<compile_context>
chip_gen: v7x
topology: tpu7x:2x2x1
jax: 0.10.0
libtpu: 0.0.40
codegen_flags: <defaults>
</compile_context>

<pallas_src>
import functools

import jax
import jax.numpy as jnp
from jax import lax
from jax.experimental import pallas as pl
from jax.experimental.pallas import tpu as pltpu

_LANES = 128


# ---------------------------------------------------------------------------
# The single fused kernel (grid = (), everything resident in VMEM)
# ---------------------------------------------------------------------------

def _stgcn_kernel(spec, kt, x_ref, p_ref, out_ref):
    """spec: name -> (row_off, rows, cols, rows_padded, n_col_chunks)."""

    def get(name):
        off, r, c, rp, nchunks = spec[name]
        chunks = []
        for j in range(nchunks):
            w = min(_LANES, c - j * _LANES)
            chunks.append(p_ref[off + j * rp: off + j * rp + r, :w])
        return chunks[0] if nchunks == 1 else jnp.concatenate(chunks, axis=-1)

    def tconv(x, name, k, act):
        # x: (B, T, N*C_in); kron'd per-tap weights (N*C_in, N*C_out).
        b_, t_, nci = x.shape
        t_out = t_ - k + 1
        rows = b_ * t_out
        xs = [x[:, d:d + t_out, :].reshape(rows, nci) for d in range(k)]

        def branch(sfx):
            acc = jnp.dot(xs[0], get(f"{name}.w{sfx}.0"),
                          preferred_element_type=jnp.float32)
            for d in range(1, k):                       # static, k <= 4
                acc = acc + jnp.dot(xs[d], get(f"{name}.w{sfx}.{d}"),
                                    preferred_element_type=jnp.float32)
            return acc + get(f"{name}.b{sfx}")

        main = branch("1")                              # residual pre-folded
        if act == "GLU":
            out = main * jax.nn.sigmoid(branch("2"))
        elif act == "sigmoid":
            out = jax.nn.sigmoid(main)
        else:  # relu
            out = jnp.maximum(main, 0.0)
        return out.reshape(b_, t_out, out.shape[-1])

    def sconv(x, name):
        # relu( x @ W + b + x ) with W = sum_k kron(Lk[k].T, theta[k]).
        b_, t_, nc = x.shape
        x2 = x.reshape(b_ * t_, nc)
        y = jnp.dot(x2, get(f"{name}.w"), preferred_element_type=jnp.float32)
        y = y + get(f"{name}.b") + x2
        return jnp.maximum(y, 0.0).reshape(b_, t_, nc)

    def lnorm(x, name, eps=1e-5):
        # LayerNorm over (N, C) == over the whole lane dim per (b, t) row.
        b_, t_, nc = x.shape
        x2 = x.reshape(b_ * t_, nc)
        mu = jnp.sum(x2, axis=-1, keepdims=True) * (1.0 / nc)
        d = x2 - mu
        var = jnp.sum(d * d, axis=-1, keepdims=True) * (1.0 / nc)
        y = d * lax.rsqrt(var + eps)
        y = y * get(f"{name}.g") + get(f"{name}.b")
        return y.reshape(b_, t_, nc)

    x = x_ref[...].astype(jnp.float32)                  # (B, T, N*C_in)

    for blk in ("blk1", "blk2"):
        x = tconv(x, f"{blk}.t1", kt, "GLU")
        x = sconv(x, f"{blk}.sp")
        x = tconv(x, f"{blk}.t2", kt, "relu")
        x = lnorm(x, f"{blk}.ln")
        # TODO(synk): nn.Dropout is identity in eval mode; training-time random masking omitted.

    x = tconv(x, "out.t1", x.shape[1], "GLU")           # kt == remaining T -> T=1
    x = lnorm(x, "out.ln")
    x = tconv(x, "out.t2", 1, "sigmoid")

    b_, t_, nc = x.shape                                # t_ == 1
    y = jnp.dot(x.reshape(b_ * t_, nc), get("out.fc.w"),
                preferred_element_type=jnp.float32) + get("out.fc.b")
    out_ref[...] = y.astype(out_ref.dtype)              # (B, N) lane-dense


# ---------------------------------------------------------------------------
# Wrapper: one pallas_call for the whole network
# ---------------------------------------------------------------------------

def stgcn_forward(x_nchw, param_buf, spec, kt):
    """x_nchw: PyTorch layout (B, C_in, T, N) -> output (B, 1, 1, N)."""
    B, c_in, T, n = x_nchw.shape
    # NCHW -> lane-dense (B, T, N*C_in) with flat index node*C + channel.
    x = jnp.transpose(x_nchw, (0, 2, 3, 1)).reshape(B, T, n * c_in)
    x = x.astype(jnp.float32)
    out = pl.pallas_call(
        functools.partial(_stgcn_kernel, spec, kt),
        out_shape=jax.ShapeDtypeStruct((B, n), jnp.float32),
        compiler_params=pltpu.CompilerParams(
            vmem_limit_bytes=32 * 1024 * 1024),
    )(x, param_buf)
    return out.reshape(B, 1, 1, n)                      # NCHW: (B, 1, T=1, N)


# ---------------------------------------------------------------------------
# Parameter preparation (trace-time, plain JAX):
#   fold residual/align into tap kt-1, split GLU halves, kron to lane-dense,
#   and pack EVERYTHING into one (rows, 128) f32 buffer + static offset spec.
# ---------------------------------------------------------------------------

def prepare_kernel_params(params, n):
    eye_n = jnp.eye(n, dtype=jnp.float32)
    leaves = []                                          # (name, 2-D f32 array)

    def add(name, arr):
        leaves.append((name, jnp.asarray(arr, jnp.float32)))

    def add_tconv(name, p, glu):
        w, b = p["w"], p["b"]                            # (kt, c_in, c_tot), (c_tot,)
        kt_, c_in, c_tot = w.shape
        c_out = c_tot // 2 if glu else c_tot
        aw, ab = p.get("align_w"), p.get("align_b")
        if aw is None:   # identity (c_in == c_out) or zero-pad (c_in < c_out)
            aw = jnp.eye(c_in, c_out, dtype=jnp.float32)
            ab = jnp.zeros((c_out,), jnp.float32)
        # residual is added pre-activation at time tap kt-1, on the main half.
        w = w.at[kt_ - 1, :, :c_out].add(aw)
        b = b.at[:c_out].add(ab)
        halves = [("1", w[..., :c_out], b[:c_out])]
        if glu:
            halves.append(("2", w[..., c_out:], b[c_out:]))
        for sfx, wh, bh in halves:
            for d in range(kt_):
                add(f"{name}.w{sfx}.{d}", jnp.kron(eye_n, wh[d]))   # (n*ci, n*co)
            add(f"{name}.b{sfx}", jnp.tile(bh, n)[None, :])

    def add_block(name, bp):
        add_tconv(f"{name}.t1", bp["tconv1"], True)
        lk, th = bp["Lk"], bp["theta"]
        W = sum(jnp.kron(lk[k].T, th[k]) for k in range(th.shape[0]))
        add(f"{name}.sp.w", W)                                       # (n*c, n*c)
        add(f"{name}.sp.b", jnp.tile(bp["sb"], n)[None, :])
        add_tconv(f"{name}.t2", bp["tconv2"], False)
        add(f"{name}.ln.g", bp["ln_g"].reshape(1, -1))
        add(f"{name}.ln.b", bp["ln_b"].reshape(1, -1))

    add_block("blk1", params["block1"])
    add_block("blk2", params["block2"])
    op = params["output"]
    add_tconv("out.t1", op["tconv1"], True)
    add("out.ln.g", op["ln_g"].reshape(1, -1))
    add("out.ln.b", op["ln_b"].reshape(1, -1))
    add_tconv("out.t2", op["tconv2"], False)
    add("out.fc.w", jnp.kron(eye_n, op["fc_w"]))                     # (n*c, n)
    add("out.fc.b", jnp.broadcast_to(op["fc_b"], (n,))[None, :])

    # Pack: each leaf's columns are split into <=128-lane chunks, rows padded
    # to a multiple of 8, chunks stacked along rows -> one contiguous buffer.
    chunks, spec, offset = [], {}, 0
    for name, arr in leaves:
        r, c = arr.shape
        rp = ((r + 7) // 8) * 8
        nchunks = (c + _LANES - 1) // _LANES
        spec[name] = (offset, r, c, rp, nchunks)
        for j in range(nchunks):
            blk = arr[:, j * _LANES:(j + 1) * _LANES]
            blk = jnp.pad(blk, ((0, rp - r), (0, _LANES - blk.shape[1])))
            chunks.append(blk)
        offset += rp * nchunks
    buf = jnp.concatenate(chunks, axis=0)                # (total_rows, 128) f32
    return buf, spec


# ---------------------------------------------------------------------------
# Deterministic synthetic parameters (shapes follow the PyTorch __init__)
# ---------------------------------------------------------------------------

def init_stgcn_params(key, ks, kt, bs, T, n, Lk):
    keys = iter(jax.random.split(key, 64))

    def w_init(shape, scale=0.1):
        return jax.random.normal(next(keys), shape, jnp.float32) * scale

    def tconv_params(c_in, c_out, k, glu):
        c_tot = 2 * c_out if glu else c_out
        p = {"w": w_init((k, c_in, c_tot)), "b": w_init((c_tot,), 0.05)}
        if c_in > c_out:                      # align uses a 1x1 conv
            p["align_w"] = w_init((c_in, c_out))
            p["align_b"] = w_init((c_out,), 0.05)
        return p

    def block_params(c):
        return {
            "tconv1": tconv_params(c[0], c[1], kt, True),
            "Lk": Lk,
            "theta": w_init((ks, c[1], c[1])),     # theta[k, in, out]
            "sb": w_init((c[1],), 0.05),
            "tconv2": tconv_params(c[1], c[2], kt, False),
            "ln_g": jnp.ones((n, c[2]), jnp.float32),
            "ln_b": jnp.zeros((n, c[2]), jnp.float32),
        }

    c_fin = bs[1][2]
    t_out = T - 4 * (kt - 1)
    return {
        "block1": block_params(bs[0]),
        "block2": block_params(bs[1]),
        "output": {
            "tconv1": tconv_params(c_fin, c_fin, t_out, True),
            "ln_g": jnp.ones((n, c_fin), jnp.float32),
            "ln_b": jnp.zeros((n, c_fin), jnp.float32),
            "tconv2": tconv_params(c_fin, c_fin, 1, False),
            "fc_w": w_init((c_fin, 1)),
            "fc_b": w_init((1,), 0.05),
        },
    }


# ---------------------------------------------------------------------------
# Plain-JAX reference (mirrors the PyTorch module, NCHW) for validation
# ---------------------------------------------------------------------------

def stgcn_reference(x, params, kt):
    def align(x, c_out, p):
        c_in = x.shape[1]
        if c_in > c_out:
            return (jnp.einsum("bitn,io->botn", x, p["align_w"])
                    + p["align_b"][None, :, None, None])
        if c_in < c_out:
            return jnp.pad(x, ((0, 0), (0, c_out - c_in), (0, 0), (0, 0)))
        return x

    def tconv(x, p, k, c_out, act):
        w, b = p["w"], p["b"]
        T_out = x.shape[2] - k + 1
        x_in = align(x, c_out, p)[:, :, k - 1:, :]
        conv = sum(jnp.einsum("bitn,io->botn", x[:, :, dt:dt + T_out, :], w[dt])
                   for dt in range(k)) + b[None, :, None, None]
        if act == "GLU":
            return (conv[:, :c_out] + x_in) * jax.nn.sigmoid(conv[:, c_out:])
        if act == "sigmoid":
            return jax.nn.sigmoid(conv + x_in)
        return jnp.maximum(conv + x_in, 0.0)

    def sconv(x, Lk, theta, b):
        x_c = jnp.einsum("knm,bitm->bitkn", Lk, x)
        x_gc = jnp.einsum("kio,bitkn->botn", theta, x_c) + b[None, :, None, None]
        return jnp.maximum(x_gc + x, 0.0)

    def lnorm(x, g, beta):
        xt = jnp.transpose(x, (0, 2, 3, 1))
        mu = jnp.mean(xt, axis=(2, 3), keepdims=True)
        var = jnp.mean((xt - mu) ** 2, axis=(2, 3), keepdims=True)
        y = (xt - mu) / jnp.sqrt(var + 1e-5) * g + beta
        return jnp.transpose(y, (0, 3, 1, 2))

    def block(x, bp):
        c1 = bp["tconv1"]["w"].shape[-1] // 2
        c2 = bp["tconv2"]["w"].shape[-1]
        x = tconv(x, bp["tconv1"], kt, c1, "GLU")
        x = sconv(x, bp["Lk"], bp["theta"], bp["sb"])
        x = tconv(x, bp["tconv2"], kt, c2, "relu")
        return lnorm(x, bp["ln_g"], bp["ln_b"])

    x = block(x, params["block1"])
    x = block(x, params["block2"])
    op = params["output"]
    c = op["fc_w"].shape[0]
    x = tconv(x, op["tconv1"], x.shape[2], c, "GLU")
    x = lnorm(x, op["ln_g"], op["ln_b"])
    x = tconv(x, op["tconv2"], 1, c, "sigmoid")
    return (jnp.einsum("bitn,io->botn", x, op["fc_w"])
            + op["fc_b"][None, :, None, None])


if __name__ == "__main__":
    key = jax.random.PRNGKey(0)
    ks, kt = 3, 3
    bs = [[2, 8, 16], [16, 8, 4]]
    T, n, B = 12, 16, 2

    k_x, k_lk, k_p = jax.random.split(key, 3)
    Lk = jax.random.normal(k_lk, (ks, n, n), jnp.float32) * (1.0 / n)
    params = init_stgcn_params(k_p, ks, kt, bs, T, n, Lk)
    param_buf, spec = prepare_kernel_params(params, n)

    # PyTorch NCHW input: (B, C_in, T, N)
    x = jax.random.normal(k_x, (B, bs[0][0], T, n), jnp.float32)

    fwd = jax.jit(lambda xx, pb: stgcn_forward(xx, pb, spec, kt))
    out = jax.block_until_ready(fwd(x, param_buf))
    assert out.shape == (B, 1, 1, n), out.shape
    assert bool(jnp.all(jnp.isfinite(out)))

    ref = stgcn_reference(x, params, kt)
    max_err = float(jnp.max(jnp.abs(out - ref)))
    assert max_err < 1e-2, max_err

    print("KERNEL_OK")
</pallas_src>

<mosaic_0001>
module attributes {stable_mosaic.version = 11 : i64} {
  func.func @_stgcn_kernel(%arg0: memref<2x12x32xf32, #tpu.memory_space<vmem>>, %arg1: memref<3944x128xf32, #tpu.memory_space<vmem>>, %arg2: memref<2x16xf32, #tpu.memory_space<vmem>>) attributes {dimension_semantics = [], scalar_prefetch = 0 : i64, scratch_operands = 0 : i64, tpu.core_type = #tpu.core_type<tc>} {
    %c0 = arith.constant 0 : index
    %c0_0 = arith.constant 0 : index
    %c0_1 = arith.constant 0 : index
    %0 = vector.load %arg0[%c0, %c0_0, %c0_1] : memref<2x12x32xf32, #tpu.memory_space<vmem>>, vector<2x12x32xf32>
    %1 = vector.extract_strided_slice %0 {offsets = [0, 0, 0], sizes = [2, 10, 32], strides = [1, 1, 1]} : vector<2x12x32xf32> to vector<2x10x32xf32>
    %2 = vector.shape_cast %1 : vector<2x10x32xf32> to vector<20x32xf32>
    %3 = vector.extract_strided_slice %0 {offsets = [0, 1, 0], sizes = [2, 10, 32], strides = [1, 1, 1]} : vector<2x12x32xf32> to vector<2x10x32xf32>
    %4 = vector.shape_cast %3 : vector<2x10x32xf32> to vector<20x32xf32>
    %5 = vector.extract_strided_slice %0 {offsets = [0, 2, 0], sizes = [2, 10, 32], strides = [1, 1, 1]} : vector<2x12x32xf32> to vector<2x10x32xf32>
    %6 = vector.shape_cast %5 : vector<2x10x32xf32> to vector<20x32xf32>
    %c0_2 = arith.constant 0 : index
    %c0_3 = arith.constant 0 : index
    %7 = vector.load %arg1[%c0_2, %c0_3] : memref<3944x128xf32, #tpu.memory_space<vmem>>, vector<32x128xf32>
    %cst = arith.constant dense<0.000000e+00> : vector<20x128xf32>
    %8 = tpu.matmul %2, %7, %cst {dimension_numbers = #tpu.dot_dimension_numbers<[1], [0], [0], [1], [0, 0, 1, 1], [], []>} : vector<20x32xf32>, vector<32x128xf32>, vector<20x128xf32> -> vector<20x128xf32>
    %c32 = arith.constant 32 : index
    %c0_4 = arith.constant 0 : index
    %9 = vector.load %arg1[%c32, %c0_4] : memref<3944x128xf32, #tpu.memory_space<vmem>>, vector<32x128xf32>
    %cst_5 = arith.constant dense<0.000000e+00> : vector<20x128xf32>
    %10 = tpu.matmul %4, %9, %cst_5 {dimension_numbers = #tpu.dot_dimension_numbers<[1], [0], [0], [1], [0, 0, 1, 1], [], []>} : vector<20x32xf32>, vector<32x128xf32>, vector<20x128xf32> -> vector<20x128xf32>
    %11 = arith.addf %8, %10 : vector<20x128xf32>
    %c64 = arith.constant 64 : index
    %c0_6 = arith.constant 0 : index
    %12 = vector.load %arg1[%c64, %c0_6] : memref<3944x128xf32, #tpu.memory_space<vmem>>, vector<32x128xf32>
    %cst_7 = arith.constant dense<0.000000e+00> : vector<20x128xf32>
    %13 = tpu.matmul %6, %12, %cst_7 {dimension_numbers = #tpu.dot_dimension_numbers<[1], [0], [0], [1], [0, 0, 1, 1], [], []>} : vector<20x32xf32>, vector<32x128xf32>, vector<20x128xf32> -> vector<20x128xf32>
    %14 = arith.addf %11, %13 : vector<20x128xf32>
    %c96 = arith.constant 96 : index
    %c0_8 = arith.constant 0 : index
    %15 = vector.load %arg1[%c96, %c0_8] : memref<3944x128xf32, #tpu.memory_space<vmem>>, vector<1x128xf32>
    %16 = vector.broadcast %15 : vector<1x128xf32> to vector<20x128xf32>
    %17 = arith.addf %14, %16 : vector<20x128xf32>
    %c104 = arith.constant 104 : index
    %c0_9 = arith.constant 0 : index
    %18 = vector.load %arg1[%c104, %c0_9] : memref<3944x128xf32, #tpu.memory_space<vmem>>, vector<32x128xf32>
    %cst_10 = arith.constant dense<0.000000e+00> : vector<20x128xf32>
    %19 = tpu.matmul %2, %18, %cst_10 {dimension_numbers = #tpu.dot_dimension_numbers<[1], [0], [0], [1], [0, 0, 1, 1], [], []>} : vector<20x32xf32>, vector<32x128xf32>, vector<20x128xf32> -> vector<20x128xf32>
    %c136 = arith.constant 136 : index
    %c0_11 = arith.constant 0 : index
    %20 = vector.load %arg1[%c136, %c0_11] : memref<3944x128xf32, #tpu.memory_space<vmem>>, vector<32x128xf32>
    %cst_12 = arith.constant dense<0.000000e+00> : vector<20x128xf32>
    %21 = tpu.matmul %4, %20, %cst_12 {dimension_numbers = #tpu.dot_dimension_numbers<[1], [0], [0], [1], [0, 0, 1, 1], [], []>} : vector<20x32xf32>, vector<32x128xf32>, vector<20x128xf32> -> vector<20x128xf32>
    %22 = arith.addf %19, %21 : vector<20x128xf32>
    %c168 = arith.constant 168 : index
    %c0_13 = arith.constant 0 : index
    %23 = vector.load %arg1[%c168, %c0_13] : memref<3944x128xf32, #tpu.memory_space<vmem>>, vector<32x128xf32>
    %cst_14 = arith.constant dense<0.000000e+00> : vector<20x128xf32>
    %24 = tpu.matmul %6, %23, %cst_14 {dimension_numbers = #tpu.dot_dimension_numbers<[1], [0], [0], [1], [0, 0, 1, 1], [], []>} : vector<20x32xf32>, vector<32x128xf32>, vector<20x128xf32> -> vector<20x128xf32>
    %25 = arith.addf %22, %24 : vector<20x128xf32>
    %c200 = arith.constant 200 : index
    %c0_15 = arith.constant 0 : index
    %26 = vector.load %arg1[%c200, %c0_15] : memref<3944x128xf32, #tpu.memory_space<vmem>>, vector<1x128xf32>
    %27 = vector.broadcast %26 : vector<1x128xf32> to vector<20x128xf32>
    %28 = arith.addf %25, %27 : vector<20x128xf32>
    %29 = arith.negf %28 : vector<20x128xf32>
    %30 = math.exp %29 : vector<20x128xf32>
    %cst_16 = arith.constant 1.000000e+00 : f32
    %31 = vector.broadcast %cst_16 : f32 to vector<20x128xf32>
    %32 = arith.addf %31, %30 : vector<20x128xf32>
    %33 = arith.divf %31, %32 : vector<20x128xf32>
    %34 = arith.mulf %17, %33 : vector<20x128xf32>
    %35 = vector.shape_cast %34 : vector<20x128xf32> to vector<2x10x128xf32>
    %36 = vector.shape_cast %35 : vector<2x10x128xf32> to vector<20x128xf32>
    %c208 = arith.constant 208 : index
    %c0_17 = arith.constant 0 : index
    %37 = vector.load %arg1[%c208, %c0_17] : memref<3944x128xf32, #tpu.memory_space<vmem>>, vector<128x128xf32>
    %cst_18 = arith.constant dense<0.000000e+00> : vector<20x128xf32>
    %38 = tpu.matmul %36, %37, %cst_18 {dimension_numbers = #tpu.dot_dimension_numbers<[1], [0], [0], [1], [0, 0, 1, 1], [], []>} : vector<20x128xf32>, vector<128x128xf32>, vector<20x128xf32> -> vector<20x128xf32>
    %c336 = arith.constant 336 : index
    %c0_19 = arith.constant 0 : index
    %39 = vector.load %arg1[%c336, %c0_19] : memref<3944x128xf32, #tpu.memory_space<vmem>>, vector<1x128xf32>
    %40 = vector.broadcast %39 : vector<1x128xf32> to vector<20x128xf32>
    %41 = arith.addf %38, %40 : vector<20x128xf32>
    %42 = arith.addf %41, %36 : vector<20x128xf32>
    %cst_20 = arith.constant 0.000000e+00 : f32
    %43 = vector.broadcast %cst_20 : f32 to vector<20x128xf32>
    %44 = arith.maximumf %42, %43 : vector<20x128xf32>
    %45 = vector.shape_cast %44 : vector<20x128xf32> to vector<2x10x128xf32>
    %46 = vector.extract_strided_slice %45 {offsets = [0, 0, 0], sizes = [2, 8, 128], strides = [1, 1, 1]} : vector<2x10x128xf32> to vector<2x8x128xf32>
    %47 = vector.shape_cast %46 : vector<2x8x128xf32> to vector<16x128xf32>
    %48 = vector.extract_strided_slice %45 {offsets = [0, 1, 0], sizes = [2, 8, 128], strides = [1, 1, 1]} : vector<2x10x128xf32> to vector<2x8x128xf32>
    %49 = vector.shape_cast %48 : vector<2x8x128xf32> to vector<16x128xf32>
    %50 = vector.extract_strided_slice %45 {offsets = [0, 2, 0], sizes = [2, 8, 128], strides = [1, 1, 1]} : vector<2x10x128xf32> to vector<2x8x128xf32>
    %51 = vector.shape_cast %50 : vector<2x8x128xf32> to vector<16x128xf32>
    %c344 = arith.constant 344 : index
    %c0_21 = arith.constant 0 : index
    %52 = vector.load %arg1[%c344, %c0_21] : memref<3944x128xf32, #tpu.memory_space<vmem>>, vector<128x128xf32>
    %c472 = arith.constant 472 : index
    %c0_22 = arith.constant 0 : index
    %53 = vector.load %arg1[%c472, %c0_22] : memref<3944x128xf32, #tpu.memory_space<vmem>>, vector<128x128xf32>
    %54 = tpu.concatenate %52, %53 in 1 : vector<128x128xf32>, vector<128x128xf32> -> vector<128x256xf32>
    %cst_23 = arith.constant dense<0.000000e+00> : vector<16x256xf32>
    %55 = tpu.matmul %47, %54, %cst_23 {dimension_numbers = #tpu.dot_dimension_numbers<[1], [0], [0], [1], [0, 0, 1, 1], [], []>} : vector<16x128xf32>, vector<128x256xf32>, vector<16x256xf32> -> vector<16x256xf32>
    %c600 = arith.constant 600 : index
    %c0_24 = arith.constant 0 : index
    %56 = vector.load %arg1[%c600, %c0_24] : memref<3944x128xf32, #tpu.memory_space<vmem>>, vector<128x128xf32>
    %c728 = arith.constant 728 : index
    %c0_25 = arith.constant 0 : index
    %57 = vector.load %arg1[%c728, %c0_25] : memref<3944x128xf32, #tpu.memory_space<vmem>>, vector<128x128xf32>
    %58 = tpu.concatenate %56, %57 in 1 : vector<128x128xf32>, vector<128x128xf32> -> vector<128x256xf32>
    %cst_26 = arith.constant dense<0.000000e+00> : vector<16x256xf32>
    %59 = tpu.matmul %49, %58, %cst_26 {dimension_numbers = #tpu.dot_dimension_numbers<[1], [0], [0], [1], [0, 0, 1, 1], [], []>} : vector<16x128xf32>, vector<128x256xf32>, vector<16x256xf32> -> vector<16x256xf32>
    %60 = arith.addf %55, %59 : vector<16x256xf32>
    %c856 = arith.constant 856 : index
    %c0_27 = arith.constant 0 : index
    %61 = vector.load %arg1[%c856, %c0_27] : memref<3944x128xf32, #tpu.memory_space<vmem>>, vector<128x128xf32>
    %c984 = arith.constant 984 : index
    %c0_28 = arith.constant 0 : index
    %62 = vector.load %arg1[%c984, %c0_28] : memref<3944x128xf32, #tpu.memory_space<vmem>>, vector<128x128xf32>
    %63 = tpu.concatenate %61, %62 in 1 : vector<128x128xf32>, vector<128x128xf32> -> vector<128x256xf32>
    %cst_29 = arith.constant dense<0.000000e+00> : vector<16x256xf32>
    %64 = tpu.matmul %51, %63, %cst_29 {dimension_numbers = #tpu.dot_dimension_numbers<[1], [0], [0], [1], [0, 0, 1, 1], [], []>} : vector<16x128xf32>, vector<128x256xf32>, vector<16x256xf32> -> vector<16x256xf32>
    %65 = arith.addf %60, %64 : vector<16x256xf32>
    %c1112 = arith.constant 1112 : index
    %c0_30 = arith.constant 0 : index
    %66 = vector.load %arg1[%c1112, %c0_30] : memref<3944x128xf32, #tpu.memory_space<vmem>>, vector<1x128xf32>
    %c1120 = arith.constant 1120 : index
    %c0_31 = arith.constant 0 : index
    %67 = vector.load %arg1[%c1120, %c0_31] : memref<3944x128xf32, #tpu.memory_space<vmem>>, vector<1x128xf32>
    %68 = tpu.concatenate %66, %67 in 1 : vector<1x128xf32>, vector<1x128xf32> -> vector<1x256xf32>
    %69 = vector.broadcast %68 : vector<1x256xf32> to vector<16x256xf32>
    %70 = arith.addf %65, %69 : vector<16x256xf32>
    %cst_32 = arith.constant 0.000000e+00 : f32
    %71 = vector.broadcast %cst_32 : f32 to vector<16x256xf32>
    %72 = arith.maximumf %70, %71 : vector<16x256xf32>
    %73 = vector.shape_cast %72 : vector<16x256xf32> to vector<2x8x256xf32>
    %74 = vector.shape_cast %73 : vector<2x8x256xf32> to vector<16x256xf32>
    %cst_33 = arith.constant dense<0.000000e+00> : vector<16xf32>
    %75 = vector.multi_reduction <add>, %74, %cst_33 [1] : vector<16x256xf32> to vector<16xf32>
    %76 = vector.shape_cast %75 : vector<16xf32> to vector<16x1xf32>
    %cst_34 = arith.constant 3.906250e-03 : f32
    %77 = vector.broadcast %cst_34 : f32 to vector<16x1xf32>
    %78 = arith.mulf %76, %77 : vector<16x1xf32>
    %79 = vector.broadcast %78 : vector<16x1xf32> to vector<16x256xf32>
    %80 = arith.subf %74, %79 : vector<16x256xf32>
    %81 = arith.mulf %80, %80 : vector<16x256xf32>
    %cst_35 = arith.constant dense<0.000000e+00> : vector<16xf32>
    %82 = vector.multi_reduction <add>, %81, %cst_35 [1] : vector<16x256xf32> to vector<16xf32>
    %83 = vector.shape_cast %82 : vector<16xf32> to vector<16x1xf32>
    %cst_36 = arith.constant 3.906250e-03 : f32
    %84 = vector.broadcast %cst_36 : f32 to vector<16x1xf32>
    %85 = arith.mulf %83, %84 : vector<16x1xf32>
    %cst_37 = arith.constant 9.99999974E-6 : f32
    %86 = vector.broadcast %cst_37 : f32 to vector<16x1xf32>
    %87 = arith.addf %85, %86 : vector<16x1xf32>
    %88 = math.rsqrt %87 : vector<16x1xf32>
    %89 = vector.broadcast %88 : vector<16x1xf32> to vector<16x256xf32>
    %90 = arith.mulf %80, %89 : vector<16x256xf32>
    %c1128 = arith.constant 1128 : index
    %c0_38 = arith.constant 0 : index
    %91 = vector.load %arg1[%c1128, %c0_38] : memref<3944x128xf32, #tpu.memory_space<vmem>>, vector<1x128xf32>
    %c1136 = arith.constant 1136 : index
    %c0_39 = arith.constant 0 : index
    %92 = vector.load %arg1[%c1136, %c0_39] : memref<3944x128xf32, #tpu.memory_space<vmem>>, vector<1x128xf32>
    %93 = tpu.concatenate %91, %92 in 1 : vector<1x128xf32>, vector<1x128xf32> -> vector<1x256xf32>
    %94 = vector.broadcast %93 : vector<1x256xf32> to vector<16x256xf32>
    %95 = arith.mulf %90, %94 : vector<16x256xf32>
    %c1144 = arith.constant 1144 : index
    %c0_40 = arith.constant 0 : index
    %96 = vector.load %arg1[%c1144, %c0_40] : memref<3944x128xf32, #tpu.memory_space<vmem>>, vector<1x128xf32>
    %c1152 = arith.constant 1152 : index
    %c0_41 = arith.constant 0 : index
    %97 = vector.load %arg1[%c1152, %c0_41] : memref<3944x128xf32, #tpu.memory_space<vmem>>, vector<1x128xf32>
    %98 = tpu.concatenate %96, %97 in 1 : vector<1x128xf32>, vector<1x128xf32> -> vector<1x256xf32>
    %99 = vector.broadcast %98 : vector<1x256xf32> to vector<16x256xf32>
    %100 = arith.addf %95, %99 : vector<16x256xf32>
    %101 = vector.shape_cast %100 : vector<16x256xf32> to vector<2x8x256xf32>
    %102 = vector.extract_strided_slice %101 {offsets = [0, 0, 0], sizes = [2, 6, 256], strides = [1, 1, 1]} : vector<2x8x256xf32> to vector<2x6x256xf32>
    %103 = vector.shape_cast %102 : vector<2x6x256xf32> to vector<12x256xf32>
    %104 = vector.extract_strided_slice %101 {offsets = [0, 1, 0], sizes = [2, 6, 256], strides = [1, 1, 1]} : vector<2x8x256xf32> to vector<2x6x256xf32>
    %105 = vector.shape_cast %104 : vector<2x6x256xf32> to vector<12x256xf32>
    %106 = vector.extract_strided_slice %101 {offsets = [0, 2, 0], sizes = [2, 6, 256], strides = [1, 1, 1]} : vector<2x8x256xf32> to vector<2x6x256xf32>
    %107 = vector.shape_cast %106 : vector<2x6x256xf32> to vector<12x256xf32>
    %c1160 = arith.constant 1160 : index
    %c0_42 = arith.constant 0 : index
    %108 = vector.load %arg1[%c1160, %c0_42] : memref<3944x128xf32, #tpu.memory_space<vmem>>, vector<256x128xf32>
    %cst_43 = arith.constant dense<0.000000e+00> : vector<12x128xf32>
    %109 = tpu.matmul %103, %108, %cst_43 {dimension_numbers = #tpu.dot_dimension_numbers<[1], [0], [0], [1], [0, 0, 1, 1], [], []>} : vector<12x256xf32>, vector<256x128xf32>, vector<12x128xf32> -> vector<12x128xf32>
    %c1416 = arith.constant 1416 : index
    %c0_44 = arith.constant 0 : index
    %110 = vector.load %arg1[%c1416, %c0_44] : memref<3944x128xf32, #tpu.memory_space<vmem>>, vector<256x128xf32>
    %cst_45 = arith.constant dense<0.000000e+00> : vector<12x128xf32>
    %111 = tpu.matmul %105, %110, %cst_45 {dimension_numbers = #tpu.dot_dimension_numbers<[1], [0], [0], [1], [0, 0, 1, 1], [], []>} : vector<12x256xf32>, vector<256x128xf32>, vector<12x128xf32> -> vector<12x128xf32>
    %112 = arith.addf %109, %111 : vector<12x128xf32>
    %c1672 = arith.constant 1672 : index
    %c0_46 = arith.constant 0 : index
    %113 = vector.load %arg1[%c1672, %c0_46] : memref<3944x128xf32, #tpu.memory_space<vmem>>, vector<256x128xf32>
    %cst_47 = arith.constant dense<0.000000e+00> : vector<12x128xf32>
    %114 = tpu.matmul %107, %113, %cst_47 {dimension_numbers = #tpu.dot_dimension_numbers<[1], [0], [0], [1], [0, 0, 1, 1], [], []>} : vector<12x256xf32>, vector<256x128xf32>, vector<12x128xf32> -> vector<12x128xf32>
    %115 = arith.addf %112, %114 : vector<12x128xf32>
    %c1928 = arith.constant 1928 : index
    %c0_48 = arith.constant 0 : index
    %116 = vector.load %arg1[%c1928, %c0_48] : memref<3944x128xf32, #tpu.memory_space<vmem>>, vector<1x128xf32>
    %117 = vector.broadcast %116 : vector<1x128xf32> to vector<12x128xf32>
    %118 = arith.addf %115, %117 : vector<12x128xf32>
    %c1936 = arith.constant 1936 : index
    %c0_49 = arith.constant 0 : index
    %119 = vector.load %arg1[%c1936, %c0_49] : memref<3944x128xf32, #tpu.memory_space<vmem>>, vector<256x128xf32>
    %cst_50 = arith.constant dense<0.000000e+00> : vector<12x128xf32>
    %120 = tpu.matmul %103, %119, %cst_50 {dimension_numbers = #tpu.dot_dimension_numbers<[1], [0], [0], [1], [0, 0, 1, 1], [], []>} : vector<12x256xf32>, vector<256x128xf32>, vector<12x128xf32> -> vector<12x128xf32>
    %c2192 = arith.constant 2192 : index
    %c0_51 = arith.constant 0 : index
    %121 = vector.load %arg1[%c2192, %c0_51] : memref<3944x128xf32, #tpu.memory_space<vmem>>, vector<256x128xf32>
    %cst_52 = arith.constant dense<0.000000e+00> : vector<12x128xf32>
    %122 = tpu.matmul %105, %121, %cst_52 {dimension_numbers = #tpu.dot_dimension_numbers<[1], [0], [0], [1], [0, 0, 1, 1], [], []>} : vector<12x256xf32>, vector<256x128xf32>, vector<12x128xf32> -> vector<12x128xf32>
    %123 = arith.addf %120, %122 : vector<12x128xf32>
    %c2448 = arith.constant 2448 : index
    %c0_53 = arith.constant 0 : index
    %124 = vector.load %arg1[%c2448, %c0_53] : memref<3944x128xf32, #tpu.memory_space<vmem>>, vector<256x128xf32>
    %cst_54 = arith.constant dense<0.000000e+00> : vector<12x128xf32>
    %125 = tpu.matmul %107, %124, %cst_54 {dimension_numbers = #tpu.dot_dimension_numbers<[1], [0], [0], [1], [0, 0, 1, 1], [], []>} : vector<12x256xf32>, vector<256x128xf32>, vector<12x128xf32> -> vector<12x128xf32>
    %126 = arith.addf %123, %125 : vector<12x128xf32>
    %c2704 = arith.constant 2704 : index
    %c0_55 = arith.constant 0 : index
    %127 = vector.load %arg1[%c2704, %c0_55] : memref<3944x128xf32, #tpu.memory_space<vmem>>, vector<1x128xf32>
    %128 = vector.broadcast %127 : vector<1x128xf32> to vector<12x128xf32>
    %129 = arith.addf %126, %128 : vector<12x128xf32>
    %130 = arith.negf %129 : vector<12x128xf32>
    %131 = math.exp %130 : vector<12x128xf32>
    %cst_56 = arith.constant 1.000000e+00 : f32
    %132 = vector.broadcast %cst_56 : f32 to vector<12x128xf32>
    %133 = arith.addf %132, %131 : vector<12x128xf32>
    %134 = arith.divf %132, %133 : vector<12x128xf32>
    %135 = arith.mulf %118, %134 : vector<12x128xf32>
    %136 = vector.shape_cast %135 : vector<12x128xf32> to vector<2x6x128xf32>
    %137 = vector.shape_cast %136 : vector<2x6x128xf32> to vector<12x128xf32>
    %c2712 = arith.constant 2712 : index
    %c0_57 = arith.constant 0 : index
    %138 = vector.load %arg1[%c2712, %c0_57] : memref<3944x128xf32, #tpu.memory_space<vmem>>, vector<128x128xf32>
    %cst_58 = arith.constant dense<0.000000e+00> : vector<12x128xf32>
    %139 = tpu.matmul %137, %138, %cst_58 {dimension_numbers = #tpu.dot_dimension_numbers<[1], [0], [0], [1], [0, 0, 1, 1], [], []>} : vector<12x128xf32>, vector<128x128xf32>, vector<12x128xf32> -> vector<12x128xf32>
    %c2840 = arith.constant 2840 : index
    %c0_59 = arith.constant 0 : index
    %140 = vector.load %arg1[%c2840, %c0_59] : memref<3944x128xf32, #tpu.memory_space<vmem>>, vector<1x128xf32>
    %141 = vector.broadcast %140 : vector<1x128xf32> to vector<12x128xf32>
    %142 = arith.addf %139, %141 : vector<12x128xf32>
    %143 = arith.addf %142, %137 : vector<12x128xf32>
    %cst_60 = arith.constant 0.000000e+00 : f32
    %144 = vector.broadcast %cst_60 : f32 to vector<12x128xf32>
    %145 = arith.maximumf %143, %144 : vector<12x128xf32>
    %146 = vector.shape_cast %145 : vector<12x128xf32> to vector<2x6x128xf32>
    %147 = vector.extract_strided_slice %146 {offsets = [0, 0, 0], sizes = [2, 4, 128], strides = [1, 1, 1]} : vector<2x6x128xf32> to vector<2x4x128xf32>
    %148 = vector.shape_cast %147 : vector<2x4x128xf32> to vector<8x128xf32>
    %149 = vector.extract_strided_slice %146 {offsets = [0, 1, 0], sizes = [2, 4, 128], strides = [1, 1, 1]} : vector<2x6x128xf32> to vector<2x4x128xf32>
    %150 = vector.shape_cast %149 : vector<2x4x128xf32> to vector<8x128xf32>
    %151 = vector.extract_strided_slice %146 {offsets = [0, 2, 0], sizes = [2, 4, 128], strides = [1, 1, 1]} : vector<2x6x128xf32> to vector<2x4x128xf32>
    %152 = vector.shape_cast %151 : vector<2x4x128xf32> to vector<8x128xf32>
    %c2848 = arith.constant 2848 : index
    %c0_61 = arith.constant 0 : index
    %153 = vector.load %arg1[%c2848, %c0_61] : memref<3944x128xf32, #tpu.memory_space<vmem>>, vector<128x64xf32>
    %cst_62 = arith.constant dense<0.000000e+00> : vector<8x64xf32>
    %154 = tpu.matmul %148, %153, %cst_62 {dimension_numbers = #tpu.dot_dimension_numbers<[1], [0], [0], [1], [0, 0, 1, 1], [], []>} : vector<8x128xf32>, vector<128x64xf32>, vector<8x64xf32> -> vector<8x64xf32>
    %c2976 = arith.constant 2976 : index
    %c0_63 = arith.constant 0 : index
    %155 = vector.load %arg1[%c2976, %c0_63] : memref<3944x128xf32, #tpu.memory_space<vmem>>, vector<128x64xf32>
    %cst_64 = arith.constant dense<0.000000e+00> : vector<8x64xf32>
    %156 = tpu.matmul %150, %155, %cst_64 {dimension_numbers = #tpu.dot_dimension_numbers<[1], [0], [0], [1], [0, 0, 1, 1], [], []>} : vector<8x128xf32>, vector<128x64xf32>, vector<8x64xf32> -> vector<8x64xf32>
    %157 = arith.addf %154, %156 : vector<8x64xf32>
    %c3104 = arith.constant 3104 : index
    %c0_65 = arith.constant 0 : index
    %158 = vector.load %arg1[%c3104, %c0_65] : memref<3944x128xf32, #tpu.memory_space<vmem>>, vector<128x64xf32>
    %cst_66 = arith.constant dense<0.000000e+00> : vector<8x64xf32>
    %159 = tpu.matmul %152, %158, %cst_66 {dimension_numbers = #tpu.dot_dimension_numbers<[1], [0], [0], [1], [0, 0, 1, 1], [], []>} : vector<8x128xf32>, vector<128x64xf32>, vector<8x64xf32> -> vector<8x64xf32>
    %160 = arith.addf %157, %159 : vector<8x64xf32>
    %c3232 = arith.constant 3232 : index
    %c0_67 = arith.constant 0 : index
    %161 = vector.load %arg1[%c3232, %c0_67] : memref<3944x128xf32, #tpu.memory_space<vmem>>, vector<1x64xf32>
    %162 = vector.broadcast %161 : vector<1x64xf32> to vector<8x64xf32>
    %163 = arith.addf %160, %162 : vector<8x64xf32>
    %cst_68 = arith.constant 0.000000e+00 : f32
    %164 = vector.broadcast %cst_68 : f32 to vector<8x64xf32>
    %165 = arith.maximumf %163, %164 : vector<8x64xf32>
    %166 = vector.shape_cast %165 : vector<8x64xf32> to vector<2x4x64xf32>
    %167 = vector.shape_cast %166 : vector<2x4x64xf32> to vector<8x64xf32>
    %cst_69 = arith.constant dense<0.000000e+00> : vector<8xf32>
    %168 = vector.multi_reduction <add>, %167, %cst_69 [1] : vector<8x64xf32> to vector<8xf32>
    %169 = vector.shape_cast %168 : vector<8xf32> to vector<8x1xf32>
    %cst_70 = arith.constant 1.562500e-02 : f32
    %170 = vector.broadcast %cst_70 : f32 to vector<8x1xf32>
    %171 = arith.mulf %169, %170 : vector<8x1xf32>
    %172 = vector.broadcast %171 : vector<8x1xf32> to vector<8x64xf32>
    %173 = arith.subf %167, %172 : vector<8x64xf32>
    %174 = arith.mulf %173, %173 : vector<8x64xf32>
    %cst_71 = arith.constant dense<0.000000e+00> : vector<8xf32>
    %175 = vector.multi_reduction <add>, %174, %cst_71 [1] : vector<8x64xf32> to vector<8xf32>
    %176 = vector.shape_cast %175 : vector<8xf32> to vector<8x1xf32>
    %cst_72 = arith.constant 1.562500e-02 : f32
    %177 = vector.broadcast %cst_72 : f32 to vector<8x1xf32>
    %178 = arith.mulf %176, %177 : vector<8x1xf32>
    %cst_73 = arith.constant 9.99999974E-6 : f32
    %179 = vector.broadcast %cst_73 : f32 to vector<8x1xf32>
    %180 = arith.addf %178, %179 : vector<8x1xf32>
    %181 = math.rsqrt %180 : vector<8x1xf32>
    %182 = vector.broadcast %181 : vector<8x1xf32> to vector<8x64xf32>
    %183 = arith.mulf %173, %182 : vector<8x64xf32>
    %c3240 = arith.constant 3240 : index
    %c0_74 = arith.constant 0 : index
    %184 = vector.load %arg1[%c3240, %c0_74] : memref<3944x128xf32, #tpu.memory_space<vmem>>, vector<1x64xf32>
    %185 = vector.broadcast %184 : vector<1x64xf32> to vector<8x64xf32>
    %186 = arith.mulf %183, %185 : vector<8x64xf32>
    %c3248 = arith.constant 3248 : index
    %c0_75 = arith.constant 0 : index
    %187 = vector.load %arg1[%c3248, %c0_75] : memref<3944x128xf32, #tpu.memory_space<vmem>>, vector<1x64xf32>
    %188 = vector.broadcast %187 : vector<1x64xf32> to vector<8x64xf32>
    %189 = arith.addf %186, %188 : vector<8x64xf32>
    %190 = vector.shape_cast %189 : vector<8x64xf32> to vector<2x4x64xf32>
    %191 = vector.extract_strided_slice %190 {offsets = [0, 0, 0], sizes = [2, 1, 64], strides = [1, 1, 1]} : vector<2x4x64xf32> to vector<2x1x64xf32>
    %192 = vector.shape_cast %191 : vector<2x1x64xf32> to vector<2x64xf32>
    %193 = vector.extract_strided_slice %190 {offsets = [0, 1, 0], sizes = [2, 1, 64], strides = [1, 1, 1]} : vector<2x4x64xf32> to vector<2x1x64xf32>
    %194 = vector.shape_cast %193 : vector<2x1x64xf32> to vector<2x64xf32>
    %195 = vector.extract_strided_slice %190 {offsets = [0, 2, 0], sizes = [2, 1, 64], strides = [1, 1, 1]} : vector<2x4x64xf32> to vector<2x1x64xf32>
    %196 = vector.shape_cast %195 : vector<2x1x64xf32> to vector<2x64xf32>
    %197 = vector.extract_strided_slice %190 {offsets = [0, 3, 0], sizes = [2, 1, 64], strides = [1, 1, 1]} : vector<2x4x64xf32> to vector<2x1x64xf32>
    %198 = vector.shape_cast %197 : vector<2x1x64xf32> to vector<2x64xf32>
    %c3256 = arith.constant 3256 : index
    %c0_76 = arith.constant 0 : index
    %199 = vector.load %arg1[%c3256, %c0_76] : memref<3944x128xf32, #tpu.memory_space<vmem>>, vector<64x64xf32>
    %cst_77 = arith.constant dense<0.000000e+00> : vector<2x64xf32>
    %200 = tpu.matmul %192, %199, %cst_77 {dimension_numbers = #tpu.dot_dimension_numbers<[1], [0], [0], [1], [0, 0, 1, 1], [], []>} : vector<2x64xf32>, vector<64x64xf32>, vector<2x64xf32> -> vector<2x64xf32>
    %c3320 = arith.constant 3320 : index
    %c0_78 = arith.constant 0 : index
    %201 = vector.load %arg1[%c3320, %c0_78] : memref<3944x128xf32, #tpu.memory_space<vmem>>, vector<64x64xf32>
    %cst_79 = arith.constant dense<0.000000e+00> : vector<2x64xf32>
    %202 = tpu.matmul %194, %201, %cst_79 {dimension_numbers = #tpu.dot_dimension_numbers<[1], [0], [0], [1], [0, 0, 1, 1], [], []>} : vector<2x64xf32>, vector<64x64xf32>, vector<2x64xf32> -> vector<2x64xf32>
    %203 = arith.addf %200, %202 : vector<2x64xf32>
    %c3384 = arith.constant 3384 : index
    %c0_80 = arith.constant 0 : index
    %204 = vector.load %arg1[%c3384, %c0_80] : memref<3944x128xf32, #tpu.memory_space<vmem>>, vector<64x64xf32>
    %cst_81 = arith.constant dense<0.000000e+00> : vector<2x64xf32>
    %205 = tpu.matmul %196, %204, %cst_81 {dimension_numbers = #tpu.dot_dimension_numbers<[1], [0], [0], [1], [0, 0, 1, 1], [], []>} : vector<2x64xf32>, vector<64x64xf32>, vector<2x64xf32> -> vector<2x64xf32>
    %206 = arith.addf %203, %205 : vector<2x64xf32>
    %c3448 = arith.constant 3448 : index
    %c0_82 = arith.constant 0 : index
    %207 = vector.load %arg1[%c3448, %c0_82] : memref<3944x128xf32, #tpu.memory_space<vmem>>, vector<64x64xf32>
    %cst_83 = arith.constant dense<0.000000e+00> : vector<2x64xf32>
    %208 = tpu.matmul %198, %207, %cst_83 {dimension_numbers = #tpu.dot_dimension_numbers<[1], [0], [0], [1], [0, 0, 1, 1], [], []>} : vector<2x64xf32>, vector<64x64xf32>, vector<2x64xf32> -> vector<2x64xf32>
    %209 = arith.addf %206, %208 : vector<2x64xf32>
    %c3512 = arith.constant 3512 : index
    %c0_84 = arith.constant 0 : index
    %210 = vector.load %arg1[%c3512, %c0_84] : memref<3944x128xf32, #tpu.memory_space<vmem>>, vector<1x64xf32>
    %211 = vector.broadcast %210 : vector<1x64xf32> to vector<2x64xf32>
    %212 = arith.addf %209, %211 : vector<2x64xf32>
    %c3520 = arith.constant 3520 : index
    %c0_85 = arith.constant 0 : index
    %213 = vector.load %arg1[%c3520, %c0_85] : memref<3944x128xf32, #tpu.memory_space<vmem>>, vector<64x64xf32>
    %cst_86 = arith.constant dense<0.000000e+00> : vector<2x64xf32>
    %214 = tpu.matmul %192, %213, %cst_86 {dimension_numbers = #tpu.dot_dimension_numbers<[1], [0], [0], [1], [0, 0, 1, 1], [], []>} : vector<2x64xf32>, vector<64x64xf32>, vector<2x64xf32> -> vector<2x64xf32>
    %c3584 = arith.constant 3584 : index
    %c0_87 = arith.constant 0 : index
    %215 = vector.load %arg1[%c3584, %c0_87] : memref<3944x128xf32, #tpu.memory_space<vmem>>, vector<64x64xf32>
    %cst_88 = arith.constant dense<0.000000e+00> : vector<2x64xf32>
    %216 = tpu.matmul %194, %215, %cst_88 {dimension_numbers = #tpu.dot_dimension_numbers<[1], [0], [0], [1], [0, 0, 1, 1], [], []>} : vector<2x64xf32>, vector<64x64xf32>, vector<2x64xf32> -> vector<2x64xf32>
    %217 = arith.addf %214, %216 : vector<2x64xf32>
    %c3648 = arith.constant 3648 : index
    %c0_89 = arith.constant 0 : index
    %218 = vector.load %arg1[%c3648, %c0_89] : memref<3944x128xf32, #tpu.memory_space<vmem>>, vector<64x64xf32>
    %cst_90 = arith.constant dense<0.000000e+00> : vector<2x64xf32>
    %219 = tpu.matmul %196, %218, %cst_90 {dimension_numbers = #tpu.dot_dimension_numbers<[1], [0], [0], [1], [0, 0, 1, 1], [], []>} : vector<2x64xf32>, vector<64x64xf32>, vector<2x64xf32> -> vector<2x64xf32>
    %220 = arith.addf %217, %219 : vector<2x64xf32>
    %c3712 = arith.constant 3712 : index
    %c0_91 = arith.constant 0 : index
    %221 = vector.load %arg1[%c3712, %c0_91] : memref<3944x128xf32, #tpu.memory_space<vmem>>, vector<64x64xf32>
    %cst_92 = arith.constant dense<0.000000e+00> : vector<2x64xf32>
    %222 = tpu.matmul %198, %221, %cst_92 {dimension_numbers = #tpu.dot_dimension_numbers<[1], [0], [0], [1], [0, 0, 1, 1], [], []>} : vector<2x64xf32>, vector<64x64xf32>, vector<2x64xf32> -> vector<2x64xf32>
    %223 = arith.addf %220, %222 : vector<2x64xf32>
    %c3776 = arith.constant 3776 : index
    %c0_93 = arith.constant 0 : index
    %224 = vector.load %arg1[%c3776, %c0_93] : memref<3944x128xf32, #tpu.memory_space<vmem>>, vector<1x64xf32>
    %225 = vector.broadcast %224 : vector<1x64xf32> to vector<2x64xf32>
    %226 = arith.addf %223, %225 : vector<2x64xf32>
    %227 = arith.negf %226 : vector<2x64xf32>
    %228 = math.exp %227 : vector<2x64xf32>
    %cst_94 = arith.constant 1.000000e+00 : f32
    %229 = vector.broadcast %cst_94 : f32 to vector<2x64xf32>
    %230 = arith.addf %229, %228 : vector<2x64xf32>
    %231 = arith.divf %229, %230 : vector<2x64xf32>
    %232 = arith.mulf %212, %231 : vector<2x64xf32>
    %233 = vector.shape_cast %232 : vector<2x64xf32> to vector<2x1x64xf32>
    %234 = vector.shape_cast %233 : vector<2x1x64xf32> to vector<2x64xf32>
    %cst_95 = arith.constant dense<0.000000e+00> : vector<2xf32>
    %235 = vector.multi_reduction <add>, %234, %cst_95 [1] : vector<2x64xf32> to vector<2xf32>
    %236 = vector.shape_cast %235 : vector<2xf32> to vector<2x1xf32>
    %cst_96 = arith.constant 1.562500e-02 : f32
    %237 = vector.broadcast %cst_96 : f32 to vector<2x1xf32>
    %238 = arith.mulf %236, %237 : vector<2x1xf32>
    %239 = vector.broadcast %238 : vector<2x1xf32> to vector<2x64xf32>
    %240 = arith.subf %234, %239 : vector<2x64xf32>
    %241 = arith.mulf %240, %240 : vector<2x64xf32>
    %cst_97 = arith.constant dense<0.000000e+00> : vector<2xf32>
    %242 = vector.multi_reduction <add>, %241, %cst_97 [1] : vector<2x64xf32> to vector<2xf32>
    %243 = vector.shape_cast %242 : vector<2xf32> to vector<2x1xf32>
    %cst_98 = arith.constant 1.562500e-02 : f32
    %244 = vector.broadcast %cst_98 : f32 to vector<2x1xf32>
    %245 = arith.mulf %243, %244 : vector<2x1xf32>
    %cst_99 = arith.constant 9.99999974E-6 : f32
    %246 = vector.broadcast %cst_99 : f32 to vector<2x1xf32>
    %247 = arith.addf %245, %246 : vector<2x1xf32>
    %248 = math.rsqrt %247 : vector<2x1xf32>
    %249 = vector.broadcast %248 : vector<2x1xf32> to vector<2x64xf32>
    %250 = arith.mulf %240, %249 : vector<2x64xf32>
    %c3784 = arith.constant 3784 : index
    %c0_100 = arith.constant 0 : index
    %251 = vector.load %arg1[%c3784, %c0_100] : memref<3944x128xf32, #tpu.memory_space<vmem>>, vector<1x64xf32>
    %252 = vector.broadcast %251 : vector<1x64xf32> to vector<2x64xf32>
    %253 = arith.mulf %250, %252 : vector<2x64xf32>
    %c3792 = arith.constant 3792 : index
    %c0_101 = arith.constant 0 : index
    %254 = vector.load %arg1[%c3792, %c0_101] : memref<3944x128xf32, #tpu.memory_space<vmem>>, vector<1x64xf32>
    %255 = vector.broadcast %254 : vector<1x64xf32> to vector<2x64xf32>
    %256 = arith.addf %253, %255 : vector<2x64xf32>
    %257 = vector.shape_cast %256 : vector<2x64xf32> to vector<2x1x64xf32>
    %258 = vector.shape_cast %257 : vector<2x1x64xf32> to vector<2x64xf32>
    %c3800 = arith.constant 3800 : index
    %c0_102 = arith.constant 0 : index
    %259 = vector.load %arg1[%c3800, %c0_102] : memref<3944x128xf32, #tpu.memory_space<vmem>>, vector<64x64xf32>
    %cst_103 = arith.constant dense<0.000000e+00> : vector<2x64xf32>
    %260 = tpu.matmul %258, %259, %cst_103 {dimension_numbers = #tpu.dot_dimension_numbers<[1], [0], [0], [1], [0, 0, 1, 1], [], []>} : vector<2x64xf32>, vector<64x64xf32>, vector<2x64xf32> -> vector<2x64xf32>
    %c3864 = arith.constant 3864 : index
    %c0_104 = arith.constant 0 : index
    %261 = vector.load %arg1[%c3864, %c0_104] : memref<3944x128xf32, #tpu.memory_space<vmem>>, vector<1x64xf32>
    %262 = vector.broadcast %261 : vector<1x64xf32> to vector<2x64xf32>
    %263 = arith.addf %260, %262 : vector<2x64xf32>
    %264 = arith.negf %263 : vector<2x64xf32>
    %265 = math.exp %264 : vector<2x64xf32>
    %cst_105 = arith.constant 1.000000e+00 : f32
    %266 = vector.broadcast %cst_105 : f32 to vector<2x64xf32>
    %267 = arith.addf %266, %265 : vector<2x64xf32>
    %268 = arith.divf %266, %267 : vector<2x64xf32>
    %269 = vector.shape_cast %268 : vector<2x64xf32> to vector<2x1x64xf32>
    %270 = vector.shape_cast %269 : vector<2x1x64xf32> to vector<2x64xf32>
    %c3872 = arith.constant 3872 : index
    %c0_106 = arith.constant 0 : index
    %271 = vector.load %arg1[%c3872, %c0_106] : memref<3944x128xf32, #tpu.memory_space<vmem>>, vector<64x16xf32>
    %cst_107 = arith.constant dense<0.000000e+00> : vector<2x16xf32>
    %272 = tpu.matmul %270, %271, %cst_107 {dimension_numbers = #tpu.dot_dimension_numbers<[1], [0], [0], [1], [0, 0, 1, 1], [], []>} : vector<2x64xf32>, vector<64x16xf32>, vector<2x16xf32> -> vector<2x16xf32>
    %c3936 = arith.constant 3936 : index
    %c0_108 = arith.constant 0 : index
    %273 = vector.load %arg1[%c3936, %c0_108] : memref<3944x128xf32, #tpu.memory_space<vmem>>, vector<1x16xf32>
    %274 = vector.broadcast %273 : vector<1x16xf32> to vector<2x16xf32>
    %275 = arith.addf %272, %274 : vector<2x16xf32>
    %c0_109 = arith.constant 0 : index
    %c0_110 = arith.constant 0 : index
    %276 = vector.load %arg2[%c0_109, %c0_110] : memref<2x16xf32, #tpu.memory_space<vmem>>, vector<2x16xf32>
    tpu.vector_store %arg2[%c0_109, %c0_110], %275 {strides = array<i32>} : memref<2x16xf32, #tpu.memory_space<vmem>>, vector<2x16xf32>,
    return
  }
}

</mosaic_0001>

<bundles_post_ra>
// kernel: _lambda_.1
= control target key start
LH: loop header
LB: loop body
LE: loop exit
PB: predicated region body
PF: predicated region fallthrough
CT: control target
= control target key end

     0   :  { %7 = vsyncpa [#allocation3], 0  ;;  %s6067_s0 = inlined_call_operand.vmem [shape: f32[2,12,32], index: 0, kind: input, shape index: {}]   ;;  %s6068_s1 = inlined_call_operand.hbm [shape: f32[3944,128], index: 1, kind: input, shape index: {}]   ;;  %s6069_s2 = inlined_call_operand.hbm [shape: f32[2,16], index: 2, kind: output, shape index: {}]  }
   0x1   :  { %8 = vsyncpa [#allocation4], 0  ;;  %s5402_s9 = smov [#allocation2]   ;;  %s5354_s13 = scalar_lea.hbm %s6068_s1, 63104 }
   0x2   :  { %s16_s10 = sshll.u32 %s5402_s9, 4  ;;  %p5355_p0 = scmp.ne.s32.totalorder %s6068_s1, %s5354_s13  ;;  %s17_s10 = int_to_ptr.vmem [resolvable:$true] %s16_s10 }
   0x3   :  { %p5358_p1 = scmp.lt.u32.totalorder %s5354_s13, %s6068_s1 }
   0x5   :  { %p5360_p2 = pnand %p5358_p1, %p5355_p0 }
   0x7   :  { %5363 = shalt.err (!%p5360_p2)
}
   0x8   :  { %s5364_s18 = scalar_lea.vmem %s17_s10, 63104  ;;  %p5369_p4 = scmp.lt.s32.totalorder %s17_s10, %s17_s10 }
   0x9   :  { %p5365_p3 = scmp.ne.s32.totalorder %s17_s10, %s5364_s18  ;;  %p5370_p5 = scmp.lt.s32.totalorder %s5364_s18, %s5364_s18 }
   0xb   :  { %p5371_p6 = por %p5370_p5, %p5369_p4 }
   0xd   :  { %p5372_p7 = pnand %p5371_p6, %p5365_p3 }
   0xf   :  { %5375 = shalt.err (!%p5372_p7)
}
  0x10   :  { %s5403_s19 = smov 128   ;;  %s5404_s20 = smov 8  }
  0x11   :  { %22 = dma.hbm_to_vmem [thread:$0]  %s6068_s1, 63104, %s17_s10, [#allocation3], %s5403_s19, %s5403_s19, %s5404_s20  }
  0x12   :  { %5398 = dma.done.wait [#allocation3], 63104  }
  0x13   :  { %5399 = vsyncadd [#allocation3], 4294904192  ;;  %v38_v0 = vlaneseq  ;;  %v5405_v1 = vmov 0.0|0.0   ;;  %vm5406_vm0 = vmmov 0   ;;  %v5407_v2 = vmov 0.0   ;;  %v127_v9 = vld [vmem:[#allocation2 + $0x20] sm:$0xff] }
  0x14   :  { %4728 = vmatprep.subr.bf16.mxu0 %v5405_v1  ;;  %4734 = vmatprep.subr.bf16.mxu1 %v5405_v1  ;;  %v5408_v3 = vmov 1983009808   ;;  %vm84_vm1 = vcmask 1040384   ;;  %vm85_vm2 = vcmask 1042434   ;;  %v128_v10 = vld [vmem:[#allocation2 + $0x28] sm:$0xff]  ;;  %v123_v11 = vld [vmem:[#allocation2] sm:$0xff] }
  0x15   :  { %4263 = vmatprep.mubr.msk.f32.mxu0 %vm5406_vm0, %v5407_v2  ;;  %4280 = vmatprep.mubr.msk.f32.mxu1 %vm5406_vm0, %v5407_v2  ;;  %v36_v4 = vunpack.c.l.s4 %v5408_v3  ;;  %v5443_v5 = vshrl.u32 %v38_v0, 7  ;;  %vm5448_vm3 = vmor %vm84_vm1, %vm85_vm2  ;;  %vm87_vm4 = vcmask 1044484   ;;  %v4729_v12 = vpack.c.bf16 %v128_v10, %v127_v9  ;;  %v124_v13 = vld [vmem:[#allocation2 + $0x8] sm:$0xff]  ;;  %v129_v14 = vld [vmem:[#allocation2 + $0x30] sm:$0xff] }
  0x16   :  { %v130_v15 = vld [vmem:[#allocation2 + $0x38] sm:$0xff]  ;;  %v4735_v16 = vpack.c.bf16 %v124_v13, %v123_v11  ;;  %v125_v17 = vld [vmem:[#allocation2 + $0x10] sm:$0xff]  ;;  %v26_v19 = vld [vmem:[%s6067_s0] sm:$0xff]  ;;  %vm89_vm6 = vcmask 1046534   ;;  %vm173_vm7 = vcmask 261120   ;;  %vm2798_vm9 = vcmask 523264  }
  0x17   :  { %v37_v6 = vunpack.c.0.s8 %v36_v4  ;;  %v126_v18 = vld [vmem:[#allocation2 + $0x18] sm:$0xff]  ;;  %4730 = vmatpush3.bf16.msra.mxu0 %v4729_v12  ;;  %v4732_v20 = vpack.c.bf16 %v130_v15, %v129_v14  ;;  %v5458_v21 = vld.sshfl [vmem:[%s6067_s0 + $0x8] sm:$0x33 pattern:$0x76325410]  ;;  %v34_v22 = vcombine.high %v26_v19, %v26_v19  ;;  %vm5463_vm5 = vmor %vm5448_vm3, %vm87_vm4  ;;  %vm2850_vm10 = vcmask 1041409  }
  0x18   :  { %4736 = vmatpush3.bf16.msra.mxu1 %v4735_v16  ;;  %4731 = vmatprep.subr.bf16.mxu0 %v5405_v1  ;;  %v4738_v25 = vpack.c.bf16 %v126_v18, %v125_v17  ;;  %v102_v26 = vrot.slane %v5458_v21, 7  ;;  %v5469_v27 = vld [vmem:[#allocation2 + $0x88] sm:$0xff]  ;;  %v5471_v28 = vld [vmem:[#allocation2 + $0x90] sm:$0xff]  ;;  %v82_v30 = vcombine.high %v5458_v21, %v5458_v21  ;;  %vm5489_vm8 = vmor %vm5463_vm5, %vm89_vm6  ;;  %vm3518_vm11 = vcmask 517120  }
  0x19   :  { %v5446_v7 = vsub.s32 %v37_v6, %v5443_v5  ;;  %v28_v29 = vld [vmem:[%s6067_s0 + $0x10] sm:$0xff]  ;;  %4737 = vmatprep.subr.bf16.mxu1 %v5405_v1  ;;  %v4747_v34 = vpack.c.bf16 %v5471_v28, %v5469_v27  ;;  %v388_v62 = vld [vmem:[#allocation2 + $0x40] sm:$0xff]  ;;  %v389_v63 = vld [vmem:[#allocation2 + $0x48] sm:$0xff]  ;;  %vm3722_vm12 = vcmask 123904  }
  0x1a   :  { %v58_v36 = vcombine.high %v28_v29, %v28_v29  ;;  %v104_v38 = vrot.slane %v102_v26, 2  ;;  %v105_v39 = vrot.slane %v82_v30, 7  ;;  %v5537_v10 = vld.sshfl [vmem:[%s6067_s0 + $0x18] sm:$0x33 pattern:$0x76325410]  ;;  %v4741_v15 = vpack.c.bf16 %v389_v63, %v388_v62 }
  0x1b   :  { %v41_v23 = vrot.slane %v26_v19, %v5446_v7  ;;  %v5480_v31 = vrot.slane %v34_v22, %v5446_v7  ;;  %v5494_v37 = vrot.slane %v28_v29, %v5446_v7  ;;  %4733 = vmatpush3.bf16.msra.mxu0 %v4732_v20  ;;  %v537_v24 = vld [vmem:[#allocation2 + $0x98] sm:$0xff]  ;;  %v118_v29 = vrot.slane %v5537_v10, 7  ;;  %s5409_s0 = smov [#allocation5]  }
  0x1c   :  { %4739 = vmatpush3.bf16.msra.mxu1 %v4738_v25  ;;  %4740 = vmatprep.subr.bf16.mxu0 %v5405_v1  ;;  %v5505_v44 = vrot.slane %v58_v36, %v5446_v7  ;;  %v106_v46 = vsel %vm5489_vm8, %v104_v38, %v105_v39  ;;  %v538_v25 = vld [vmem:[#allocation2 + $0xa0] sm:$0xff]  ;;  %v390_v36 = vld [vmem:[#allocation2 + $0x50] sm:$0xff]  ;;  %v391_v38 = vld [vmem:[#allocation2 + $0x58] sm:$0xff]  ;;  %s3730_s30 = sshll.u32 %s5409_s0, 4  ;;  %s3731_s30 = int_to_ptr.vmem [resolvable:$true] %s3730_s30 }
  0x1d   :  { %v5482_v32 = vcombine.high %v41_v23, %v41_v23  ;;  %v3741_v33 = vrot.slane %v41_v23, 9  ;;  %v5498_v40 = vcombine.high %v5480_v31, %v5480_v31  ;;  %v96_v42 = vrot.slane %v5480_v31, 7  ;;  %4746 = vmatprep.subr.bf16.mxu1 %v5405_v1  ;;  %v533_v63 = vld [vmem:[#allocation2 + $0x78] sm:$0xff]  ;;  %s5376_s3 = scalar_lea.vmem %s3731_s30, 32  ;;  %p5381_p9 = scmp.lt.s32.totalorder %s3731_s30, %s3731_s30 }
  0x1e   :  { %v73_v45 = vcombine.high %v5494_v37, %v5494_v37  ;;  %v3742_v47 = vrot.slane %v5494_v37, 9  ;;  %v5521_v54 = vcombine.high %v5505_v44, %v5505_v44  ;;  %v112_v59 = vrot.slane %v5505_v44, 7  ;;  %p5377_p8 = scmp.ne.s32.totalorder %s3731_s30, %s5376_s3  ;;  %p5382_p10 = scmp.lt.s32.totalorder %s5376_s3, %s5376_s3 }
  0x1f   :  { %v93_v41 = vrot.slane %v5482_v32, 7  ;;  %v260_v43 = vcombine.low %v41_v23, %v5482_v32  ;;  %v98_v50 = vrot.slane %v96_v42, 2  ;;  %v99_v51 = vrot.slane %v5498_v40, 7 }
  0x20   :  { %v261_v52 = vcombine.low %v5480_v31, %v5498_v40  ;;  %v109_v55 = vrot.slane %v73_v45, 7  ;;  %v114_v6 = vrot.slane %v112_v59, 2  ;;  %v115_v8 = vrot.slane %v5521_v54, 7  ;;  %p5383_p11 = por %p5382_p10, %p5381_p9 }
  0x21   :  { %v94_v48 = vsel %vm5489_vm8, %v3741_v33, %v93_v41  ;;  %v95_v49 = vrot.slane %v93_v41, 2  ;;  %v268_v53 = vrot.slane %v260_v43, %v5446_v7  ;;  %v100_v57 = vsel %vm5489_vm8, %v98_v50, %v99_v51 }
  0x22   :  { %v101_v58 = vrot.slane %v99_v51, 2  ;;  %v275_v61 = vrot.slane %v261_v52, %v5446_v7  ;;  %v110_v0 = vsel %vm5489_vm8, %v3742_v47, %v109_v55  ;;  %v111_v3 = vrot.slane %v109_v55, 2  ;;  %v700_v55 = vld [vmem:[#allocation2 + $0xb0] sm:$0xff]  ;;  %p5384_p12 = pnand %p5383_p11, %p5377_p8 }
  0x23   :  { %v97_v56 = vsel %vm5489_vm8, %v95_v49, %v96_v42  ;;  %v148_v9 = vcombine.low %v106_v46, %v110_v0  ;;  %v116_v16 = vsel %vm5489_vm8, %v114_v6, %v115_v8  ;;  %v277_v17 = vcombine.low %v5458_v21, %v5494_v37  ;;  %v534_v0 = vld [vmem:[#allocation2 + $0x80] sm:$0xff] }
  0x24   :  { %v131_v60 = vcombine.low %v94_v48, %v97_v56  ;;  %v103_v4 = vsel %vm5489_vm8, %v101_v58, %v102_v26  ;;  %v5540_v13 = vcombine.low %v268_v53, %v275_v61  ;;  %v113_v14 = vsel %vm5489_vm8, %v111_v3, %v112_v59  ;;  %v699_v53 = vld [vmem:[#allocation2 + $0xa8] sm:$0xff]  ;;  %v532_v59 = vld [vmem:[#allocation2 + $0x70] sm:$0xff]  ;;  %v702_v61 = vld [vmem:[#allocation2 + $0xc0] sm:$0xff] }
  0x25   :  { %v132_v11 = vcombine.low %v100_v57, %v103_v4  ;;  %v278_v18 = vcombine.low %v73_v45, %v5505_v44  ;;  %v149_v20 = vcombine.low %v113_v14, %v116_v16  ;;  %v156_v22 = vrot.slane %v148_v9, %v5446_v7  ;;  %v531_v58 = vld [vmem:[#allocation2 + $0x68] sm:$0xff]  ;;  %v819_v16 = vld [vmem:[#allocation2 + $0xf0] sm:$0xff] }
  0x26   :  { %v139_v12 = vrot.slane %v131_v60, %v5446_v7  ;;  %4281 = vmatmul.mubr.msk.f32.vlgmr.msra.gmra.mrb[0].mxu1 %vm173_vm7, %v5540_v13  ;;  %v5555_v23 = vcombine.high %v5537_v10, %v5537_v10  ;;  %v285_v26 = vrot.slane %v277_v17, %v5446_v7  ;;  %v117_v28 = vrot.slane %v115_v8, 2  ;;  %v818_v14 = vld [vmem:[#allocation2 + $0xe8] sm:$0xff]  ;;  %v820_v17 = vld [vmem:[#allocation2 + $0xf8] sm:$0xff] }
  0x27   :  { %v146_v19 = vrot.slane %v132_v11, %v5446_v7  ;;  %4748 = vmatpush3.bf16.msra.mxu1 %v4747_v34  ;;  %4283 = vmatprep.mubr.msk.f32.mxu1 %vm5406_vm0, %v5407_v2  ;;  %v292_v27 = vrot.slane %v278_v18, %v5446_v7  ;;  %v163_v33 = vrot.slane %v149_v20, %v5446_v7  ;;  %v120_v43 = vrot.slane %v118_v29, 2  ;;  %v816_v11 = vld [vmem:[#allocation2 + $0xd8] sm:$0xff]  ;;  %v822_v20 = vld [vmem:[#allocation2 + $0x108] sm:$0xff] }
  0x28   :  { %4749 = vmatprep.subr.bf16.mxu1 %v5405_v1  ;;  %v121_v39 = vrot.slane %v5555_v23, 7  ;;  %v294_v34 = vcombine.low %v5521_v54, %v5537_v10  ;;  %v119_v42 = vsel %vm5489_vm8, %v117_v28, %v118_v29  ;;  %v4750_v45 = vpack.c.bf16 %v538_v25, %v537_v24  ;;  %v824_v24 = vld [vmem:[#allocation2 + $0x118] sm:$0xff]  ;;  %v827_v29 = vld [vmem:[#allocation2 + $0x130] sm:$0xff] }
  0x29   :  { %v147_v30 = vcombine.low %v139_v12, %v146_v19  ;;  %v5567_v41 = vcombine.low %v285_v26, %v292_v27  ;;  %v164_v46 = vcombine.low %v156_v22, %v163_v33  ;;  %v392_v47 = vcombine.low %v5482_v32, %v5480_v31  ;;  %v821_v19 = vld [vmem:[#allocation2 + $0x100] sm:$0xff]  ;;  %v826_v27 = vld [vmem:[#allocation2 + $0x128] sm:$0xff] }
  0x2a   :  { %v393_v48 = vcombine.low %v5498_v40, %v5458_v21  ;;  %v4744_v49 = vpack.c.bf16 %v391_v38, %v390_v36  ;;  %v122_v50 = vsel %vm5489_vm8, %v120_v43, %v121_v39  ;;  %v5584_v52 = vrot.slane %v294_v34, %v5446_v7  ;;  %v825_v26 = vld [vmem:[#allocation2 + $0x120] sm:$0xff]  ;;  %v830_v38 = vld [vmem:[#allocation2 + $0x148] sm:$0xff]  ;;  %v1041_v34 = vld [vmem:[#allocation2 + $0x2d8] sm:$0xff] }
  0x2b   :  { %4264 = vmatmul.mubr.msk.f32.vlgmr.msra.gmra.mrb[0].mxu0 %vm173_vm7, %v147_v30  ;;  %4284 = vmatmul.mubr.msk.f32.gmra.mrb[2].mxu1 %vm173_vm7, %v5567_v41  ;;  %v165_v51 = vcombine.low %v119_v42, %v122_v50  ;;  %v400_v31 = vrot.slane %v392_v47, %v5446_v7  ;;  %v3749_v56 = vcombine.high %v5458_v21, %v5494_v37  ;;  %v829_v36 = vld [vmem:[#allocation2 + $0x140] sm:$0xff]  ;;  %v1025_v42 = vld [vmem:[#allocation2 + $0x258] sm:$0xff]  ;;  %v1044_v47 = vld [vmem:[#allocation2 + $0x2f0] sm:$0xff] }
  0x2c   :  { %4742 = vmatpush3.bf16.msra.mxu0 %v4741_v15  ;;  %4266 = vmatprep.mubr.msk.f32.mxu0 %vm5406_vm0, %v5407_v2  ;;  %v407_v32 = vrot.slane %v393_v48, %v5446_v7  ;;  %v410_v57 = vcombine.low %v5505_v44, %v5521_v54  ;;  %v4759_v60 = vpack.c.bf16 %v700_v55, %v699_v53  ;;  %v701_v54 = vld [vmem:[#allocation2 + $0xb8] sm:$0xff]  ;;  %v1027_v50 = vld [vmem:[#allocation2 + $0x268] sm:$0xff] }
  0x2d   :  { %4743 = vmatprep.subr.bf16.mxu0 %v5405_v1  ;;  %4286 = vmatprep.mubr.msk.f32.mxu1 %vm5406_vm0, %v5407_v2  ;;  %v172_v40 = vrot.slane %v165_v51, %v5446_v7  ;;  %v417_v37 = vrot.slane %v3749_v56, %v5446_v7  ;;  %v4753_v62 = vpack.c.bf16 %v532_v59, %v531_v58  ;;  %v1028_v51 = vld [vmem:[#allocation2 + $0x270] sm:$0xff] }
  0x2e   :  { %4751 = vmatpush3.bf16.msra.mxu1 %v4750_v45  ;;  %v408_v21 = vcombine.low %v400_v31, %v407_v32  ;;  %v424_v44 = vrot.slane %v410_v57, %v5446_v7  ;;  %v4762_v3 = vpack.c.bf16 %v702_v61, %v701_v54  ;;  %v426_v6 = vcombine.low %v5537_v10, %v5555_v23  ;;  %v815_v10 = vld [vmem:[#allocation2 + $0xd0] sm:$0xff]  ;;  %v1026_v45 = vld [vmem:[#allocation2 + $0x260] sm:$0xff] }
  0x2f   :  { %4267 = vmatmul.mubr.msk.f32.gmra.mrb[2].mxu0 %vm173_vm7, %v164_v46  ;;  %4758 = vmatprep.subr.bf16.mxu1 %v5405_v1  ;;  %v4756_v8 = vpack.c.bf16 %v534_v0, %v533_v63  ;;  %v4765_v12 = vpack.c.bf16 %v816_v11, %v815_v10  ;;  %v4771_v18 = vpack.c.bf16 %v820_v17, %v819_v16  ;;  %v823_v23 = vld [vmem:[#allocation2 + $0x110] sm:$0xff]  ;;  %v1046_v31 = vld [vmem:[#allocation2 + $0x300] sm:$0xff] }
  0x30   :  { %4745 = vmatpush3.bf16.msra.mxu0 %v4744_v49  ;;  %4269 = vmatprep.mubr.msk.f32.mxu0 %vm5406_vm0, %v5407_v2  ;;  %v425_v4 = vcombine.low %v417_v37, %v424_v44  ;;  %v433_v9 = vrot.slane %v426_v6, %v5446_v7  ;;  %v4774_v22 = vpack.c.bf16 %v822_v20, %v821_v19 }
  0x31   :  { %4287 = vmatmul.mubr.msk.f32.gmra.mrb[4].mxu1 %vm173_vm7, %v5584_v52  ;;  %4752 = vmatprep.subr.bf16.mxu0 %v5405_v1  ;;  %v4777_v25 = vpack.c.bf16 %v824_v24, %v823_v23  ;;  %v4780_v28 = vpack.c.bf16 %v826_v27, %v825_v26  ;;  %v4786_v39 = vpack.c.bf16 %v830_v38, %v829_v36  ;;  %v3763_v26 = vld [vmem:[#allocation2 + $0xc8] ss:$0 sm:$0xff] }
  0x32   :  { %4314 = vmatprep.mubr.msk.f32.mxu1 %vm5406_vm0, %v5407_v2  ;;  %v4790_v48 = vpack.c.bf16 %v1026_v45, %v1025_v42  ;;  %v4794_v32 = vpack.c.bf16 %v1028_v51, %v1027_v50 }
  0x33   :  { %4270 = vmatmul.mubr.msk.f32.gmra.mrb[4].mxu0 %vm173_vm7, %v172_v40 }
  0x34   :  { %4297 = vmatprep.mubr.msk.f32.mxu0 %vm5406_vm0, %v5407_v2 }
  0x35   :  { %4315 = vmatmul.mubr.msk.f32.vlgmr.msra.gmra.mrb[6].mxu1 %vm173_vm7, %v147_v30  ;;  %v828_v30 = vld [vmem:[#allocation2 + $0x138] sm:$0xff] }
  0x36   :  { %4760 = vmatpush3.bf16.msra.mxu1 %v4759_v60  ;;  %4317 = vmatprep.mubr.msk.f32.mxu1 %vm5406_vm0, %v5407_v2  ;;  %v4783_v33 = vpack.c.bf16 %v828_v30, %v827_v29 }
  0x37   :  { %4298 = vmatmul.mubr.msk.f32.vlgmr.msra.gmra.mrb[6].mxu0 %vm173_vm7, %v408_v21  ;;  %4761 = vmatprep.subr.bf16.mxu1 %v5405_v1 }
  0x38   :  { %4754 = vmatpush3.bf16.msra.mxu0 %v4753_v62  ;;  %4300 = vmatprep.mubr.msk.f32.mxu0 %vm5406_vm0, %v5407_v2 }
  0x39   :  { %4318 = vmatmul.mubr.msk.f32.gmra.mrb[8].mxu1 %vm173_vm7, %v164_v46  ;;  %4755 = vmatprep.subr.bf16.mxu0 %v5405_v1  ;;  %v1043_v46 = vld [vmem:[#allocation2 + $0x2e8] sm:$0xff] }
  0x3a   :  { %4320 = vmatprep.mubr.msk.f32.mxu1 %vm5406_vm0, %v5407_v2  ;;  %4763 = vmatpush3.bf16.msra.mxu1 %v4762_v3  ;;  %v4792_v49 = vpack.c.bf16 %v1044_v47, %v1043_v46 }
  0x3b   :  { %4301 = vmatmul.mubr.msk.f32.gmra.mrb[8].mxu0 %vm173_vm7, %v425_v4 }
  0x3c   :  { %4757 = vmatpush3.bf16.msra.mxu0 %v4756_v8  ;;  %4303 = vmatprep.mubr.msk.f32.mxu0 %vm5406_vm0, %v5407_v2 }
  0x3d   :  { %4321 = vmatmul.mubr.msk.f32.gmra.mrb[10].mxu1 %vm173_vm7, %v172_v40  ;;  %4764 = vmatprep.subr.bf16.mxu0 %v5405_v1 }
  0x3e   :  { %4348 = vmatprep.mubr.msk.f32.mxu1 %vm5406_vm0, %v5407_v2 }
  0x3f   :  { %4304 = vmatmul.mubr.msk.f32.gmra.mrb[10].mxu0 %vm173_vm7, %v433_v9 }
  0x40   :  { %4331 = vmatprep.mubr.msk.f32.mxu0 %vm5406_vm0, %v5407_v2 }
  0x41   :  { %4349 = vmatmul.mubr.msk.f32.vlgmr.msra.gmra.mrb[12].mxu1 %vm173_vm7, %v408_v21 }
  0x42   :  { %4351 = vmatprep.mubr.msk.f32.mxu1 %vm5406_vm0, %v5407_v2 }
  0x43   :  { %4332 = vmatmul.mubr.msk.f32.vlgmr.msra.gmra.mrb[12].mxu0 %vm173_vm7, %v5540_v13  ;;  %v817_v13 = vld [vmem:[#allocation2 + $0xe0] sm:$0xff] }
  0x44   :  { %4334 = vmatprep.mubr.msk.f32.mxu0 %vm5406_vm0, %v5407_v2  ;;  %4766 = vmatpush3.bf16.msra.mxu0 %v4765_v12  ;;  %v4768_v15 = vpack.c.bf16 %v818_v14, %v817_v13 }
  0x45   :  { %4352 = vmatmul.mubr.msk.f32.gmra.mrb[14].mxu1 %vm173_vm7, %v425_v4  ;;  %4767 = vmatprep.subr.bf16.mxu0 %v5405_v1 }
  0x46   :  { %4354 = vmatprep.mubr.msk.f32.mxu1 %vm5406_vm0, %v5407_v2 }
  0x47   :  { %4335 = vmatmul.mubr.msk.f32.gmra.mrb[14].mxu0 %vm173_vm7, %v5567_v41  ;;  %v1042_v41 = vld [vmem:[#allocation2 + $0x2e0] sm:$0xff] }
  0x48   :  { %4337 = vmatprep.mubr.msk.f32.mxu0 %vm5406_vm0, %v5407_v2  ;;  %4769 = vmatpush3.bf16.msra.mxu0 %v4768_v15  ;;  %v4788_v43 = vpack.c.bf16 %v1042_v41, %v1041_v34 }
  0x49   :  { %4355 = vmatmul.mubr.msk.f32.gmra.mrb[16].mxu1 %vm173_vm7, %v433_v9  ;;  %4770 = vmatprep.subr.bf16.mxu0 %v5405_v1 }
  0x4a   :  { %1157 = vmatprep.mubr.f32.mxu1 %v5407_v2  ;;  %4789 = vmatprep.subr.bf16.mxu1 %v4788_v43 }
  0x4b   :  { %4338 = vmatmul.mubr.msk.f32.gmra.mrb[16].mxu0 %vm173_vm7, %v5584_v52  ;;  %v1045_v52 = vld [vmem:[#allocation2 + $0x2f8] sm:$0xff]  ;;  %4791 = vmatpush1.bf16.msra.mxu1 %v4790_v48 }
  0x4c   :  { %4389 = vmatprep.mubr.msk.f32.mxu0 %vm5406_vm0, %v5407_v2  ;;  %4772 = vmatpush3.bf16.msra.mxu0 %v4771_v18  ;;  %v4796_v40 = vpack.c.bf16 %v1046_v31, %v1045_v52 }
  0x4d   :  { %4773 = vmatprep.subr.bf16.mxu0 %v5405_v1  ;;  %4793 = vmatprep.subr.bf16.mxu1 %v4792_v49 }
  0x4f   :  { %4795 = vmatpush1.bf16.msra.mxu1 %v4794_v32 }
  0x50   :  { %4775 = vmatpush3.bf16.msra.mxu0 %v4774_v22  ;;  %4797 = vmatprep.subr.bf16.mxu1 %v4796_v40 }
  0x51   :  { %4776 = vmatprep.subr.bf16.mxu0 %v5405_v1 }
  0x54   :  { %4778 = vmatpush3.bf16.msra.mxu0 %v4777_v25 }
  0x55   :  { %4779 = vmatprep.subr.bf16.mxu0 %v5405_v1 }
  0x58   :  { %4781 = vmatpush3.bf16.msra.mxu0 %v4780_v28 }
  0x59   :  { %4782 = vmatprep.subr.bf16.mxu0 %v5405_v1 }
  0x5c   :  { %4784 = vmatpush3.bf16.msra.mxu0 %v4783_v33 }
  0x5d   :  { %4785 = vmatprep.subr.bf16.mxu0 %v5405_v1 }
  0x60   :  { %4787 = vmatpush3.bf16.msra.mxu0 %v4786_v39 }
  0xf9   :  { %v374_v53 = vpop.f32.mrb[0].mxu1 }
  0xfa   :  { %v4282_v55 = vpop.f32.mrb[1].mxu1 }
  0xfb   :  { %v3753_v55 = vld [vmem:[#allocation2 + $0x60] ss:$0 sm:$0xff] }
  0xfe   :  { %v246_v56 = vpop.f32.mrb[0].mxu0  ;;  %v379_v59 = vpop.f32.mrb[2].mxu1 }
  0xff   :  { %v375_v57 = vadd.f32 %v374_v53, %v246_v56  ;;  %v4265_v58 = vpop.f32.mrb[1].mxu0  ;;  %v4285_v60 = vpop.f32.mrb[3].mxu1 }
 0x102   :  { %v251_v21 = vpop.f32.mrb[2].mxu0 }
 0x103   :  { %v380_v37 = vadd.f32 %v379_v59, %v251_v21  ;;  %v4268_v44 = vpop.f32.mrb[3].mxu0 }
 0x104   :  { %v384_v54 = vpop.f32.mrb[4].mxu1 }
 0x105   :  { %v4288_v61 = vpop.f32.mrb[5].mxu1 }
 0x106   :  { %v256_v62 = vpop.f32.mrb[4].mxu0 }
 0x107   :  { %v385_v63 = vadd.f32 %v384_v54, %v256_v62  ;;  %v4271_v0 = vpop.f32.mrb[5].mxu0  ;;  %v1029_v62 = vld [vmem:[#allocation2 + $0x278] sm:$0xff] }
 0x108   :  { %v605_v3 = vpop.f32.mrb[6].mxu1 }
 0x109   :  { %v4316_v4 = vpop.f32.mrb[7].mxu1 }
 0x10a   :  { %v506_v6 = vpop.f32.mrb[6].mxu0  ;;  %v1048_v4 = vld [vmem:[#allocation2 + $0x310] sm:$0xff] }
 0x10b   :  { %v520_v8 = vadd.f32 %v506_v6, %v375_v57  ;;  %v4299_v9 = vpop.f32.mrb[7].mxu0 }
 0x10c   :  { %v610_v10 = vpop.f32.mrb[8].mxu1  ;;  %v1032_v9 = vld [vmem:[#allocation2 + $0x290] sm:$0xff] }
 0x10d   :  { %v4319_v11 = vpop.f32.mrb[9].mxu1  ;;  %v528_v57 = vadd.f32 %v3753_v55, %v520_v8  ;;  %v1031_v8 = vld [vmem:[#allocation2 + $0x288] sm:$0xff] }
 0x10e   :  { %v511_v12 = vpop.f32.mrb[8].mxu0  ;;  %v1049_v11 = vld [vmem:[#allocation2 + $0x318] sm:$0xff] }
 0x10f   :  { %v521_v13 = vadd.f32 %v511_v12, %v380_v37  ;;  %v4302_v14 = vpop.f32.mrb[9].mxu0  ;;  %v1050_v12 = vld [vmem:[#allocation2 + $0x320] sm:$0xff] }
 0x110   :  { %v615_v15 = vpop.f32.mrb[10].mxu1  ;;  %v1033_v14 = vld [vmem:[#allocation2 + $0x298] sm:$0xff] }
 0x111   :  { %v4322_v16 = vpop.f32.mrb[11].mxu1  ;;  %v529_v60 = vadd.f32 %v3753_v55, %v521_v13  ;;  %v4804_v13 = vpack.c.bf16 %v1050_v12, %v1049_v11 }
 0x112   :  { %v516_v17 = vpop.f32.mrb[10].mxu0 }
 0x113   :  { %v522_v18 = vadd.f32 %v516_v17, %v385_v63  ;;  %v4305_v19 = vpop.f32.mrb[11].mxu0  ;;  %v1030_v63 = vld [vmem:[#allocation2 + $0x280] sm:$0xff]  ;;  %v1051_v17 = vld [vmem:[#allocation2 + $0x328] sm:$0xff] }
 0x114   :  { %v769_v20 = vpop.f32.mrb[12].mxu1  ;;  %v4798_v0 = vpack.c.bf16 %v1030_v63, %v1029_v62 }
 0x115   :  { %v4350_v22 = vpop.f32.mrb[13].mxu1  ;;  %v530_v44 = vadd.f32 %v3753_v55, %v522_v18  ;;  %v1052_v18 = vld [vmem:[#allocation2 + $0x330] sm:$0xff] }
 0x116   :  { %v685_v23 = vpop.f32.mrb[12].mxu0  ;;  %4799 = vmatpush1.bf16.msra.mxu1 %v4798_v0  ;;  %v4808_v19 = vpack.c.bf16 %v1052_v18, %v1051_v17  ;;  %v1036_v22 = vld [vmem:[#allocation2 + $0x2b0] sm:$0xff] }
 0x117   :  { %v686_v24 = vadd.f32 %v685_v23, %v605_v3  ;;  %v4333_v25 = vpop.f32.mrb[13].mxu0  ;;  %v1047_v3 = vld [vmem:[#allocation2 + $0x308] sm:$0xff] }
 0x118   :  { %v774_v27 = vpop.f32.mrb[14].mxu1  ;;  %v4800_v6 = vpack.c.bf16 %v1048_v4, %v1047_v3  ;;  %v1054_v25 = vld [vmem:[#allocation2 + $0x340] sm:$0xff] }
 0x119   :  { %v783_v28 = vadd.f32 %v769_v20, %v686_v24  ;;  %v4353_v29 = vpop.f32.mrb[15].mxu1  ;;  %v1035_v20 = vld [vmem:[#allocation2 + $0x2a8] sm:$0xff]  ;;  %v1053_v24 = vld [vmem:[#allocation2 + $0x338] sm:$0xff] }
 0x11a   :  { %v690_v30 = vpop.f32.mrb[14].mxu0  ;;  %4801 = vmatprep.subr.bf16.mxu1 %v4800_v6  ;;  %v4810_v23 = vpack.c.bf16 %v1036_v22, %v1035_v20 }
 0x11b   :  { %v791_v33 = vadd.f32 %v3763_v26, %v783_v28  ;;  %v691_v36 = vadd.f32 %v690_v30, %v610_v10  ;;  %v4336_v38 = vpop.f32.mrb[15].mxu0  ;;  %v4802_v10 = vpack.c.bf16 %v1032_v9, %v1031_v8  ;;  %v1038_v28 = vld [vmem:[#allocation2 + $0x2c0] sm:$0xff]  ;;  %v1055_v30 = vld [vmem:[#allocation2 + $0x348] sm:$0xff] }
 0x11c   :  { %v779_v39 = vpop.f32.mrb[16].mxu1  ;;  %v1039_v38 = vld [vmem:[#allocation2 + $0x2c8] sm:$0xff] }
 0x11d   :  { %v3764_v34 = vmul.f32 -1.442695, %v791_v33  ;;  %v784_v41 = vadd.f32 %v774_v27, %v691_v36  ;;  %v4356_v42 = vpop.f32.mrb[17].mxu1  ;;  %4803 = vmatpush1.bf16.msra.mxu1 %v4802_v10  ;;  %v1037_v27 = vld [vmem:[#allocation2 + $0x2b8] sm:$0xff]  ;;  %v1056_v33 = vld [vmem:[#allocation2 + $0x350] sm:$0xff] }
 0x11e   :  { %v695_v43 = vpop.f32.mrb[16].mxu0  ;;  %4805 = vmatprep.subr.bf16.mxu1 %v4804_v13  ;;  %v4814_v29 = vpack.c.bf16 %v1038_v28, %v1037_v27  ;;  %v4816_v36 = vpack.c.bf16 %v1056_v33, %v1055_v30  ;;  %v1010_v42 = vld [vmem:[#allocation2 + $0x1e0] sm:$0xff] }
 0x11f   :  { %5318 = vpow2.f32 %v3764_v34  ;;  %v792_v45 = vadd.f32 %v3763_v26, %v784_v41  ;;  %v696_v46 = vadd.f32 %v695_v43, %v615_v15  ;;  %v4339_v47 = vpop.f32.mrb[17].mxu0  ;;  %v1034_v15 = vld [vmem:[#allocation2 + $0x2a0] sm:$0xff]  ;;  %v1009_v34 = vld [vmem:[#allocation2 + $0x1d8] sm:$0xff] }
 0x120   :  { %v4806_v16 = vpack.c.bf16 %v1034_v15, %v1033_v14  ;;  %v4820_v43 = vpack.c.bf16 %v1010_v42, %v1009_v34  ;;  %v1011_v14 = vld [vmem:[#allocation2 + $0x1e8] sm:$0xff]  ;;  %v1012_v15 = vld [vmem:[#allocation2 + $0x1f0] sm:$0xff] }
 0x121   :  { %v3765_v48 = vmul.f32 -1.442695, %v792_v45  ;;  %v785_v49 = vadd.f32 %v779_v39, %v696_v46  ;;  %v1040_v39 = vld [vmem:[#allocation2 + $0x2d0] sm:$0xff] }
 0x122   :  { %4807 = vmatpush1.bf16.msra.mxu1 %v4806_v16  ;;  %v4818_v41 = vpack.c.bf16 %v1040_v39, %v1039_v38  ;;  %v3767_v45 = vld [vmem:[#allocation2 + $0x150] ss:$0 sm:$0xff] }
 0x123   :  { %5320 = vpow2.f32 %v3765_v48  ;;  %v793_v50 = vadd.f32 %v3763_v26, %v785_v49  ;;  %4809 = vmatprep.subr.bf16.mxu1 %v4808_v19  ;;  %v4812_v26 = vpack.c.bf16 %v1054_v25, %v1053_v24 }
 0x125   :  { %v3766_v51 = vmul.f32 -1.442695, %v793_v50 }
 0x126   :  { %4811 = vmatpush1.bf16.msra.mxu1 %v4810_v23 }
 0x127   :  { %5322 = vpow2.f32 %v3766_v51  ;;  %4813 = vmatprep.subr.bf16.mxu1 %v4812_v26  ;;  %v4824_v26 = vpack.c.bf16 %v1012_v15, %v1011_v14  ;;  %v997_v14 = vld [vmem:[#allocation2 + $0x178] sm:$0xff]  ;;  %v998_v15 = vld [vmem:[#allocation2 + $0x180] sm:$0xff] }
 0x129   :  { %v5319_v52 = vpop.eup %5318 }
 0x12a   :  { %v803_v31 = vadd.f32 1.0, %v5319_v52  ;;  %4815 = vmatpush1.bf16.msra.mxu1 %v4814_v29 }
 0x12b   :  { %4817 = vmatprep.subr.bf16.mxu1 %v4816_v36 }
 0x12c   :  { %5324 = vrcp.f32 %v803_v31 }
 0x12d   :  { %v5321_v32 = vpop.eup %5320 }
 0x12e   :  { %v804_v40 = vadd.f32 1.0, %v5321_v32  ;;  %4819 = vmatpush1.bf16.msra.mxu1 %v4818_v41 }
 0x12f   :  { %4821 = vmatprep.subr.bf16.mxu1 %v4820_v43 }
 0x130   :  { %5326 = vrcp.f32 %v804_v40 }
 0x131   :  { %v5323_v53 = vpop.eup %5322 }
 0x132   :  { %v805_v56 = vadd.f32 1.0, %v5323_v53 }
 0x134   :  { %5328 = vrcp.f32 %v805_v56 }
 0x136   :  { %v5325_v58 = vpop.eup %5324 }
 0x137   :  { %v5660_v59 = vmul.f32 %v5325_v58, %v528_v57 }
 0x139   :  { %4390 = vmatmul.mubr.f32.vlgmr.msra.gmra.mrb[18].mxu0 %v5660_v59 }
 0x13a   :  { %v5327_v21 = vpop.eup %5326  ;;  %4392 = vmatprep.mubr.msk.f32.mxu0 %vm5406_vm0, %v5407_v2 }
 0x13b   :  { %v5665_v37 = vmul.f32 %v5327_v21, %v529_v60  ;;  %v5685_v21 = vld [vmem:[#allocation2 + $0x158] sm:$0xff] }
 0x13d   :  { %4393 = vmatmul.mubr.f32.gmra.mrb[20].mxu0 %v5665_v37 }
 0x13e   :  { %v5329_v54 = vpop.eup %5328  ;;  %4395 = vmatprep.mubr.msk.f32.mxu0 %vm5406_vm0, %v5407_v2 }
 0x13f   :  { %v5670_v61 = vmul.f32 %v5329_v54, %v530_v44  ;;  %v5687_v44 = vld [vmem:[#allocation2 + $0x160] sm:$0xff] }
 0x140   :  { %v4822_v9 = vpack.c.bf16 %v5687_v44, %v5685_v21  ;;  %v996_v21 = vld [vmem:[#allocation2 + $0x170] sm:$0xff] }
 0x141   :  { %4396 = vmatmul.mubr.f32.gmra.mrb[22].mxu0 %v5670_v61 }
 0x20c   :  { %v902_v46 = vpop.f32.mrb[18].mxu0 }
 0x20d   :  { %v903_v47 = vadd.f32 %v3767_v45, %v902_v46  ;;  %v4391_v48 = vpop.f32.mrb[19].mxu0 }
 0x20f   :  { %v916_v49 = vadd.f32 %v903_v47, %v5660_v59 }
 0x210   :  { %v907_v50 = vpop.f32.mrb[20].mxu0 }
 0x211   :  { %v919_v51 = vmax.f32 %v916_v49, 0.0  ;;  %v908_v52 = vadd.f32 %v3767_v45, %v907_v50  ;;  %v4394_v31 = vpop.f32.mrb[21].mxu0 }
 0x213   :  { %v925_v32 = vcombine.high %v919_v51, %v919_v51  ;;  %v5675_v40 = vrot.slane %v919_v51, %v5446_v7  ;;  %v917_v53 = vadd.f32 %v908_v52, %v5665_v37 }
 0x214   :  { %v912_v55 = vpop.f32.mrb[22].mxu0 }
 0x215   :  { %v5679_v56 = vrot.slane %v925_v32, %v5446_v7  ;;  %v5683_v57 = vcombine.high %v5675_v40, %v5675_v40  ;;  %v920_v58 = vmax.f32 %v917_v53, 0.0  ;;  %v4397_v59 = vpop.f32.mrb[23].mxu0  ;;  %v913_v60 = vadd.f32 %v3767_v45, %v912_v55 }
 0x216   :  { %v3768_v6 = vrot.slane %v5675_v40, 9 }
 0x217   :  { %v969_v54 = vrot.slane %v5683_v57, 7  ;;  %v972_v62 = vrot.slane %v5679_v56, 7  ;;  %v1315_v37 = vcombine.low %v5683_v57, %v5679_v56  ;;  %v5695_v63 = vcombine.high %v5679_v56, %v5679_v56 }
 0x218   :  { %v942_v0 = vcombine.high %v920_v58, %v920_v58  ;;  %v949_v3 = vrot.slane %v920_v58, %v5446_v7  ;;  %v918_v4 = vadd.f32 %v913_v60, %v5670_v61  ;;  %v995_v60 = vld [vmem:[#allocation2 + $0x168] sm:$0xff] }
 0x219   :  { %v971_v8 = vrot.slane %v969_v54, 2  ;;  %v974_v10 = vrot.slane %v972_v62, 2  ;;  %v975_v13 = vrot.slane %v5695_v63, 7  ;;  %v970_v16 = vsel %vm5489_vm8, %v3768_v6, %v969_v54 }
 0x21a   :  { %v956_v11 = vrot.slane %v942_v0, %v5446_v7  ;;  %v957_v12 = vcombine.high %v949_v3, %v949_v3  ;;  %v1316_v17 = vcombine.low %v5695_v63, %v949_v3  ;;  %v921_v18 = vmax.f32 %v918_v4, 0.0  ;;  %v1013_v0 = vld [vmem:[#allocation2 + $0x1f8] sm:$0xff] }
 0x21b   :  { %v973_v61 = vsel %vm5489_vm8, %v971_v8, %v972_v62  ;;  %v977_v22 = vrot.slane %v975_v13, 2  ;;  %v978_v23 = vrot.slane %v949_v3, 7  ;;  %v976_v28 = vsel %vm5489_vm8, %v974_v10, %v975_v13  ;;  %v1014_v3 = vld [vmem:[#allocation2 + $0x200] sm:$0xff] }
 0x21c   :  { %v1057_v19 = vcombine.low %v970_v16, %v973_v61  ;;  %v958_v20 = vcombine.high %v956_v11, %v956_v11  ;;  %v3769_v24 = vrot.slane %v957_v12, 9  ;;  %v965_v25 = vrot.slane %v921_v18, %v5446_v7  ;;  %v1016_v61 = vld [vmem:[#allocation2 + $0x210] sm:$0xff] }
 0x21d   :  { %v982_v27 = vrot.slane %v956_v11, 7  ;;  %v979_v29 = vsel %vm5489_vm8, %v977_v22, %v978_v23  ;;  %v5715_v30 = vrot.slane %v1316_v17, %v5446_v7  ;;  %v1187_v45 = vcombine.low %v957_v12, %v956_v11  ;;  %v1017_v22 = vld [vmem:[#allocation2 + $0x218] sm:$0xff]  ;;  %v1018_v23 = vld [vmem:[#allocation2 + $0x220] sm:$0xff] }
 0x21e   :  { %v985_v33 = vrot.slane %v958_v20, 7  ;;  %v1058_v36 = vcombine.low %v976_v28, %v979_v29  ;;  %v966_v38 = vcombine.high %v965_v25, %v965_v25  ;;  %v988_v39 = vrot.slane %v965_v25, 7  ;;  %v1019_v28 = vld [vmem:[#allocation2 + $0x228] sm:$0xff]  ;;  %v1020_v29 = vld [vmem:[#allocation2 + $0x230] sm:$0xff] }
 0x21f   :  { %v1065_v34 = vrot.slane %v1057_v19, %v5446_v7  ;;  %v983_v41 = vsel %vm5489_vm8, %v3769_v24, %v982_v27  ;;  %v984_v42 = vrot.slane %v982_v27, 2  ;;  %v1188_v49 = vcombine.low %v958_v20, %v965_v25  ;;  %v999_v19 = vld [vmem:[#allocation2 + $0x188] sm:$0xff]  ;;  %v1002_v27 = vld [vmem:[#allocation2 + $0x1a0] sm:$0xff] }
 0x220   :  { %v987_v43 = vrot.slane %v985_v33, 2  ;;  %v1072_v46 = vrot.slane %v1058_v36, %v5446_v7  ;;  %v990_v47 = vrot.slane %v988_v39, 2  ;;  %v991_v48 = vrot.slane %v966_v38, 7 }
 0x221   :  { %v986_v50 = vsel %vm5489_vm8, %v984_v42, %v985_v33  ;;  %v5726_v52 = vrot.slane %v1187_v45, %v5446_v7  ;;  %v5729_v31 = vrot.slane %v1315_v37, %v5446_v7  ;;  %v5734_v58 = vrot.slane %v1188_v49, %v5446_v7  ;;  %v1005_v45 = vld [vmem:[#allocation2 + $0x1b8] sm:$0xff] }
 0x222   :  { %v989_v51 = vsel %vm5489_vm8, %v987_v43, %v988_v39  ;;  %v1073_v32 = vcombine.low %v1065_v34, %v1072_v46  ;;  %v992_v53 = vsel %vm5489_vm8, %v990_v47, %v991_v48  ;;  %v1074_v55 = vcombine.low %v983_v41, %v986_v50  ;;  %v1004_v39 = vld [vmem:[#allocation2 + $0x1b0] sm:$0xff]  ;;  %v1021_v34 = vld [vmem:[#allocation2 + $0x238] sm:$0xff]  ;;  %v1022_v41 = vld [vmem:[#allocation2 + $0x240] sm:$0xff] }
 0x223   :  { %v1075_v59 = vcombine.low %v989_v51, %v992_v53  ;;  %v1331_v44 = vcombine.low %v5729_v31, %v5715_v30  ;;  %v1332_v54 = vcombine.low %v956_v11, %v958_v20  ;;  %v1333_v62 = vcombine.low %v965_v25, %v966_v38  ;;  %v1000_v20 = vld [vmem:[#allocation2 + $0x190] sm:$0xff]  ;;  %v1003_v38 = vld [vmem:[#allocation2 + $0x1a8] sm:$0xff]  ;;  %v1006_v46 = vld [vmem:[#allocation2 + $0x1c0] sm:$0xff] }
 0x224   :  { %1158 = vmatmul.mubr.f32.vlgmr.msra.gmra.mrb[18].mxu1 %v1073_v32  ;;  %v1082_v37 = vrot.slane %v1074_v55, %v5446_v7  ;;  %v1203_v4 = vcombine.low %v5726_v52, %v5734_v58  ;;  %v4826_v11 = vpack.c.bf16 %v996_v21, %v995_v60  ;;  %v4828_v13 = vpack.c.bf16 %v1014_v3, %v1013_v0  ;;  %v1023_v47 = vld [vmem:[#allocation2 + $0x248] sm:$0xff]  ;;  %v1024_v48 = vld [vmem:[#allocation2 + $0x250] sm:$0xff]  ;;  %v1299_v55 = vld [vmem:[#allocation2 + $0x3d8] sm:$0xff] }
 0x225   :  { %4823 = vmatpush1.bf16.msra.mxu1 %v4822_v9  ;;  %1163 = vmatprep.mubr.f32.mxu1 %v5407_v2  ;;  %v1089_v6 = vrot.slane %v1075_v59, %v5446_v7  ;;  %v5744_v8 = vrot.slane %v1332_v54, %v5446_v7  ;;  %v5747_v10 = vrot.slane %v1333_v62, %v5446_v7  ;;  %v1015_v9 = vld [vmem:[#allocation2 + $0x208] sm:$0xff]  ;;  %v1008_v32 = vld [vmem:[#allocation2 + $0x1d0] sm:$0xff]  ;;  %v1300_v59 = vld [vmem:[#allocation2 + $0x3e0] sm:$0xff] }
 0x226   :  { %4825 = vmatprep.subr.bf16.mxu1 %v4824_v26  ;;  %v4830_v17 = vpack.c.bf16 %v998_v15, %v997_v14  ;;  %v4832_v18 = vpack.c.bf16 %v1016_v61, %v1015_v9  ;;  %v4834_v24 = vpack.c.bf16 %v1000_v20, %v999_v19  ;;  %v4836_v25 = vpack.c.bf16 %v1018_v23, %v1017_v22  ;;  %v1001_v26 = vld [vmem:[#allocation2 + $0x198] sm:$0xff]  ;;  %v1007_v51 = vld [vmem:[#allocation2 + $0x1c8] sm:$0xff]  ;;  %v1284_v0 = vld [vmem:[#allocation2 + $0x360] sm:$0xff] }
 0x227   :  { %v1090_v12 = vcombine.low %v1082_v37, %v1089_v6  ;;  %v1348_v16 = vcombine.low %v5744_v8, %v5747_v10  ;;  %v4838_v33 = vpack.c.bf16 %v1002_v27, %v1001_v26  ;;  %v4840_v36 = vpack.c.bf16 %v1020_v29, %v1019_v28  ;;  %v1283_v37 = vld [vmem:[#allocation2 + $0x358] sm:$0xff]  ;;  %v1301_v3 = vld [vmem:[#allocation2 + $0x3e8] sm:$0xff]  ;;  %v1302_v6 = vld [vmem:[#allocation2 + $0x3f0] sm:$0xff] }
 0x228   :  { %v4842_v42 = vpack.c.bf16 %v1004_v39, %v1003_v38  ;;  %v4844_v43 = vpack.c.bf16 %v1022_v41, %v1021_v34  ;;  %v4846_v49 = vpack.c.bf16 %v1006_v46, %v1005_v45  ;;  %v4848_v50 = vpack.c.bf16 %v1024_v48, %v1023_v47  ;;  %v1286_v14 = vld [vmem:[#allocation2 + $0x370] sm:$0xff]  ;;  %v1287_v61 = vld [vmem:[#allocation2 + $0x378] sm:$0xff]  ;;  %v1289_v23 = vld [vmem:[#allocation2 + $0x388] sm:$0xff] }
 0x229   :  { %1164 = vmatmul.mubr.f32.gmra.mrb[20].mxu1 %v1090_v12  ;;  %v1171_v53 = vcombine.low %v5679_v56, %v5695_v63  ;;  %v1170_v60 = vcombine.low %v5675_v40, %v5683_v57  ;;  %v4850_v21 = vpack.c.bf16 %v1008_v32, %v1007_v51  ;;  %v4852_v62 = vpack.c.bf16 %v1300_v59, %v1299_v55  ;;  %v1303_v40 = vld [vmem:[#allocation2 + $0x3f8] sm:$0xff]  ;;  %v1304_v57 = vld [vmem:[#allocation2 + $0x400] sm:$0xff]  ;;  %v1306_v19 = vld [vmem:[#allocation2 + $0x410] sm:$0xff] }
 0x22a   :  { %4827 = vmatpush1.bf16.msra.mxu1 %v4826_v11  ;;  %1270 = vmatprep.mubr.f32.mxu1 %v5407_v2  ;;  %v4854_v12 = vpack.c.bf16 %v1284_v0, %v1283_v37  ;;  %v4856_v63 = vpack.c.bf16 %v1302_v6, %v1301_v3  ;;  %v4860_v9 = vpack.c.bf16 %v1304_v57, %v1303_v40  ;;  %v1308_v26 = vld [vmem:[#allocation2 + $0x420] sm:$0xff]  ;;  %v1291_v29 = vld [vmem:[#allocation2 + $0x398] sm:$0xff]  ;;  %v1310_v38 = vld [vmem:[#allocation2 + $0x430] sm:$0xff] }
 0x22b   :  { %4829 = vmatprep.subr.bf16.mxu1 %v4828_v13  ;;  %v1185_v54 = vrot.slane %v1171_v53, %v5446_v7  ;;  %v1178_v11 = vrot.slane %v1170_v60, %v5446_v7  ;;  %v1285_v13 = vld [vmem:[#allocation2 + $0x368] sm:$0xff]  ;;  %v1294_v39 = vld [vmem:[#allocation2 + $0x3b0] sm:$0xff]  ;;  %v1311_v34 = vld [vmem:[#allocation2 + $0x438] sm:$0xff] }
 0x22c   :  { %v4858_v15 = vpack.c.bf16 %v1286_v14, %v1285_v13  ;;  %v1312_v41 = vld [vmem:[#allocation2 + $0x440] sm:$0xff]  ;;  %v1295_v45 = vld [vmem:[#allocation2 + $0x3b8] sm:$0xff]  ;;  %v1313_v47 = vld [vmem:[#allocation2 + $0x448] sm:$0xff] }
 0x22d   :  { %v1186_v56 = vcombine.low %v1178_v11, %v1185_v54  ;;  %v1296_v46 = vld [vmem:[#allocation2 + $0x3c0] sm:$0xff]  ;;  %v1314_v48 = vld [vmem:[#allocation2 + $0x450] sm:$0xff]  ;;  %v1297_v51 = vld [vmem:[#allocation2 + $0x3c8] sm:$0xff] }
 0x22e   :  { %4831 = vmatpush1.bf16.msra.mxu1 %v4830_v17  ;;  %v1288_v17 = vld [vmem:[#allocation2 + $0x380] sm:$0xff]  ;;  %v1298_v32 = vld [vmem:[#allocation2 + $0x3d0] sm:$0xff]  ;;  %v3770_v55 = vld [vmem:[#allocation2 + $0x458] ss:$0 sm:$0xff] }
 0x22f   :  { %4833 = vmatprep.subr.bf16.mxu1 %v4832_v18  ;;  %v1305_v18 = vld [vmem:[#allocation2 + $0x408] sm:$0xff]  ;;  %v4862_v20 = vpack.c.bf16 %v1288_v17, %v1287_v61  ;;  %v4882_v53 = vpack.c.bf16 %v1298_v32, %v1297_v51  ;;  %v3771_v59 = vld [vmem:[#allocation2 + $0x460] ss:$0 sm:$0xff]  ;;  %v2045_v51 = vld [vmem:[#allocation2 + $0x930] sm:$0xff] }
 0x230   :  { %v4864_v22 = vpack.c.bf16 %v1306_v19, %v1305_v18 }
 0x232   :  { %4835 = vmatpush1.bf16.msra.mxu1 %v4834_v24  ;;  %v1290_v24 = vld [vmem:[#allocation2 + $0x390] sm:$0xff] }
 0x233   :  { %4837 = vmatprep.subr.bf16.mxu1 %v4836_v25  ;;  %v1307_v25 = vld [vmem:[#allocation2 + $0x418] sm:$0xff]  ;;  %v4866_v27 = vpack.c.bf16 %v1290_v24, %v1289_v23  ;;  %v2041_v23 = vld [vmem:[#allocation2 + $0x910] sm:$0xff] }
 0x234   :  { %v4868_v28 = vpack.c.bf16 %v1308_v26, %v1307_v25  ;;  %v2042_v25 = vld [vmem:[#allocation2 + $0x918] sm:$0xff]  ;;  %v1602_v26 = vld [vmem:[#allocation2 + $0x588] sm:$0xff] }
 0x236   :  { %4839 = vmatpush1.bf16.msra.mxu1 %v4838_v33  ;;  %v1292_v33 = vld [vmem:[#allocation2 + $0x3a0] sm:$0xff] }
 0x237   :  { %4841 = vmatprep.subr.bf16.mxu1 %v4840_v36  ;;  %v1309_v36 = vld [vmem:[#allocation2 + $0x428] sm:$0xff]  ;;  %v4870_v52 = vpack.c.bf16 %v1292_v33, %v1291_v29  ;;  %v2025_v33 = vld [vmem:[#allocation2 + $0x890] sm:$0xff] }
 0x238   :  { %v4872_v58 = vpack.c.bf16 %v1310_v38, %v1309_v36  ;;  %v2026_v36 = vld [vmem:[#allocation2 + $0x898] sm:$0xff] }
 0x239   :  { %v4982_v38 = vpack.c.bf16 %v2026_v36, %v2025_v33 }
 0x23a   :  { %4843 = vmatpush1.bf16.msra.mxu1 %v4842_v42 }
 0x23b   :  { %4845 = vmatprep.subr.bf16.mxu1 %v4844_v43  ;;  %v4876_v43 = vpack.c.bf16 %v1312_v41, %v1311_v34  ;;  %v2044_v34 = vld [vmem:[#allocation2 + $0x928] sm:$0xff]  ;;  %v1604_v41 = vld [vmem:[#allocation2 + $0x598] sm:$0xff] }
 0x23e   :  { %4847 = vmatpush1.bf16.msra.mxu1 %v4846_v49  ;;  %v4878_v49 = vpack.c.bf16 %v1296_v46, %v1295_v45  ;;  %v2027_v46 = vld [vmem:[#allocation2 + $0x8a0] sm:$0xff] }
 0x23f   :  { %4849 = vmatprep.subr.bf16.mxu1 %v4848_v50  ;;  %v4880_v50 = vpack.c.bf16 %v1314_v48, %v1313_v47  ;;  %v2028_v47 = vld [vmem:[#allocation2 + $0x8a8] sm:$0xff] }
 0x240   :  { %v4986_v48 = vpack.c.bf16 %v2028_v47, %v2027_v46  ;;  %v2054_v46 = vld [vmem:[#allocation2 + $0x978] sm:$0xff]  ;;  %v1614_v47 = vld [vmem:[#allocation2 + $0x5e8] sm:$0xff] }
 0x242   :  { %4851 = vmatpush1.bf16.msra.mxu1 %v4850_v21 }
 0x243   :  { %4853 = vmatprep.subr.bf16.mxu1 %v4852_v62 }
 0x245   :  { %1271 = vmatmul.mubr.f32.vlgmr.msra.gmra.mrb[18].mxu1 %v1186_v56 }
 0x246   :  { %4855 = vmatpush1.bf16.msra.mxu1 %v4854_v12  ;;  %1276 = vmatprep.mubr.f32.mxu1 %v5407_v2 }
 0x247   :  { %4857 = vmatprep.subr.bf16.mxu1 %v4856_v63 }
 0x249   :  { %1277 = vmatmul.mubr.f32.gmra.mrb[20].mxu1 %v1203_v4  ;;  %v1293_v4 = vld [vmem:[#allocation2 + $0x3a8] sm:$0xff] }
 0x24a   :  { %4859 = vmatpush1.bf16.msra.mxu1 %v4858_v15  ;;  %1415 = vmatprep.mubr.f32.mxu1 %v5407_v2  ;;  %v4874_v42 = vpack.c.bf16 %v1294_v39, %v1293_v4  ;;  %v2043_v4 = vld [vmem:[#allocation2 + $0x920] sm:$0xff] }
 0x24b   :  { %4861 = vmatprep.subr.bf16.mxu1 %v4860_v9 }
 0x24e   :  { %4863 = vmatpush1.bf16.msra.mxu1 %v4862_v20  ;;  %v1618_v20 = vld [vmem:[#allocation2 + $0x608] sm:$0xff] }
 0x24f   :  { %4865 = vmatprep.subr.bf16.mxu1 %v4864_v22  ;;  %v1619_v22 = vld [vmem:[#allocation2 + $0x610] sm:$0xff] }
 0x250   :  { %v4884_v24 = vpack.c.bf16 %v1619_v22, %v1618_v20 }
 0x252   :  { %4867 = vmatpush1.bf16.msra.mxu1 %v4866_v27  ;;  %v1603_v27 = vld [vmem:[#allocation2 + $0x590] sm:$0xff]  ;;  %4885 = vmatprep.subr.bf16.mxu0 %v4884_v24  ;;  %v2034_v24 = vld [vmem:[#allocation2 + $0x8d8] sm:$0xff] }
 0x253   :  { %4869 = vmatprep.subr.bf16.mxu1 %v4868_v28  ;;  %v4980_v28 = vpack.c.bf16 %v2042_v25, %v2041_v23  ;;  %v4886_v29 = vpack.c.bf16 %v1603_v27, %v1602_v26  ;;  %v2033_v23 = vld [vmem:[#allocation2 + $0x8d0] sm:$0xff]  ;;  %v1628_v25 = vld [vmem:[#allocation2 + $0x658] sm:$0xff]  ;;  %v1629_v27 = vld [vmem:[#allocation2 + $0x660] sm:$0xff] }
 0x254   :  { %v4998_v26 = vpack.c.bf16 %v2034_v24, %v2033_v23  ;;  %v4904_v33 = vpack.c.bf16 %v1629_v27, %v1628_v25  ;;  %v3774_v24 = vld [vmem:[#allocation2 + $0x478] ss:$0 sm:$0xff]  ;;  %v3775_v25 = vld [vmem:[#allocation2 + $0x480] ss:$0 sm:$0xff] }
 0x255   :  { %4887 = vmatpush3.bf16.msra.mxu0 %v4886_v29  ;;  %v2052_v29 = vld [vmem:[#allocation2 + $0x968] sm:$0xff] }
 0x256   :  { %4871 = vmatpush1.bf16.msra.mxu1 %v4870_v52  ;;  %v1620_v52 = vld [vmem:[#allocation2 + $0x618] sm:$0xff] }
 0x257   :  { %4873 = vmatprep.subr.bf16.mxu1 %v4872_v58  ;;  %v1621_v58 = vld [vmem:[#allocation2 + $0x620] sm:$0xff] }
 0x258   :  { %v4888_v39 = vpack.c.bf16 %v1621_v58, %v1620_v52  ;;  %v1613_v52 = vld [vmem:[#allocation2 + $0x5e0] sm:$0xff] }
 0x259   :  { %v2035_v58 = vld [vmem:[#allocation2 + $0x8e0] sm:$0xff] }
 0x25a   :  { %4875 = vmatpush1.bf16.msra.mxu1 %v4874_v42  ;;  %v1605_v42 = vld [vmem:[#allocation2 + $0x5a0] sm:$0xff]  ;;  %4889 = vmatprep.subr.bf16.mxu0 %v4888_v39  ;;  %v2036_v39 = vld [vmem:[#allocation2 + $0x8e8] sm:$0xff] }
 0x25b   :  { %4877 = vmatprep.subr.bf16.mxu1 %v4876_v43  ;;  %v4984_v43 = vpack.c.bf16 %v2044_v34, %v2043_v4  ;;  %v4890_v45 = vpack.c.bf16 %v1605_v42, %v1604_v41  ;;  %v1630_v34 = vld [vmem:[#allocation2 + $0x668] sm:$0xff]  ;;  %v1631_v41 = vld [vmem:[#allocation2 + $0x670] sm:$0xff]  ;;  %v5002_v42 = vpack.c.bf16 %v2036_v39, %v2035_v58 }
 0x25d   :  { %4891 = vmatpush3.bf16.msra.mxu0 %v4890_v45  ;;  %v2053_v45 = vld [vmem:[#allocation2 + $0x970] sm:$0xff] }
 0x25e   :  { %4879 = vmatpush1.bf16.msra.mxu1 %v4878_v49  ;;  %v1622_v49 = vld [vmem:[#allocation2 + $0x628] sm:$0xff] }
 0x25f   :  { %4881 = vmatprep.subr.bf16.mxu1 %v4880_v50  ;;  %v1623_v50 = vld [vmem:[#allocation2 + $0x630] sm:$0xff] }
 0x260   :  { %v4892_v32 = vpack.c.bf16 %v1623_v50, %v1622_v49  ;;  %v1615_v49 = vld [vmem:[#allocation2 + $0x5f0] sm:$0xff] }
 0x261   :  { %v2037_v50 = vld [vmem:[#allocation2 + $0x8f0] sm:$0xff] }
 0x262   :  { %4883 = vmatpush1.bf16.msra.mxu1 %v4882_v53  ;;  %v2046_v53 = vld [vmem:[#allocation2 + $0x938] sm:$0xff]  ;;  %4893 = vmatprep.subr.bf16.mxu0 %v4892_v32  ;;  %v4910_v32 = vpack.c.bf16 %v1615_v49, %v1614_v47 }
 0x263   :  { %4981 = vmatprep.subr.bf16.mxu1 %v4980_v28  ;;  %v2051_v28 = vld [vmem:[#allocation2 + $0x960] sm:$0xff] }
 0x264   :  { %v5000_v36 = vpack.c.bf16 %v2052_v29, %v2051_v28 }
 0x265   :  { %1416 = vmatmul.mubr.f32.vlgmr.msra.gmra.mrb[18].mxu1 %v1331_v44 }
 0x266   :  { %1421 = vmatprep.mubr.f32.mxu1 %v5407_v2  ;;  %4983 = vmatpush3.bf16.msra.mxu1 %v4982_v38  ;;  %v1612_v38 = vld [vmem:[#allocation2 + $0x5d8] sm:$0xff] }
 0x267   :  { %4985 = vmatprep.subr.bf16.mxu1 %v4984_v43  ;;  %v4906_v4 = vpack.c.bf16 %v1613_v52, %v1612_v38  ;;  %v4908_v43 = vpack.c.bf16 %v1631_v41, %v1630_v34 }
 0x269   :  { %1422 = vmatmul.mubr.f32.gmra.mrb[20].mxu1 %v1348_v16 }
 0x26a   :  { %4987 = vmatpush3.bf16.msra.mxu1 %v4986_v48  ;;  %v5004_v48 = vpack.c.bf16 %v2054_v46, %v2053_v45 }
 0x338   :  { %v1417_v60 = vpop.f32.mrb[18].mxu1 }
 0x339   :  { %v1442_v21 = vadd.f32 %v3770_v55, %v1417_v60  ;;  %v1419_v54 = vpop.f32.mrb[19].mxu1  ;;  %v4988_v60 = vpack.c.bf16 %v2046_v53, %v2045_v51  ;;  %v2038_v51 = vld [vmem:[#allocation2 + $0x8f8] sm:$0xff] }
 0x33a   :  { %v1443_v62 = vadd.f32 %v3771_v59, %v1419_v54  ;;  %v2029_v54 = vld [vmem:[#allocation2 + $0x8b0] sm:$0xff]  ;;  %v1632_v53 = vld [vmem:[#allocation2 + $0x678] sm:$0xff] }
 0x33b   :  { %v1446_v37 = vmax.f32 %v1442_v21, 0.0  ;;  %4989 = vmatprep.subr.bf16.mxu1 %v4988_v60  ;;  %v5006_v60 = vpack.c.bf16 %v2038_v51, %v2037_v50 }
 0x33c   :  { %v1447_v0 = vmax.f32 %v1443_v62, 0.0  ;;  %v1423_v3 = vpop.f32.mrb[20].mxu1  ;;  %v2030_v62 = vld [vmem:[#allocation2 + $0x8b8] sm:$0xff] }
 0x33d   :  { %v1444_v6 = vadd.f32 %v3770_v55, %v1423_v3  ;;  %v1425_v11 = vpop.f32.mrb[21].mxu1  ;;  %v1606_v55 = vld [vmem:[#allocation2 + $0x5a8] sm:$0xff]  ;;  %v1625_v3 = vld [vmem:[#allocation2 + $0x640] sm:$0xff] }
 0x33e   :  { %v1445_v12 = vadd.f32 %v3771_v59, %v1425_v11  ;;  %v1450_v30 = vadd.f32 %v1447_v0, %v1446_v37  ;;  %v1607_v59 = vld [vmem:[#allocation2 + $0x5b0] sm:$0xff] }
 0x33f   :  { %v1448_v31 = vmax.f32 %v1444_v6, 0.0  ;;  %v4894_v21 = vpack.c.bf16 %v1607_v59, %v1606_v55  ;;  %v2047_v6 = vld [vmem:[#allocation2 + $0x940] sm:$0xff] }
 0x340   :  { %v1449_v44 = vmax.f32 %v1445_v12, 0.0  ;;  %1451 = vadd.xlane.f32.xlu0 %v1450_v30  ;;  %v2048_v12 = vld [vmem:[#allocation2 + $0x948] sm:$0xff]  ;;  %v1608_v30 = vld [vmem:[#allocation2 + $0x5b8] sm:$0xff]  ;;  %v1633_v55 = vld [vmem:[#allocation2 + $0x680] sm:$0xff] }
 0x341   :  { %4895 = vmatpush3.bf16.msra.mxu0 %v4894_v21  ;;  %v2055_v59 = vld [vmem:[#allocation2 + $0x980] sm:$0xff]  ;;  %v4912_v21 = vpack.c.bf16 %v1633_v55, %v1632_v53 }
 0x342   :  { %v1453_v56 = vadd.f32 %v1449_v44, %v1448_v31 }
 0x344   :  { %1454 = vadd.xlane.f32.xlu0 %v1453_v56 }
 0x3cd   :  { %v1452_v8 = vpop.xlane.xlu0 %1451 }
 0x3ce   :  { %v1456_v10 = vmul.f32 0.00390625, %v1452_v8  ;;  %v2031_v8 = vld [vmem:[#allocation2 + $0x8c0] sm:$0xff] }
 0x3d0   :  { %v5770_v16 = vsub.f32 %v1446_v37, %v1456_v10  ;;  %v5772_v63 = vsub.f32 %v1447_v0, %v1456_v10  ;;  %v4990_v37 = vpack.c.bf16 %v2030_v62, %v2029_v54  ;;  %v1624_v0 = vld [vmem:[#allocation2 + $0x638] sm:$0xff]  ;;  %v2032_v10 = vld [vmem:[#allocation2 + $0x8c8] sm:$0xff] }
 0x3d1   :  { %v1455_v13 = vpop.xlane.xlu0 %1454  ;;  %v4896_v11 = vpack.c.bf16 %v1625_v3, %v1624_v0  ;;  %v2056_v54 = vld [vmem:[#allocation2 + $0x988] sm:$0xff]  ;;  %v1616_v62 = vld [vmem:[#allocation2 + $0x5f8] sm:$0xff]  ;;  %v2039_v3 = vld [vmem:[#allocation2 + $0x900] sm:$0xff] }
 0x3d2   :  { %v1457_v14 = vmul.f32 0.00390625, %v1455_v13  ;;  %v1462_v40 = vmul.f32 %v5770_v16, %v5770_v16  ;;  %v1463_v57 = vmul.f32 %v5772_v63, %v5772_v63  ;;  %4991 = vmatpush3.bf16.msra.mxu1 %v4990_v37  ;;  %v4994_v13 = vpack.c.bf16 %v2032_v10, %v2031_v8  ;;  %v1617_v37 = vld [vmem:[#allocation2 + $0x600] sm:$0xff]  ;;  %v2224_v8 = vld [vmem:[#allocation2 + $0xa18] sm:$0xff] }
 0x3d3   :  { %4897 = vmatprep.subr.bf16.mxu0 %v4896_v11  ;;  %v5008_v0 = vpack.c.bf16 %v2056_v54, %v2055_v59  ;;  %v4914_v11 = vpack.c.bf16 %v1617_v37, %v1616_v62 }
 0x3d4   :  { %v5778_v15 = vsub.f32 %v1448_v31, %v1457_v14  ;;  %v5780_v9 = vsub.f32 %v1449_v44, %v1457_v14  ;;  %v1466_v61 = vadd.f32 %v1463_v57, %v1462_v40  ;;  %v1609_v31 = vld [vmem:[#allocation2 + $0x5c0] sm:$0xff]  ;;  %v4992_v44 = vpack.c.bf16 %v2048_v12, %v2047_v6  ;;  %v1626_v14 = vld [vmem:[#allocation2 + $0x648] sm:$0xff]  ;;  %v1627_v40 = vld [vmem:[#allocation2 + $0x650] sm:$0xff] }
 0x3d5   :  { %v4898_v56 = vpack.c.bf16 %v1609_v31, %v1608_v30  ;;  %v2049_v57 = vld [vmem:[#allocation2 + $0x950] sm:$0xff]  ;;  %v2040_v6 = vld [vmem:[#allocation2 + $0x908] sm:$0xff] }
 0x3d6   :  { %1467 = vadd.xlane.f32.xlu1 %v1466_v61  ;;  %v1464_v17 = vmul.f32 %v5778_v15, %v5778_v15  ;;  %v1465_v18 = vmul.f32 %v5780_v9, %v5780_v9  ;;  %4993 = vmatprep.subr.bf16.mxu1 %v4992_v44  ;;  %v4900_v61 = vpack.c.bf16 %v1627_v40, %v1626_v14  ;;  %v1586_v30 = vld [vmem:[#allocation2 + $0x508] sm:$0xff]  ;;  %v1587_v31 = vld [vmem:[#allocation2 + $0x510] sm:$0xff] }
 0x3d7   :  { %4899 = vmatpush3.bf16.msra.mxu0 %v4898_v56  ;;  %4995 = vmatpush3.bf16.msra.mxu1 %v4994_v13  ;;  %v5010_v12 = vpack.c.bf16 %v2040_v6, %v2039_v3  ;;  %v2223_v44 = vld [vmem:[#allocation2 + $0xa10] sm:$0xff]  ;;  %v4916_v56 = vpack.c.bf16 %v1587_v31, %v1586_v30  ;;  %v1570_v31 = vld [vmem:[#allocation2 + $0x488] sm:$0xff] }
 0x3d8   :  { %v1469_v19 = vadd.f32 %v1465_v18, %v1464_v17  ;;  %v2050_v17 = vld [vmem:[#allocation2 + $0x958] sm:$0xff]  ;;  %v1610_v18 = vld [vmem:[#allocation2 + $0x5c8] sm:$0xff]  ;;  %4901 = vmatprep.subr.bf16.mxu0 %v4900_v61  ;;  %v5044_v10 = vpack.c.bf16 %v2224_v8, %v2223_v44  ;;  %v1571_v44 = vld [vmem:[#allocation2 + $0x490] sm:$0xff] }
 0x3d9   :  { %v4996_v20 = vpack.c.bf16 %v2050_v17, %v2049_v57  ;;  %v2208_v8 = vld [vmem:[#allocation2 + $0x998] sm:$0xff] }
 0x3da   :  { %1470 = vadd.xlane.f32.xlu1 %v1469_v19  ;;  %v1611_v19 = vld [vmem:[#allocation2 + $0x5d0] sm:$0xff] }
 0x3db   :  { %v4902_v22 = vpack.c.bf16 %v1611_v19, %v1610_v18  ;;  %4997 = vmatprep.subr.bf16.mxu1 %v4996_v20  ;;  %v3772_v19 = vld [vmem:[#allocation2 + $0x468] ss:$0 sm:$0xff]  ;;  %v3773_v20 = vld [vmem:[#allocation2 + $0x470] ss:$0 sm:$0xff] }
 0x3dc   :  { %4999 = vmatpush3.bf16.msra.mxu1 %v4998_v26 }
 0x3dd   :  { %4903 = vmatpush3.bf16.msra.mxu0 %v4902_v22  ;;  %5001 = vmatprep.subr.bf16.mxu1 %v5000_v36 }
 0x3de   :  { %4905 = vmatprep.subr.bf16.mxu0 %v4904_v33 }
 0x3e0   :  { %5003 = vmatpush3.bf16.msra.mxu1 %v5002_v42 }
 0x3e1   :  { %4907 = vmatpush3.bf16.msra.mxu0 %v4906_v4  ;;  %5005 = vmatprep.subr.bf16.mxu1 %v5004_v48 }
 0x3e2   :  { %4909 = vmatprep.subr.bf16.mxu0 %v4908_v43 }
 0x3e4   :  { %5007 = vmatpush3.bf16.msra.mxu1 %v5006_v60 }
 0x3e5   :  { %4911 = vmatpush3.bf16.msra.mxu0 %v4910_v32  ;;  %5009 = vmatprep.subr.bf16.mxu1 %v5008_v0 }
 0x3e6   :  { %4913 = vmatprep.subr.bf16.mxu0 %v4912_v21 }
 0x3e8   :  { %5011 = vmatpush3.bf16.msra.mxu1 %v5010_v12 }
 0x3e9   :  { %4915 = vmatpush3.bf16.msra.mxu0 %v4914_v11  ;;  %5045 = vmatprep.subr.bf16.mxu1 %v5044_v10 }
 0x3ea   :  { %4917 = vmatprep.subr.bf16.mxu0 %v4916_v56  ;;  %v2207_v56 = vld [vmem:[#allocation2 + $0x990] sm:$0xff] }
 0x463   :  { %v1468_v13 = vpop.xlane.xlu1 %1467 }
 0x464   :  { %v1472_v14 = vmul.f32 0.00390625, %v1468_v13 }
 0x466   :  { %v1474_v40 = vadd.f32 1e-05, %v1472_v14 }
 0x467   :  { %v1471_v57 = vpop.xlane.xlu1 %1470 }
 0x468   :  { %5330 = vrsqrt.f32 %v1474_v40  ;;  %v1473_v61 = vmul.f32 0.00390625, %v1471_v57 }
 0x46a   :  { %v1475_v17 = vadd.f32 1e-05, %v1473_v61  ;;  %v1588_v61 = vld [vmem:[#allocation2 + $0x518] sm:$0xff] }
 0x46c   :  { %5332 = vrsqrt.f32 %v1475_v17  ;;  %v4918_v17 = vpack.c.bf16 %v1571_v44, %v1570_v31  ;;  %v2213_v44 = vld [vmem:[#allocation2 + $0x9c0] sm:$0xff] }
 0x472   :  { %v5331_v18 = vpop.eup %5330 }
 0x473   :  { %v1478_v22 = vmul.f32 %v5331_v18, %v5770_v16  ;;  %v1479_v23 = vmul.f32 %v5331_v18, %v5772_v63  ;;  %v1589_v18 = vld [vmem:[#allocation2 + $0x520] sm:$0xff] }
 0x475   :  { %v1492_v26 = vmul.f32 %v3772_v19, %v1478_v22  ;;  %v1493_v27 = vmul.f32 %v3773_v20, %v1479_v23 }
 0x476   :  { %v5333_v28 = vpop.eup %5332 }
 0x477   :  { %v1506_v29 = vadd.f32 %v3774_v24, %v1492_v26  ;;  %v1507_v33 = vadd.f32 %v3775_v25, %v1493_v27  ;;  %v1480_v36 = vmul.f32 %v5333_v28, %v5778_v15  ;;  %v1481_v38 = vmul.f32 %v5333_v28, %v5780_v9  ;;  %v1572_v28 = vld [vmem:[#allocation2 + $0x498] sm:$0xff] }
 0x478   :  { %v5046_v26 = vpack.c.bf16 %v2208_v8, %v2207_v56  ;;  %v2214_v56 = vld [vmem:[#allocation2 + $0x9c8] sm:$0xff] }
 0x479   :  { %v1514_v52 = vcombine.low %v1506_v29, %v1507_v33  ;;  %v1515_v58 = vcombine.high %v1506_v29, %v1507_v33  ;;  %v1494_v4 = vmul.f32 %v3772_v19, %v1480_v36  ;;  %v1495_v39 = vmul.f32 %v3773_v20, %v1481_v38  ;;  %v2225_v19 = vld [vmem:[#allocation2 + $0xa20] sm:$0xff]  ;;  %v2226_v20 = vld [vmem:[#allocation2 + $0xa28] sm:$0xff] }
 0x47a   :  { %v1573_v29 = vld [vmem:[#allocation2 + $0x4a0] sm:$0xff]  ;;  %v2210_v36 = vld [vmem:[#allocation2 + $0x9a8] sm:$0xff] }
 0x47b   :  { %v5791_v34 = vrot.slane %v1515_v58, %v5446_v7  ;;  %v1508_v16 = vadd.f32 %v3774_v24, %v1494_v4  ;;  %v1509_v63 = vadd.f32 %v3775_v25, %v1495_v39  ;;  %v5794_v41 = vrot.slane %v1514_v52, %v5446_v7  ;;  %v2209_v33 = vld [vmem:[#allocation2 + $0x9a0] sm:$0xff]  ;;  %v1594_v8 = vld [vmem:[#allocation2 + $0x548] sm:$0xff] }
 0x47c   :  { %v4920_v4 = vpack.c.bf16 %v1589_v18, %v1588_v61  ;;  %v5048_v39 = vpack.c.bf16 %v2226_v20, %v2225_v19  ;;  %v1578_v61 = vld [vmem:[#allocation2 + $0x4c8] sm:$0xff]  ;;  %v2215_v20 = vld [vmem:[#allocation2 + $0x9d0] sm:$0xff] }
 0x47d   :  { %v1531_v42 = vcombine.low %v1508_v16, %v1509_v63  ;;  %v1532_v43 = vcombine.high %v1508_v16, %v1509_v63  ;;  %v5798_v45 = vcombine.high %v5794_v41, %v5794_v41  ;;  %v1548_v15 = vcombine.high %v5791_v34, %v5791_v34  ;;  %v1590_v16 = vld [vmem:[#allocation2 + $0x528] sm:$0xff] }
 0x47e   :  { %v1555_v9 = vrot.slane %v5791_v34, 7  ;;  %v3776_v49 = vrot.slane %v5794_v41, 9 }
 0x47f   :  { %v1539_v46 = vrot.slane %v1531_v42, %v5446_v7  ;;  %v5805_v47 = vrot.slane %v1532_v43, %v5446_v7  ;;  %v1552_v48 = vrot.slane %v5798_v45, 7  ;;  %v1558_v53 = vrot.slane %v1548_v15, 7  ;;  %v1591_v43 = vld [vmem:[#allocation2 + $0x530] sm:$0xff] }
 0x480   :  { %v1557_v32 = vrot.slane %v1555_v9, 2  ;;  %v1740_v38 = vcombine.low %v5794_v41, %v5798_v45  ;;  %v1878_v52 = vcombine.low %v5798_v45, %v5791_v34  ;;  %v2227_v15 = vld [vmem:[#allocation2 + $0xa30] sm:$0xff]  ;;  %v2228_v41 = vld [vmem:[#allocation2 + $0xa38] sm:$0xff]  ;;  %v5050_v45 = vpack.c.bf16 %v2210_v36, %v2209_v33  ;;  %v1581_v33 = vld [vmem:[#allocation2 + $0x4e0] sm:$0xff] }
 0x481   :  { %v5809_v50 = vcombine.high %v1539_v46, %v1539_v46  ;;  %v1554_v51 = vrot.slane %v1552_v48, 2  ;;  %v5813_v55 = vcombine.high %v5805_v47, %v5805_v47  ;;  %v1565_v59 = vrot.slane %v5805_v47, 7 }
 0x482   :  { %v1553_v60 = vsel %vm5489_vm8, %v3776_v49, %v1552_v48  ;;  %v3777_v54 = vrot.slane %v1539_v46, 9  ;;  %v1559_v6 = vsel %vm5489_vm8, %v1557_v32, %v1558_v53  ;;  %v1741_v22 = vcombine.low %v5791_v34, %v1539_v46  ;;  %v2212_v32 = vld [vmem:[#allocation2 + $0x9b8] sm:$0xff] }
 0x483   :  { %v1556_v21 = vsel %vm5489_vm8, %v1554_v51, %v1555_v9  ;;  %v1562_v62 = vrot.slane %v5809_v50, 7  ;;  %v1567_v0 = vrot.slane %v1565_v59, 2  ;;  %v1568_v3 = vrot.slane %v5813_v55, 7  ;;  %v1574_v9 = vld [vmem:[#allocation2 + $0x4a8] sm:$0xff]  ;;  %v2211_v51 = vld [vmem:[#allocation2 + $0x9b0] sm:$0xff]  ;;  %v1592_v53 = vld [vmem:[#allocation2 + $0x538] sm:$0xff] }
 0x484   :  { %v1634_v37 = vcombine.low %v1553_v60, %v1556_v21  ;;  %v3778_v23 = vcombine.high %v5791_v34, %v1539_v46  ;;  %v5840_v63 = vrot.slane %v1741_v22, %v5446_v7  ;;  %v4922_v34 = vpack.c.bf16 %v1573_v29, %v1572_v28  ;;  %v1575_v46 = vld [vmem:[#allocation2 + $0x4b0] sm:$0xff]  ;;  %v1593_v21 = vld [vmem:[#allocation2 + $0x540] sm:$0xff]  ;;  %v2216_v22 = vld [vmem:[#allocation2 + $0x9d8] sm:$0xff] }
 0x485   :  { %v1563_v11 = vsel %vm5489_vm8, %v3777_v54, %v1562_v62  ;;  %v1564_v12 = vrot.slane %v1562_v62, 2  ;;  %v1569_v13 = vsel %vm5489_vm8, %v1567_v0, %v1568_v3  ;;  %v5846_v48 = vrot.slane %v1740_v38, %v5446_v7  ;;  %v2229_v54 = vld [vmem:[#allocation2 + $0xa40] sm:$0xff]  ;;  %v2230_v62 = vld [vmem:[#allocation2 + $0xa48] sm:$0xff]  ;;  %v1580_v29 = vld [vmem:[#allocation2 + $0x4d8] sm:$0xff] }
 0x486   :  { %v1635_v30 = vcombine.low %v1559_v6, %v1563_v11  ;;  %v1642_v14 = vrot.slane %v1634_v37, %v5446_v7  ;;  %v5843_v42 = vrot.slane %v3778_v23, %v5446_v7  ;;  %v5849_v49 = vrot.slane %v1878_v52, %v5446_v7  ;;  %v1576_v11 = vld [vmem:[#allocation2 + $0x4b8] sm:$0xff]  ;;  %v2217_v52 = vld [vmem:[#allocation2 + $0x9e0] sm:$0xff] }
 0x487   :  { %v1566_v10 = vsel %vm5489_vm8, %v1564_v12, %v1565_v59  ;;  %v4924_v59 = vpack.c.bf16 %v1591_v43, %v1590_v16  ;;  %v5052_v60 = vpack.c.bf16 %v2228_v41, %v2227_v15  ;;  %v5853_v37 = vcombine.high %v5846_v48, %v5840_v63  ;;  %v1577_v12 = vld [vmem:[#allocation2 + $0x4c0] sm:$0xff]  ;;  %v1596_v23 = vld [vmem:[#allocation2 + $0x558] sm:$0xff]  ;;  %v2235_v16 = vld [vmem:[#allocation2 + $0xa70] sm:$0xff] }
 0x488   :  { %v1649_v40 = vrot.slane %v1635_v30, %v5446_v7  ;;  %v1652_v57 = vcombine.low %v1566_v10, %v1569_v13  ;;  %v5857_v0 = vcombine.high %v5849_v49, %v5843_v42  ;;  %v4926_v3 = vpack.c.bf16 %v1575_v46, %v1574_v9  ;;  %v1595_v10 = vld [vmem:[#allocation2 + $0x550] sm:$0xff]  ;;  %v2236_v43 = vld [vmem:[#allocation2 + $0xa78] sm:$0xff] }
 0x489   :  { %v5054_v6 = vpack.c.bf16 %v2212_v32, %v2211_v51  ;;  %v4928_v30 = vpack.c.bf16 %v1593_v21, %v1592_v53  ;;  %v5056_v31 = vpack.c.bf16 %v2230_v62, %v2229_v54  ;;  %v2231_v13 = vld [vmem:[#allocation2 + $0xa50] sm:$0xff]  ;;  %v4932_v18 = vpack.c.bf16 %v1595_v10, %v1594_v8  ;;  %v2220_v32 = vld [vmem:[#allocation2 + $0x9f8] sm:$0xff]  ;;  %v2238_v21 = vld [vmem:[#allocation2 + $0xa88] sm:$0xff] }
 0x48a   :  { %v1650_v24 = vcombine.low %v1642_v14, %v1649_v40  ;;  %v1651_v25 = vcombine.high %v1642_v14, %v1649_v40  ;;  %v1659_v27 = vrot.slane %v1652_v57, %v5446_v7  ;;  %v2232_v14 = vld [vmem:[#allocation2 + $0xa58] sm:$0xff]  ;;  %v4930_v40 = vpack.c.bf16 %v1577_v12, %v1576_v11  ;;  %v2219_v51 = vld [vmem:[#allocation2 + $0x9f0] sm:$0xff]  ;;  %v1585_v12 = vld [vmem:[#allocation2 + $0x500] sm:$0xff] }
 0x48b   :  { %v5058_v57 = vpack.c.bf16 %v2214_v56, %v2213_v44  ;;  %v5060_v19 = vpack.c.bf16 %v2232_v14, %v2231_v13  ;;  %v5062_v28 = vpack.c.bf16 %v2216_v22, %v2215_v20  ;;  %v4938_v15 = vpack.c.bf16 %v1581_v33, %v1580_v29  ;;  %v1600_v53 = vld [vmem:[#allocation2 + $0x578] sm:$0xff]  ;;  %v1862_v44 = vld [vmem:[#allocation2 + $0x708] sm:$0xff]  ;;  %v1863_v56 = vld [vmem:[#allocation2 + $0x710] sm:$0xff] }
 0x48c   :  { %1729 = vmatprep.mubr.f32.mxu0 %v1651_v25  ;;  %2121 = vmatprep.mubr.f32.mxu1 %v1651_v25  ;;  %v1660_v58 = vcombine.high %v1659_v27, %v1659_v27  ;;  %v2233_v25 = vld [vmem:[#allocation2 + $0xa60] sm:$0xff]  ;;  %v5068_v46 = vpack.c.bf16 %v2236_v43, %v2235_v16  ;;  %v5070_v62 = vpack.c.bf16 %v2220_v32, %v2219_v51  ;;  %v1868_v29 = vld [vmem:[#allocation2 + $0x738] sm:$0xff]  ;;  %v1874_v32 = vld [vmem:[#allocation2 + $0x768] sm:$0xff] }
 0x48d   :  { %1730 = vmatmul.mubr.f32.vlgmr.msra.gmra.mrb[24].mxu0 %v1650_v24  ;;  %2122 = vmatmul.mubr.f32.vlgmr.msra.gmra.mrb[22].mxu1 %v1650_v24  ;;  %v1597_v24 = vld [vmem:[#allocation2 + $0x560] sm:$0xff]  ;;  %v1758_v8 = vcombine.low %v5809_v50, %v5805_v47  ;;  %v1896_v10 = vcombine.low %v5805_v47, %v5813_v55  ;;  %v5873_v50 = vcombine.low %v5846_v48, %v5840_v63 }
 0x48e   :  { %4919 = vmatpush3.bf16.msra.mxu0 %v4918_v17  ;;  %5047 = vmatpush3.bf16.msra.mxu1 %v5046_v26  ;;  %v1579_v17 = vld [vmem:[#allocation2 + $0x4d0] sm:$0xff]  ;;  %v2234_v26 = vld [vmem:[#allocation2 + $0xa68] sm:$0xff]  ;;  %v4936_v36 = vpack.c.bf16 %v1597_v24, %v1596_v23  ;;  %v5877_v55 = vcombine.low %v5849_v49, %v5843_v42  ;;  %v1848_v23 = vld [vmem:[#allocation2 + $0x698] sm:$0xff] }
 0x48f   :  { %1734 = vmatprep.mubr.f32.mxu0 %v1660_v58  ;;  %2126 = vmatprep.mubr.f32.mxu1 %v1660_v58  ;;  %v5064_v38 = vpack.c.bf16 %v2234_v26, %v2233_v25  ;;  %v2218_v58 = vld [vmem:[#allocation2 + $0x9e8] sm:$0xff]  ;;  %v5869_v20 = vrot.slane %v1896_v10, %v5446_v7  ;;  %v1849_v24 = vld [vmem:[#allocation2 + $0x6a0] sm:$0xff]  ;;  %v1993_v10 = vld [vmem:[#allocation2 + $0x790] sm:$0xff] }
 0x490   :  { %4921 = vmatprep.subr.bf16.mxu0 %v4920_v4  ;;  %5049 = vmatprep.subr.bf16.mxu1 %v5048_v39  ;;  %v1598_v4 = vld [vmem:[#allocation2 + $0x568] sm:$0xff]  ;;  %v1599_v39 = vld [vmem:[#allocation2 + $0x570] sm:$0xff]  ;;  %v5066_v41 = vpack.c.bf16 %v2218_v58, %v2217_v52  ;;  %v4954_v42 = vpack.c.bf16 %v1849_v24, %v1848_v23  ;;  %v1869_v33 = vld [vmem:[#allocation2 + $0x740] sm:$0xff] }
 0x491   :  { %1735 = vmatmul.mubr.f32.gmra.mrb[26].mxu0 %v1659_v27  ;;  %2127 = vmatmul.mubr.f32.gmra.mrb[24].mxu1 %v1659_v27  ;;  %v4934_v27 = vpack.c.bf16 %v1579_v17, %v1578_v61  ;;  %v4940_v9 = vpack.c.bf16 %v1599_v39, %v1598_v4  ;;  %v1847_v61 = vld [vmem:[#allocation2 + $0x690] sm:$0xff]  ;;  %v5866_v17 = vrot.slane %v1758_v8, %v5446_v7  ;;  %v1866_v26 = vld [vmem:[#allocation2 + $0x728] sm:$0xff]  ;;  %v1852_v52 = vld [vmem:[#allocation2 + $0x6b8] sm:$0xff] }
 0x492   :  { %4923 = vmatpush3.bf16.msra.mxu0 %v4922_v34  ;;  %5051 = vmatpush3.bf16.msra.mxu1 %v5050_v45  ;;  %v1582_v34 = vld [vmem:[#allocation2 + $0x4e8] sm:$0xff]  ;;  %v1583_v45 = vld [vmem:[#allocation2 + $0x4f0] sm:$0xff]  ;;  %v5888_v63 = vcombine.high %v5869_v20, %v5869_v20  ;;  %v1853_v58 = vld [vmem:[#allocation2 + $0x6c0] sm:$0xff] }
 0x493   :  { %1835 = vmatprep.mubr.f32.mxu0 %v5853_v37  ;;  %2303 = vmatprep.mubr.f32.mxu1 %v5857_v0  ;;  %v4942_v54 = vpack.c.bf16 %v1583_v45, %v1582_v34  ;;  %v5882_v25 = vcombine.high %v5866_v17, %v5866_v17  ;;  %v1850_v49 = vld [vmem:[#allocation2 + $0x6a8] sm:$0xff]  ;;  %v1871_v39 = vld [vmem:[#allocation2 + $0x750] sm:$0xff]  ;;  %v4962_v16 = vpack.c.bf16 %v1853_v58, %v1852_v52  ;;  %v1872_v34 = vld [vmem:[#allocation2 + $0x758] sm:$0xff] }
 0x494   :  { %4925 = vmatprep.subr.bf16.mxu0 %v4924_v59  ;;  %5053 = vmatprep.subr.bf16.mxu1 %v5052_v60  ;;  %v1601_v59 = vld [vmem:[#allocation2 + $0x580] sm:$0xff]  ;;  %v1870_v4 = vld [vmem:[#allocation2 + $0x748] sm:$0xff]  ;;  %v2001_v52 = vld [vmem:[#allocation2 + $0x7d0] sm:$0xff] }
 0x495   :  { %v2237_v60 = vld [vmem:[#allocation2 + $0xa80] sm:$0xff]  ;;  %v4964_v43 = vpack.c.bf16 %v1871_v39, %v1870_v4  ;;  %v2002_v58 = vld [vmem:[#allocation2 + $0x7d8] sm:$0xff]  ;;  %v2020_v39 = vld [vmem:[#allocation2 + $0x868] sm:$0xff] }
 0x496   :  { %4927 = vmatpush3.bf16.msra.mxu0 %v4926_v3  ;;  %5055 = vmatpush3.bf16.msra.mxu1 %v5054_v6  ;;  %v1584_v3 = vld [vmem:[#allocation2 + $0x4f8] sm:$0xff]  ;;  %v4944_v6 = vpack.c.bf16 %v1601_v59, %v1600_v53  ;;  %v5072_v11 = vpack.c.bf16 %v2238_v21, %v2237_v60  ;;  %v1873_v45 = vld [vmem:[#allocation2 + $0x760] sm:$0xff]  ;;  %v1875_v53 = vld [vmem:[#allocation2 + $0x770] sm:$0xff] }
 0x497   :  { %4929 = vmatprep.subr.bf16.mxu0 %v4928_v30  ;;  %5057 = vmatprep.subr.bf16.mxu1 %v5056_v31  ;;  %v2221_v30 = vld [vmem:[#allocation2 + $0xa00] sm:$0xff]  ;;  %v2222_v31 = vld [vmem:[#allocation2 + $0xa08] sm:$0xff]  ;;  %v4946_v13 = vpack.c.bf16 %v1585_v12, %v1584_v3  ;;  %v4972_v60 = vpack.c.bf16 %v1875_v53, %v1874_v32  ;;  %v1860_v12 = vld [vmem:[#allocation2 + $0x6f8] sm:$0xff] }
 0x498   :  { %v5074_v14 = vpack.c.bf16 %v2222_v31, %v2221_v30  ;;  %v1857_v51 = vld [vmem:[#allocation2 + $0x6e0] sm:$0xff]  ;;  %v1858_v21 = vld [vmem:[#allocation2 + $0x6e8] sm:$0xff]  ;;  %v2009_v31 = vld [vmem:[#allocation2 + $0x810] sm:$0xff] }
 0x499   :  { %v1877_v3 = vld [vmem:[#allocation2 + $0x780] sm:$0xff] }
 0x49a   :  { %4931 = vmatpush3.bf16.msra.mxu0 %v4930_v40  ;;  %5059 = vmatpush3.bf16.msra.mxu1 %v5058_v57  ;;  %v4948_v40 = vpack.c.bf16 %v1863_v56, %v1862_v44  ;;  %v1846_v57 = vld [vmem:[#allocation2 + $0x688] sm:$0xff]  ;;  %v1861_v30 = vld [vmem:[#allocation2 + $0x700] sm:$0xff]  ;;  %v2010_v44 = vld [vmem:[#allocation2 + $0x818] sm:$0xff] }
 0x49b   :  { %4933 = vmatprep.subr.bf16.mxu0 %v4932_v18  ;;  %5061 = vmatprep.subr.bf16.mxu1 %v5060_v19  ;;  %v1864_v18 = vld [vmem:[#allocation2 + $0x718] sm:$0xff]  ;;  %v1865_v19 = vld [vmem:[#allocation2 + $0x720] sm:$0xff]  ;;  %v4950_v47 = vpack.c.bf16 %v1847_v61, %v1846_v57  ;;  %v4978_v56 = vpack.c.bf16 %v1861_v30, %v1860_v12  ;;  %v5012_v8 = vpack.c.bf16 %v2010_v44, %v2009_v31 }
 0x49c   :  { %v4952_v22 = vpack.c.bf16 %v1865_v19, %v1864_v18  ;;  %v1995_v18 = vld [vmem:[#allocation2 + $0x7a0] sm:$0xff]  ;;  %v1996_v19 = vld [vmem:[#allocation2 + $0x7a8] sm:$0xff]  ;;  %v2341_v30 = vld [vmem:[#allocation2 + $0xab8] sm:$0xff] }
 0x49d   :  { %v5018_v23 = vpack.c.bf16 %v1996_v19, %v1995_v18  ;;  %v2019_v4 = vld [vmem:[#allocation2 + $0x860] sm:$0xff] }
 0x49e   :  { %4935 = vmatpush3.bf16.msra.mxu0 %v4934_v27  ;;  %5063 = vmatpush3.bf16.msra.mxu1 %v5062_v28  ;;  %v1867_v27 = vld [vmem:[#allocation2 + $0x730] sm:$0xff]  ;;  %v2342_v31 = vld [vmem:[#allocation2 + $0xac0] sm:$0xff] }
 0x49f   :  { %4937 = vmatprep.subr.bf16.mxu0 %v4936_v36  ;;  %5065 = vmatprep.subr.bf16.mxu1 %v5064_v38  ;;  %v4956_v48 = vpack.c.bf16 %v1867_v27, %v1866_v26  ;;  %v1851_v28 = vld [vmem:[#allocation2 + $0x6b0] sm:$0xff]  ;;  %v4960_v38 = vpack.c.bf16 %v1869_v33, %v1868_v29  ;;  %v1998_v27 = vld [vmem:[#allocation2 + $0x7b8] sm:$0xff]  ;;  %v1999_v29 = vld [vmem:[#allocation2 + $0x7c0] sm:$0xff]  ;;  %v5084_v44 = vpack.c.bf16 %v2342_v31, %v2341_v30 }
 0x4a0   :  { %v4958_v36 = vpack.c.bf16 %v1851_v28, %v1850_v49  ;;  %v1997_v26 = vld [vmem:[#allocation2 + $0x7b0] sm:$0xff] }
 0x4a1   :  { %v5022_v49 = vpack.c.bf16 %v1998_v27, %v1997_v26  ;;  %v2017_v33 = vld [vmem:[#allocation2 + $0x850] sm:$0xff]  ;;  %v2351_v27 = vld [vmem:[#allocation2 + $0xb08] sm:$0xff] }
 0x4a2   :  { %4939 = vmatpush3.bf16.msra.mxu0 %v4938_v15  ;;  %5067 = vmatpush3.bf16.msra.mxu1 %v5066_v41  ;;  %v1854_v15 = vld [vmem:[#allocation2 + $0x6c8] sm:$0xff]  ;;  %v1855_v41 = vld [vmem:[#allocation2 + $0x6d0] sm:$0xff] }
 0x4a3   :  { %4941 = vmatprep.subr.bf16.mxu0 %v4940_v9  ;;  %5069 = vmatprep.subr.bf16.mxu1 %v5068_v46  ;;  %v4968_v9 = vpack.c.bf16 %v1873_v45, %v1872_v34  ;;  %v1856_v46 = vld [vmem:[#allocation2 + $0x6d8] sm:$0xff] }
 0x4a4   :  { %v4970_v59 = vpack.c.bf16 %v1857_v51, %v1856_v46  ;;  %v2023_v46 = vld [vmem:[#allocation2 + $0x880] sm:$0xff]  ;;  %v2024_v51 = vld [vmem:[#allocation2 + $0x888] sm:$0xff] }
 0x4a5   :  { %v5040_v53 = vpack.c.bf16 %v2024_v51, %v2023_v46 }
 0x4a6   :  { %4943 = vmatpush3.bf16.msra.mxu0 %v4942_v54  ;;  %5071 = vmatpush3.bf16.msra.mxu1 %v5070_v62  ;;  %v1859_v54 = vld [vmem:[#allocation2 + $0x6f0] sm:$0xff]  ;;  %v1876_v62 = vld [vmem:[#allocation2 + $0x778] sm:$0xff] }
 0x4a7   :  { %4945 = vmatprep.subr.bf16.mxu0 %v4944_v6  ;;  %5073 = vmatprep.subr.bf16.mxu1 %v5072_v11  ;;  %v4974_v6 = vpack.c.bf16 %v1859_v54, %v1858_v21  ;;  %v4976_v11 = vpack.c.bf16 %v1877_v3, %v1876_v62  ;;  %v2337_v54 = vld [vmem:[#allocation2 + $0xa98] sm:$0xff]  ;;  %v2338_v62 = vld [vmem:[#allocation2 + $0xaa0] sm:$0xff] }
 0x4a8   :  { %v5076_v3 = vpack.c.bf16 %v2338_v62, %v2337_v54 }
 0x4aa   :  { %4947 = vmatpush3.bf16.msra.mxu0 %v4946_v13  ;;  %5075 = vmatpush3.bf16.msra.mxu1 %v5074_v14  ;;  %v1994_v13 = vld [vmem:[#allocation2 + $0x798] sm:$0xff]  ;;  %v2011_v14 = vld [vmem:[#allocation2 + $0x820] sm:$0xff] }
 0x4ab   :  { %4949 = vmatprep.subr.bf16.mxu0 %v4948_v40  ;;  %5108 = vmatprep.subr.bf16.mxu1 %v5405_v1  ;;  %v2012_v40 = vld [vmem:[#allocation2 + $0x828] sm:$0xff]  ;;  %v5014_v57 = vpack.c.bf16 %v1994_v13, %v1993_v10 }
 0x4ac   :  { %v5016_v61 = vpack.c.bf16 %v2012_v40, %v2011_v14  ;;  %v2347_v13 = vld [vmem:[#allocation2 + $0xae8] sm:$0xff]  ;;  %v2348_v14 = vld [vmem:[#allocation2 + $0xaf0] sm:$0xff] }
 0x4ad   :  { %1836 = vmatmul.mubr.f32.vlgmr.msra.gmra.mrb[28].mxu0 %v5873_v50  ;;  %2304 = vmatmul.mubr.f32.vlgmr.msra.gmra.mrb[26].mxu1 %v5877_v55  ;;  %v5096_v40 = vpack.c.bf16 %v2348_v14, %v2347_v13 }
 0x4ae   :  { %1840 = vmatprep.mubr.f32.mxu0 %v5882_v25  ;;  %4951 = vmatpush3.bf16.msra.mxu0 %v4950_v47  ;;  %v2013_v47 = vld [vmem:[#allocation2 + $0x830] sm:$0xff] }
 0x4af   :  { %2308 = vmatprep.mubr.f32.mxu1 %v5888_v63  ;;  %4953 = vmatprep.subr.bf16.mxu0 %v4952_v22  ;;  %v2014_v22 = vld [vmem:[#allocation2 + $0x838] sm:$0xff] }
 0x4b0   :  { %v5020_v24 = vpack.c.bf16 %v2014_v22, %v2013_v47 }
 0x4b1   :  { %1841 = vmatmul.mubr.f32.gmra.mrb[30].mxu0 %v5866_v17  ;;  %2309 = vmatmul.mubr.f32.gmra.mrb[28].mxu1 %v5869_v20 }
 0x4b2   :  { %4955 = vmatpush3.bf16.msra.mxu0 %v4954_v42  ;;  %1973 = vmatprep.mubr.f32.mxu0 %v5857_v0  ;;  %v4966_v0 = vpack.c.bf16 %v1855_v41, %v1854_v15  ;;  %v2015_v42 = vld [vmem:[#allocation2 + $0x840] sm:$0xff]  ;;  %v2021_v15 = vld [vmem:[#allocation2 + $0x870] sm:$0xff]  ;;  %v2022_v41 = vld [vmem:[#allocation2 + $0x878] sm:$0xff] }
 0x4b3   :  { %4957 = vmatprep.subr.bf16.mxu0 %v4956_v48  ;;  %4465 = vmatprep.mubr.msk.f32.mxu1 %vm5406_vm0, %v5407_v2  ;;  %v2016_v48 = vld [vmem:[#allocation2 + $0x848] sm:$0xff]  ;;  %v5036_v45 = vpack.c.bf16 %v2022_v41, %v2021_v15 }
 0x4b4   :  { %v5024_v28 = vpack.c.bf16 %v2016_v48, %v2015_v42  ;;  %v2352_v42 = vld [vmem:[#allocation2 + $0xb10] sm:$0xff] }
 0x4b6   :  { %4959 = vmatpush3.bf16.msra.mxu0 %v4958_v36 }
 0x4b7   :  { %4961 = vmatprep.subr.bf16.mxu0 %v4960_v38 }
 0x4ba   :  { %4963 = vmatpush3.bf16.msra.mxu0 %v4962_v16  ;;  %v5032_v16 = vpack.c.bf16 %v2020_v39, %v2019_v4  ;;  %v2497_v4 = vld [vmem:[#allocation2 + $0xbb8] sm:$0xff] }
 0x4bb   :  { %4965 = vmatprep.subr.bf16.mxu0 %v4964_v43  ;;  %v2004_v43 = vld [vmem:[#allocation2 + $0x7e8] sm:$0xff] }
 0x4be   :  { %4967 = vmatpush3.bf16.msra.mxu0 %v4966_v0  ;;  %v2005_v0 = vld [vmem:[#allocation2 + $0x7f0] sm:$0xff] }
 0x4bf   :  { %4969 = vmatprep.subr.bf16.mxu0 %v4968_v9  ;;  %v2006_v9 = vld [vmem:[#allocation2 + $0x7f8] sm:$0xff] }
 0x4c0   :  { %v5038_v32 = vpack.c.bf16 %v2006_v9, %v2005_v0 }
 0x4c2   :  { %4971 = vmatpush3.bf16.msra.mxu0 %v4970_v59  ;;  %v2007_v59 = vld [vmem:[#allocation2 + $0x800] sm:$0xff] }
 0x4c3   :  { %4973 = vmatprep.subr.bf16.mxu0 %v4972_v60  ;;  %v2008_v60 = vld [vmem:[#allocation2 + $0x808] sm:$0xff] }
 0x4c4   :  { %v5042_v21 = vpack.c.bf16 %v2008_v60, %v2007_v59 }
 0x4c6   :  { %4975 = vmatpush3.bf16.msra.mxu0 %v4974_v6  ;;  %v2339_v6 = vld [vmem:[#allocation2 + $0xaa8] sm:$0xff] }
 0x4c7   :  { %4977 = vmatprep.subr.bf16.mxu0 %v4976_v11  ;;  %v2340_v11 = vld [vmem:[#allocation2 + $0xab0] sm:$0xff] }
 0x4c8   :  { %v5080_v12 = vpack.c.bf16 %v2340_v11, %v2339_v6 }
 0x4ca   :  { %4979 = vmatpush3.bf16.msra.mxu0 %v4978_v56  ;;  %v2344_v56 = vld [vmem:[#allocation2 + $0xad0] sm:$0xff] }
 0x4cb   :  { %5013 = vmatprep.subr.bf16.mxu0 %v5012_v8  ;;  %v2346_v8 = vld [vmem:[#allocation2 + $0xae0] sm:$0xff] }
 0x4cd   :  { %1974 = vmatmul.mubr.f32.vlgmr.msra.gmra.mrb[32].mxu0 %v5877_v55  ;;  %v2000_v55 = vld [vmem:[#allocation2 + $0x7c8] sm:$0xff] }
 0x4ce   :  { %1978 = vmatprep.mubr.f32.mxu0 %v5888_v63  ;;  %5015 = vmatpush3.bf16.msra.mxu0 %v5014_v57  ;;  %v2018_v63 = vld [vmem:[#allocation2 + $0x858] sm:$0xff]  ;;  %v5026_v36 = vpack.c.bf16 %v2000_v55, %v1999_v29  ;;  %v5104_v55 = vpack.c.bf16 %v2352_v42, %v2351_v27 }
 0x4cf   :  { %5017 = vmatprep.subr.bf16.mxu0 %v5016_v61  ;;  %v5028_v38 = vpack.c.bf16 %v2018_v63, %v2017_v33  ;;  %v2349_v57 = vld [vmem:[#allocation2 + $0xaf8] sm:$0xff]  ;;  %v2350_v61 = vld [vmem:[#allocation2 + $0xb00] sm:$0xff] }
 0x4d1   :  { %1979 = vmatmul.mubr.f32.gmra.mrb[34].mxu0 %v5869_v20  ;;  %v5030_v20 = vpack.c.bf16 %v2002_v58, %v2001_v52  ;;  %v2496_v58 = vld [vmem:[#allocation2 + $0xbb0] sm:$0xff] }
 0x4d2   :  { %5019 = vmatpush3.bf16.msra.mxu0 %v5018_v23  ;;  %2196 = vmatprep.mubr.f32.mxu0 %v5853_v37  ;;  %v2003_v37 = vld [vmem:[#allocation2 + $0x7e0] sm:$0xff]  ;;  %v5100_v23 = vpack.c.bf16 %v2350_v61, %v2349_v57  ;;  %v5112_v39 = vpack.c.bf16 %v2497_v4, %v2496_v58 }
 0x4d3   :  { %5021 = vmatprep.subr.bf16.mxu0 %v5020_v24  ;;  %v5034_v34 = vpack.c.bf16 %v2004_v43, %v2003_v37  ;;  %v2482_v4 = vld [vmem:[#allocation2 + $0xb40] sm:$0xff] }
 0x4d6   :  { %5023 = vmatpush3.bf16.msra.mxu0 %v5022_v49 }
 0x4d7   :  { %5025 = vmatprep.subr.bf16.mxu0 %v5024_v28 }
 0x4da   :  { %5027 = vmatpush3.bf16.msra.mxu0 %v5026_v36  ;;  %v2494_v36 = vld [vmem:[#allocation2 + $0xba0] sm:$0xff] }
 0x4db   :  { %5029 = vmatprep.subr.bf16.mxu0 %v5028_v38  ;;  %v2495_v38 = vld [vmem:[#allocation2 + $0xba8] sm:$0xff] }
 0x4dc   :  { %v5109_v52 = vpack.c.bf16 %v2495_v38, %v2494_v36  ;;  %v2480_v38 = vld [vmem:[#allocation2 + $0xb30] sm:$0xff] }
 0x4de   :  { %5031 = vmatpush3.bf16.msra.mxu0 %v5030_v20  ;;  %5110 = vmatpush3.bf16.msra.mxu1 %v5109_v52  ;;  %v2498_v20 = vld [vmem:[#allocation2 + $0xbc0] sm:$0xff]  ;;  %v2481_v52 = vld [vmem:[#allocation2 + $0xb38] sm:$0xff] }
 0x4df   :  { %5033 = vmatprep.subr.bf16.mxu0 %v5032_v16  ;;  %5111 = vmatprep.subr.bf16.mxu1 %v5405_v1  ;;  %v2499_v16 = vld [vmem:[#allocation2 + $0xbc8] sm:$0xff]  ;;  %v5136_v58 = vpack.c.bf16 %v2481_v52, %v2480_v38 }
 0x4e0   :  { %v5115_v37 = vpack.c.bf16 %v2499_v16, %v2498_v20  ;;  %v2484_v16 = vld [vmem:[#allocation2 + $0xb50] sm:$0xff] }
 0x4e2   :  { %5035 = vmatpush3.bf16.msra.mxu0 %v5034_v34  ;;  %5113 = vmatpush3.bf16.msra.mxu1 %v5112_v39  ;;  %v2483_v39 = vld [vmem:[#allocation2 + $0xb48] sm:$0xff] }
 0x4e3   :  { %5037 = vmatprep.subr.bf16.mxu0 %v5036_v45  ;;  %5114 = vmatprep.subr.bf16.mxu1 %v5405_v1  ;;  %v5139_v20 = vpack.c.bf16 %v2483_v39, %v2482_v4 }
 0x4e6   :  { %5039 = vmatpush3.bf16.msra.mxu0 %v5038_v32  ;;  %5116 = vmatpush3.bf16.msra.mxu1 %v5115_v37  ;;  %v2485_v37 = vld [vmem:[#allocation2 + $0xb58] sm:$0xff] }
 0x4e7   :  { %5041 = vmatprep.subr.bf16.mxu0 %v5040_v53  ;;  %5117 = vmatprep.subr.bf16.mxu1 %v5405_v1 }
 0x4ea   :  { %5043 = vmatpush3.bf16.msra.mxu0 %v5042_v21 }
 0x4eb   :  { %5077 = vmatprep.subr.bf16.mxu0 %v5076_v3 }
 0x4ed   :  { %2197 = vmatmul.mubr.f32.vlgmr.msra.gmra.mrb[36].mxu0 %v5873_v50  ;;  %v2343_v50 = vld [vmem:[#allocation2 + $0xac8] sm:$0xff] }
 0x4ee   :  { %2201 = vmatprep.mubr.f32.mxu0 %v5882_v25  ;;  %5079 = vmatpush3.bf16.msra.mxu0 %v5076_v3  ;;  %v5088_v25 = vpack.c.bf16 %v2344_v56, %v2343_v50 }
 0x4ef   :  { %5081 = vmatprep.subr.bf16.mxu0 %v5080_v12 }
 0x4f1   :  { %2202 = vmatmul.mubr.f32.gmra.mrb[38].mxu0 %v5866_v17  ;;  %v2345_v17 = vld [vmem:[#allocation2 + $0xad8] sm:$0xff] }
 0x4f2   :  { %5083 = vmatpush3.bf16.msra.mxu0 %v5080_v12  ;;  %v5092_v10 = vpack.c.bf16 %v2346_v8, %v2345_v17  ;;  %v3780_v8 = vld [vmem:[#allocation2 + $0xa90] ss:$0 sm:$0xff] }
 0x4f3   :  { %5085 = vmatprep.subr.bf16.mxu0 %v5084_v44 }
 0x4f6   :  { %5087 = vmatpush3.bf16.msra.mxu0 %v5084_v44 }
 0x4f7   :  { %5089 = vmatprep.subr.bf16.mxu0 %v5088_v25 }
 0x4fa   :  { %5091 = vmatpush3.bf16.msra.mxu0 %v5088_v25 }
 0x4fb   :  { %5093 = vmatprep.subr.bf16.mxu0 %v5092_v10 }
 0x4fe   :  { %5095 = vmatpush3.bf16.msra.mxu0 %v5092_v10 }
 0x4ff   :  { %5097 = vmatprep.subr.bf16.mxu0 %v5096_v40 }
 0x502   :  { %5099 = vmatpush3.bf16.msra.mxu0 %v5096_v40 }
 0x503   :  { %5101 = vmatprep.subr.bf16.mxu0 %v5100_v23 }
 0x506   :  { %5103 = vmatpush3.bf16.msra.mxu0 %v5100_v23 }
 0x507   :  { %5105 = vmatprep.subr.bf16.mxu0 %v5104_v55 }
 0x50a   :  { %5107 = vmatpush3.bf16.msra.mxu0 %v5104_v55 }
 0x50b   :  { %5132 = vmatprep.subr.bf16.mxu0 %v5405_v1 }
 0x560   :  { %v3900_v18 = vpop.f32.mrb[24].mxu0  ;;  %v4014_v19 = vpop.f32.mrb[22].mxu1 }
 0x561   :  { %v3901_v47 = vpop.f32.mrb[25].mxu0  ;;  %v4015_v22 = vpop.f32.mrb[23].mxu1 }
 0x562   :  { %v3902_v24 = vadd.f32 %v3901_v47, %v3900_v18  ;;  %v4016_v26 = vadd.f32 %v4015_v22, %v4014_v19 }
 0x564   :  { %v3903_v48 = vpop.f32.mrb[26].mxu0  ;;  %v4017_v49 = vpop.f32.mrb[24].mxu1 }
 0x565   :  { %v3904_v28 = vpop.f32.mrb[27].mxu0  ;;  %v4018_v29 = vpop.f32.mrb[25].mxu1 }
 0x566   :  { %v3905_v33 = vadd.f32 %v3904_v28, %v3903_v48  ;;  %v4019_v63 = vadd.f32 %v4018_v29, %v4017_v49  ;;  %v2478_v28 = vld [vmem:[#allocation2 + $0xb20] sm:$0xff]  ;;  %v2479_v29 = vld [vmem:[#allocation2 + $0xb28] sm:$0xff] }
 0x580   :  { %v3938_v43 = vpop.f32.mrb[28].mxu0  ;;  %v4090_v15 = vpop.f32.mrb[26].mxu1 }
 0x581   :  { %v3939_v41 = vpop.f32.mrb[29].mxu0  ;;  %v4091_v34 = vpop.f32.mrb[27].mxu1 }
 0x582   :  { %v3940_v45 = vadd.f32 %v3939_v41, %v3938_v43  ;;  %v4092_v0 = vadd.f32 %v4091_v34, %v4090_v15  ;;  %v5142_v43 = vpack.c.bf16 %v2485_v37, %v2484_v16  ;;  %v2500_v15 = vld [vmem:[#allocation2 + $0xbd0] sm:$0xff]  ;;  %v2501_v41 = vld [vmem:[#allocation2 + $0xbd8] sm:$0xff] }
 0x583   :  { %v5118_v34 = vpack.c.bf16 %v2501_v41, %v2500_v15 }
 0x584   :  { %v1838_v9 = vadd.f32 %v3940_v45, %v3902_v24  ;;  %v3941_v46 = vpop.f32.mrb[30].mxu0  ;;  %v4093_v51 = vpop.f32.mrb[28].mxu1  ;;  %v2486_v45 = vld [vmem:[#allocation2 + $0xb60] sm:$0xff] }
 0x585   :  { %v3942_v32 = vpop.f32.mrb[31].mxu0  ;;  %v4094_v53 = vpop.f32.mrb[29].mxu1  ;;  %5119 = vmatpush3.bf16.msra.mxu1 %v5118_v34 }
 0x586   :  { %v3943_v59 = vadd.f32 %v3942_v32, %v3941_v46  ;;  %v4095_v60 = vadd.f32 %v4094_v53, %v4093_v51  ;;  %5120 = vmatprep.subr.bf16.mxu1 %v5405_v1  ;;  %v2502_v46 = vld [vmem:[#allocation2 + $0xbe0] sm:$0xff]  ;;  %v2503_v51 = vld [vmem:[#allocation2 + $0xbe8] sm:$0xff]  ;;  %v2488_v53 = vld [vmem:[#allocation2 + $0xb70] sm:$0xff] }
 0x587   :  { %v5121_v32 = vpack.c.bf16 %v2503_v51, %v2502_v46  ;;  %v2686_v46 = vld [vmem:[#allocation2 + $0xc20] sm:$0xff]  ;;  %v2687_v51 = vld [vmem:[#allocation2 + $0xc28] sm:$0xff] }
 0x588   :  { %v1843_v21 = vadd.f32 %v3943_v59, %v3905_v33  ;;  %v2489_v59 = vld [vmem:[#allocation2 + $0xb78] sm:$0xff] }
 0x589   :  { %5122 = vmatpush3.bf16.msra.mxu1 %v5121_v32 }
 0x58a   :  { %5123 = vmatprep.subr.bf16.mxu1 %v5405_v1 }
 0x5a0   :  { %v3976_v54 = vpop.f32.mrb[32].mxu0 }
 0x5a1   :  { %v3977_v62 = vpop.f32.mrb[33].mxu0 }
 0x5a2   :  { %v3978_v3 = vadd.f32 %v3977_v62, %v3976_v54  ;;  %v2505_v54 = vld [vmem:[#allocation2 + $0xbf8] sm:$0xff] }
 0x5a4   :  { %v1984_v6 = vadd.f32 %v3978_v3, %v1838_v9  ;;  %v3979_v11 = vpop.f32.mrb[34].mxu0  ;;  %v2490_v3 = vld [vmem:[#allocation2 + $0xb80] sm:$0xff] }
 0x5a5   :  { %v3980_v12 = vpop.f32.mrb[35].mxu0 }
 0x5a6   :  { %v3981_v30 = vadd.f32 %v3980_v12, %v3979_v11  ;;  %v2506_v12 = vld [vmem:[#allocation2 + $0xc00] sm:$0xff] }
 0x5a8   :  { %v1985_v31 = vadd.f32 %v3981_v30, %v1843_v21  ;;  %v2504_v21 = vld [vmem:[#allocation2 + $0xbf0] sm:$0xff]  ;;  %v2507_v30 = vld [vmem:[#allocation2 + $0xc08] sm:$0xff] }
 0x5a9   :  { %v5124_v62 = vpack.c.bf16 %v2505_v54, %v2504_v21  ;;  %v5157_v21 = vpack.c.bf16 %v2687_v51, %v2686_v46  ;;  %v2831_v51 = vld [vmem:[#allocation2 + $0xce0] sm:$0xff] }
 0x5ab   :  { %5125 = vmatpush3.bf16.msra.mxu1 %v5124_v62  ;;  %v2688_v62 = vld [vmem:[#allocation2 + $0xc30] sm:$0xff] }
 0x5ac   :  { %5126 = vmatprep.subr.bf16.mxu1 %v5405_v1 }
 0x5c0   :  { %v4052_v44 = vpop.f32.mrb[36].mxu0 }
 0x5c1   :  { %v4053_v50 = vpop.f32.mrb[37].mxu0 }
 0x5c2   :  { %v4054_v56 = vadd.f32 %v4053_v50, %v4052_v44  ;;  %v5127_v44 = vpack.c.bf16 %v2507_v30, %v2506_v12  ;;  %v2493_v50 = vld [vmem:[#allocation2 + $0xb98] sm:$0xff]  ;;  %v2692_v12 = vld [vmem:[#allocation2 + $0xc50] sm:$0xff] }
 0x5c3   :  { %v2693_v30 = vld [vmem:[#allocation2 + $0xc58] sm:$0xff] }
 0x5c4   :  { %v2199_v25 = vadd.f32 %v4054_v56, %v4016_v26  ;;  %v4055_v17 = vpop.f32.mrb[38].mxu0  ;;  %v3779_v26 = vld [vmem:[#allocation2 + $0x788] ss:$0 sm:$0xff]  ;;  %v2508_v56 = vld [vmem:[#allocation2 + $0xc10] sm:$0xff]  ;;  %5128 = vmatpush3.bf16.msra.mxu1 %v5127_v44  ;;  %v2694_v44 = vld [vmem:[#allocation2 + $0xc60] sm:$0xff] }
 0x5c5   :  { %v4056_v10 = vpop.f32.mrb[39].mxu0  ;;  %v1991_v42 = vadd.f32 %v3779_v26, %v1984_v6  ;;  %v1992_v55 = vadd.f32 %v3779_v26, %v1985_v31  ;;  %v2491_v6 = vld [vmem:[#allocation2 + $0xb88] sm:$0xff]  ;;  %v2492_v31 = vld [vmem:[#allocation2 + $0xb90] sm:$0xff]  ;;  %5129 = vmatprep.subr.bf16.mxu1 %v5405_v1 }
 0x5c6   :  { %v2314_v13 = vadd.f32 %v4092_v0, %v2199_v25  ;;  %v4057_v14 = vadd.f32 %v4056_v10, %v4055_v17  ;;  %v2487_v0 = vld [vmem:[#allocation2 + $0xb68] sm:$0xff]  ;;  %v5151_v11 = vpack.c.bf16 %v2491_v6, %v2490_v3  ;;  %v2509_v25 = vld [vmem:[#allocation2 + $0xc18] sm:$0xff]  ;;  %v5154_v17 = vpack.c.bf16 %v2493_v50, %v2492_v31  ;;  %v2690_v6 = vld [vmem:[#allocation2 + $0xc40] sm:$0xff] }
 0x5c7   :  { %v5145_v9 = vpack.c.bf16 %v2487_v0, %v2486_v45  ;;  %v3783_v10 = vld [vmem:[#allocation2 + $0xb18] ss:$0 sm:$0xff]  ;;  %v5166_v31 = vpack.c.bf16 %v2693_v30, %v2692_v12  ;;  %v2695_v50 = vld [vmem:[#allocation2 + $0xc68] sm:$0xff]  ;;  %v3788_v30 = vld [vmem:[#allocation2 + $0xcb0] ss:$0 sm:$0xff] }
 0x5c8   :  { %v2321_v40 = vadd.f32 %v3780_v8, %v2314_v13  ;;  %v2204_v57 = vadd.f32 %v4057_v14, %v4019_v63  ;;  %v5133_v63 = vpack.c.bf16 %v2479_v29, %v2478_v28  ;;  %v2689_v3 = vld [vmem:[#allocation2 + $0xc38] sm:$0xff] }
 0x5c9   :  { %v5160_v35 = vpack.c.bf16 %v2689_v3, %v2688_v62 }
 0x5ca   :  { %v3781_v61 = vmul.f32 -1.442695, %v2321_v40  ;;  %v2315_v18 = vadd.f32 %v4095_v60, %v2204_v57  ;;  %v5148_v60 = vpack.c.bf16 %v2489_v59, %v2488_v53 }
 0x5cc   :  { %5334 = vpow2.f32 %v3781_v61  ;;  %v2322_v19 = vadd.f32 %v3780_v8, %v2315_v18  ;;  %v5130_v8 = vpack.c.bf16 %v2509_v25, %v2508_v56  ;;  %v5169_v56 = vpack.c.bf16 %v2695_v50, %v2694_v44  ;;  %v2696_v25 = vld [vmem:[#allocation2 + $0xc70] sm:$0xff]  ;;  %v3005_v44 = vld [vmem:[#allocation2 + $0xd38] sm:$0xff] }
 0x5ce   :  { %v3782_v47 = vmul.f32 -1.442695, %v2322_v19  ;;  %5131 = vmatpush3.bf16.msra.mxu1 %v5130_v8 }
 0x5cf   :  { %5156 = vmatprep.subr.bf16.mxu1 %v5405_v1 }
 0x5d0   :  { %5336 = vpow2.f32 %v3782_v47 }
 0x5d6   :  { %v5335_v22 = vpop.eup %5334 }
 0x5d7   :  { %v2329_v23 = vadd.f32 1.0, %v5335_v22 }
 0x5d9   :  { %5338 = vrcp.f32 %v2329_v23 }
 0x5da   :  { %v5337_v24 = vpop.eup %5336 }
 0x5db   :  { %v2330_v27 = vadd.f32 1.0, %v5337_v24 }
 0x5dd   :  { %5340 = vrcp.f32 %v2330_v27 }
 0x5e3   :  { %v5339_v48 = vpop.eup %5338 }
 0x5e4   :  { %v5908_v49 = vmul.f32 %v5339_v48, %v1991_v42 }
 0x5e6   :  { %4430 = vmatprep.mubr.f32.mxu0 %v5908_v49 }
 0x5e7   :  { %v5341_v33 = vpop.eup %5340 }
 0x5e8   :  { %v5911_v36 = vmul.f32 %v5341_v33, %v1992_v55 }
 0x5ea   :  { %4431 = vmatmul.mubr.f32.vlgmr.msra.gmra.mrb[40].mxu0 %v5911_v36 }
 0x5eb   :  { %5134 = vmatpush3.bf16.msra.mxu0 %v5133_v63  ;;  %4500 = vmatprep.mubr.msk.f32.mxu0 %vm5406_vm0, %v5407_v2 }
 0x5ec   :  { %5135 = vmatprep.subr.bf16.mxu0 %v5405_v1 }
 0x5ef   :  { %5137 = vmatpush3.bf16.msra.mxu0 %v5136_v58 }
 0x5f0   :  { %5138 = vmatprep.subr.bf16.mxu0 %v5405_v1 }
 0x5f3   :  { %5140 = vmatpush3.bf16.msra.mxu0 %v5139_v20 }
 0x5f4   :  { %5141 = vmatprep.subr.bf16.mxu0 %v5405_v1 }
 0x5f7   :  { %5143 = vmatpush3.bf16.msra.mxu0 %v5142_v43 }
 0x5f8   :  { %5144 = vmatprep.subr.bf16.mxu0 %v5405_v1 }
 0x5fb   :  { %5146 = vmatpush3.bf16.msra.mxu0 %v5145_v9 }
 0x5fc   :  { %5147 = vmatprep.subr.bf16.mxu0 %v5405_v1 }
 0x5ff   :  { %5149 = vmatpush3.bf16.msra.mxu0 %v5148_v60 }
 0x600   :  { %5150 = vmatprep.subr.bf16.mxu0 %v5405_v1 }
 0x603   :  { %5152 = vmatpush3.bf16.msra.mxu0 %v5151_v11  ;;  %v2691_v11 = vld [vmem:[#allocation2 + $0xc48] sm:$0xff] }
 0x604   :  { %5153 = vmatprep.subr.bf16.mxu0 %v5405_v1 }
 0x607   :  { %5155 = vmatpush3.bf16.msra.mxu0 %v5154_v17  ;;  %v2697_v17 = vld [vmem:[#allocation2 + $0xc78] sm:$0xff] }
 0x608   :  { %5180 = vmatprep.subr.bf16.mxu0 %v5405_v1  ;;  %v5172_v8 = vpack.c.bf16 %v2697_v17, %v2696_v25  ;;  %v2926_v25 = vsub.s32 0, %v5443_v5  ;;  %v3006_v17 = vld [vmem:[#allocation2 + $0xd40] sm:$0xff] }
 0x6bd   :  { %v4432_v13 = vpop.f32.mrb[40].mxu0 }
 0x6be   :  { %v2430_v14 = vadd.f32 %v4432_v13, %v3783_v10  ;;  %v2424_v40 = vpop.f32.mrb[41].mxu0  ;;  %v2699_v13 = vld [vmem:[#allocation2 + $0xc88] sm:$0xff] }
 0x6bf   :  { %v2425_v57 = vadd.f32 %v3783_v10, %v2424_v40  ;;  %v2698_v10 = vld [vmem:[#allocation2 + $0xc80] sm:$0xff]  ;;  %v2700_v40 = vld [vmem:[#allocation2 + $0xc90] sm:$0xff] }
 0x6c0   :  { %v2434_v61 = vadd.f32 %v2430_v14, %v5911_v36  ;;  %v5175_v14 = vpack.c.bf16 %v2699_v13, %v2698_v10  ;;  %v3096_v10 = vld [vmem:[#allocation2 + $0xd80] sm:$0xff] }
 0x6c1   :  { %v2433_v18 = vadd.f32 %v2425_v57, %v5908_v49  ;;  %v2701_v57 = vld [vmem:[#allocation2 + $0xc98] sm:$0xff] }
 0x6c2   :  { %v2436_v19 = vmax.f32 %v2434_v61, 0.0  ;;  %v5178_v61 = vpack.c.bf16 %v2701_v57, %v2700_v40 }
 0x6c3   :  { %v2435_v47 = vmax.f32 %v2433_v18, 0.0 }
 0x6c4   :  { %v2462_v22 = vrot.slane %v2436_v19, %v5446_v7 }
 0x6c5   :  { %v2439_v23 = vcombine.high %v2435_v47, %v2435_v47  ;;  %v2446_v24 = vrot.slane %v2435_v47, %v5446_v7 }
 0x6c6   :  { %v2463_v27 = vcombine.high %v2462_v22, %v2462_v22  ;;  %v2473_v26 = vrot.slane %v2462_v22, 7 }
 0x6c7   :  { %v2453_v42 = vrot.slane %v2439_v23, %v5446_v7  ;;  %v2454_v48 = vcombine.high %v2446_v24, %v2446_v24  ;;  %v3784_v38 = vrot.slane %v2446_v24, 9 }
 0x6c8   :  { %v2475_v28 = vrot.slane %v2473_v26, 2  ;;  %v2476_v29 = vrot.slane %v2463_v27, 7  ;;  %v2703_v55 = vcombine.low %v2462_v22, %v2463_v27  ;;  %v3786_v27 = vld [vmem:[#allocation2 + $0xca0] ss:$0 sm:$0xff] }
 0x6c9   :  { %v2455_v33 = vcombine.high %v2453_v42, %v2453_v42  ;;  %v2466_v63 = vrot.slane %v2454_v48, 7  ;;  %v2598_v36 = vcombine.low %v2446_v24, %v2454_v48  ;;  %v2702_v49 = vcombine.low %v2454_v48, %v2453_v42 }
 0x6ca   :  { %v5935_v52 = vrot.slane %v2703_v55, %v5446_v7  ;;  %v2469_v4 = vrot.slane %v2453_v42, 7  ;;  %v2477_v37 = vsel %vm5489_vm8, %v2475_v28, %v2476_v29 }
 0x6cb   :  { %v2468_v58 = vrot.slane %v2466_v63, 2  ;;  %v3785_v39 = vrot.slane %v2455_v33, 9  ;;  %v2599_v20 = vcombine.low %v2455_v33, %v2462_v22  ;;  %v2467_v16 = vsel %vm5489_vm8, %v3784_v38, %v2466_v63 }
 0x6cc   :  { %v2710_v43 = vrot.slane %v2702_v49, %v5446_v7  ;;  %v2606_v41 = vrot.slane %v2598_v36, %v5446_v7  ;;  %v2834_v49 = vld [vmem:[#allocation2 + $0xcf8] sm:$0xff] }
 0x6cd   :  { %v2470_v15 = vsel %vm5489_vm8, %v2468_v58, %v2469_v4  ;;  %v2613_v34 = vrot.slane %v2599_v20, %v5446_v7  ;;  %v2474_v45 = vsel %vm5489_vm8, %v3785_v39, %v2473_v26  ;;  %v2826_v58 = vld [vmem:[#allocation2 + $0xcb8] sm:$0xff]  ;;  %v2827_v39 = vld [vmem:[#allocation2 + $0xcc0] sm:$0xff] }
 0x6ce   :  { %v2510_v0 = vcombine.low %v2467_v16, %v2470_v15  ;;  %v2511_v9 = vcombine.low %v2474_v45, %v2477_v37  ;;  %v2718_v32 = vcombine.low %v2710_v43, %v5935_v52  ;;  %v2835_v52 = vld [vmem:[#allocation2 + $0xd00] sm:$0xff]  ;;  %v5193_v20 = vpack.c.bf16 %v2827_v39, %v2826_v58  ;;  %v2836_v16 = vld [vmem:[#allocation2 + $0xd08] sm:$0xff]  ;;  %v2837_v37 = vld [vmem:[#allocation2 + $0xd10] sm:$0xff] }
 0x6cf   :  { %v2614_v53 = vcombine.low %v2606_v41, %v2613_v34  ;;  %v5181_v4 = vpack.c.bf16 %v2835_v52, %v2834_v49  ;;  %v2828_v43 = vld [vmem:[#allocation2 + $0xcc8] sm:$0xff]  ;;  %v5184_v15 = vpack.c.bf16 %v2837_v37, %v2836_v16  ;;  %v2829_v41 = vld [vmem:[#allocation2 + $0xcd0] sm:$0xff]  ;;  %v2838_v45 = vld [vmem:[#allocation2 + $0xd18] sm:$0xff]  ;;  %v3105_v16 = vsub.s32 3, %v5443_v5 }
 0x6d0   :  { %v2518_v59 = vrot.slane %v2510_v0, %v5446_v7  ;;  %v2525_v60 = vrot.slane %v2511_v9, %v5446_v7  ;;  %v5163_v7 = vpack.c.bf16 %v2691_v11, %v2690_v6  ;;  %v5196_v34 = vpack.c.bf16 %v2829_v41, %v2828_v43  ;;  %v2839_v0 = vld [vmem:[#allocation2 + $0xd20] sm:$0xff]  ;;  %v2830_v9 = vld [vmem:[#allocation2 + $0xcd8] sm:$0xff]  ;;  %v3012_v49 = vld [vmem:[#allocation2 + $0xd70] sm:$0xff] }
 0x6d1   :  { %4501 = vmatmul.mubr.f32.vlgmr.msra.gmra.mrb[42].mxu0 %v2614_v53  ;;  %v5187_v46 = vpack.c.bf16 %v2839_v0, %v2838_v45  ;;  %v2841_v53 = vld [vmem:[#allocation2 + $0xd30] sm:$0xff]  ;;  %v3101_v52 = vld [vmem:[#allocation2 + $0xda8] sm:$0xff]  ;;  %v3199_v37 = vld [vmem:[#allocation2 + $0xe00] sm:$0xff] }
 0x6d2   :  { %v2526_v54 = vcombine.low %v2518_v59, %v2525_v60  ;;  %4554 = vmatprep.mubr.msk.f32.mxu0 %vm5406_vm0, %v5407_v2  ;;  %5182 = vmatpush3.bf16.msra.mxu0 %v5181_v4  ;;  %v5199_v59 = vpack.c.bf16 %v2831_v51, %v2830_v9  ;;  %v2832_v60 = vld [vmem:[#allocation2 + $0xce8] sm:$0xff]  ;;  %v3102_v58 = vld [vmem:[#allocation2 + $0xdb0] sm:$0xff] }
 0x6d3   :  { %5183 = vmatprep.subr.bf16.mxu0 %v5405_v1  ;;  %v5226_v39 = vpack.c.bf16 %v3102_v58, %v3101_v52  ;;  %v3200_v43 = vld [vmem:[#allocation2 + $0xe08] sm:$0xff] }
 0x6d4   :  { %4466 = vmatmul.mubr.f32.vlgmr.msra.gmra.mrb[30].mxu1 %v2526_v54  ;;  %v3192_v41 = vld [vmem:[#allocation2 + $0xdc8] sm:$0xff]  ;;  %v5229_v0 = vpack.c.bf16 %v3200_v43, %v3199_v37 }
 0x6d5   :  { %5158 = vmatpush3.bf16.msra.mxu1 %v5157_v21  ;;  %4535 = vmatprep.mubr.msk.f32.mxu1 %vm5406_vm0, %v5407_v2  ;;  %v2833_v21 = vld [vmem:[#allocation2 + $0xcf0] sm:$0xff] }
 0x6d6   :  { %5159 = vmatprep.subr.bf16.mxu1 %v5405_v1  ;;  %5185 = vmatpush3.bf16.msra.mxu0 %v5184_v15  ;;  %v5202_v62 = vpack.c.bf16 %v2833_v21, %v2832_v60  ;;  %v3191_v15 = vld [vmem:[#allocation2 + $0xdc0] sm:$0xff] }
 0x6d7   :  { %5186 = vmatprep.subr.bf16.mxu0 %v5405_v1  ;;  %v5241_v51 = vpack.c.bf16 %v3192_v41, %v3191_v15 }
 0x6d9   :  { %5161 = vmatpush3.bf16.msra.mxu1 %v5160_v35 }
 0x6da   :  { %5162 = vmatprep.subr.bf16.mxu1 %v5405_v1  ;;  %5188 = vmatpush3.bf16.msra.mxu0 %v5187_v46 }
 0x6db   :  { %5189 = vmatprep.subr.bf16.mxu0 %v5405_v1 }
 0x6dd   :  { %5164 = vmatpush3.bf16.msra.mxu1 %v5163_v7  ;;  %v3787_v7 = vld [vmem:[#allocation2 + $0xca8] ss:$0 sm:$0xff] }
 0x6de   :  { %5165 = vmatprep.subr.bf16.mxu1 %v5405_v1 }
 0x6e1   :  { %5167 = vmatpush3.bf16.msra.mxu1 %v5166_v31 }
 0x6e2   :  { %5168 = vmatprep.subr.bf16.mxu1 %v5405_v1 }
 0x6e5   :  { %5170 = vmatpush3.bf16.msra.mxu1 %v5169_v56  ;;  %v2844_v56 = vsub.s32 1, %v5443_v5 }
 0x6e6   :  { %5171 = vmatprep.subr.bf16.mxu1 %v5405_v1 }
 0x6e9   :  { %5173 = vmatpush3.bf16.msra.mxu1 %v5172_v8  ;;  %v3095_v8 = vld [vmem:[#allocation2 + $0xd78] sm:$0xff] }
 0x6ea   :  { %5174 = vmatprep.subr.bf16.mxu1 %v5405_v1  ;;  %v5217_v40 = vpack.c.bf16 %v3096_v10, %v3095_v8  ;;  %v3348_v8 = vld [vmem:[#allocation2 + $0xe48] sm:$0xff]  ;;  %v3426_v10 = vld [vmem:[#allocation2 + $0xe80] sm:$0xff] }
 0x6ed   :  { %5176 = vmatpush3.bf16.msra.mxu1 %v5175_v14  ;;  %v5205_v14 = vpack.c.bf16 %v3006_v17, %v3005_v44  ;;  %v3197_v44 = vld [vmem:[#allocation2 + $0xdf0] sm:$0xff]  ;;  %v3347_v17 = vld [vmem:[#allocation2 + $0xe40] sm:$0xff] }
 0x6ee   :  { %5177 = vmatprep.subr.bf16.mxu1 %v5405_v1 }
 0x6f1   :  { %5179 = vmatpush3.bf16.msra.mxu1 %v5178_v61 }
 0x6f2   :  { %5192 = vmatprep.subr.bf16.mxu1 %v5405_v1 }
 0x6f4   :  { %4536 = vmatmul.mubr.f32.vlgmr.msra.gmra.mrb[32].mxu1 %v2718_v32  ;;  %v2840_v32 = vld [vmem:[#allocation2 + $0xd28] sm:$0xff] }
 0x6f5   :  { %4573 = vmatprep.mubr.msk.f32.mxu1 %vm5406_vm0, %v5407_v2  ;;  %5194 = vmatpush3.bf16.msra.mxu1 %v5193_v20  ;;  %v5190_v54 = vpack.c.bf16 %v2841_v53, %v2840_v32  ;;  %v3015_v20 = vsub.s32 2, %v5443_v5  ;;  %v3201_v32 = vld [vmem:[#allocation2 + $0xe10] sm:$0xff]  ;;  %v3202_v5 = vld [vmem:[#allocation2 + $0xe18] sm:$0xff] }
 0x6f6   :  { %5195 = vmatprep.subr.bf16.mxu1 %v5405_v1  ;;  %v3193_v53 = vld [vmem:[#allocation2 + $0xdd0] sm:$0xff] }
 0x6f7   :  { %5191 = vmatpush3.bf16.msra.mxu0 %v5190_v54  ;;  %v5232_v54 = vpack.c.bf16 %v3202_v5, %v3201_v32 }
 0x6f8   :  { %5204 = vmatprep.subr.bf16.mxu0 %v5405_v1 }
 0x6f9   :  { %5197 = vmatpush3.bf16.msra.mxu1 %v5196_v34 }
 0x6fa   :  { %5198 = vmatprep.subr.bf16.mxu1 %v5405_v1 }
 0x6fd   :  { %5200 = vmatpush3.bf16.msra.mxu1 %v5199_v59  ;;  %v3194_v59 = vld [vmem:[#allocation2 + $0xdd8] sm:$0xff] }
 0x6fe   :  { %5201 = vmatprep.subr.bf16.mxu1 %v5405_v1 }
 0x701   :  { %5203 = vmatpush3.bf16.msra.mxu1 %v5202_v62  ;;  %v5244_v62 = vpack.c.bf16 %v3194_v59, %v3193_v53  ;;  %v3798_v53 = vld [vmem:[#allocation2 + $0xec0] ss:$0 sm:$0xff] }
 0x702   :  { %5216 = vmatprep.subr.bf16.mxu1 %v5405_v1 }
 0x7a4   :  { %v2682_v18 = vpop.f32.mrb[42].mxu0 }
 0x7a5   :  { %v4502_v19 = vpop.f32.mrb[43].mxu0 }
 0x7a7   :  { %v2594_v47 = vpop.f32.mrb[30].mxu1 }
 0x7a8   :  { %v2683_v22 = vadd.f32 %v2682_v18, %v2594_v47  ;;  %v4467_v23 = vpop.f32.mrb[31].mxu1  ;;  %v3007_v47 = vld [vmem:[#allocation2 + $0xd48] sm:$0xff] }
 0x7a9   :  { %v3097_v23 = vld [vmem:[#allocation2 + $0xd88] sm:$0xff] }
 0x7c7   :  { %v2786_v24 = vpop.f32.mrb[32].mxu1 }
 0x7c8   :  { %v2790_v26 = vadd.f32 %v2786_v24, %v2683_v22  ;;  %v4537_v42 = vpop.f32.mrb[33].mxu1  ;;  %v3008_v22 = vld [vmem:[#allocation2 + $0xd50] sm:$0xff] }
 0x7c9   :  { %v3098_v24 = vld [vmem:[#allocation2 + $0xd90] sm:$0xff]  ;;  %v5208_v42 = vpack.c.bf16 %v3008_v22, %v3007_v47 }
 0x7ca   :  { %v2796_v48 = vadd.f32 %v3786_v27, %v2790_v26 }
 0x7cc   :  { %v2797_v28 = vmax.f32 %v2796_v48, 0.0  ;;  %v5220_v48 = vpack.c.bf16 %v3098_v24, %v3097_v23  ;;  %v3351_v23 = vld [vmem:[#allocation2 + $0xe60] sm:$0xff]  ;;  %v3352_v24 = vld [vmem:[#allocation2 + $0xe68] sm:$0xff] }
 0x7ce   :  { %v2799_v29 = vsel %vm2798_vm9, %v2797_v28, 0.0 }
 0x7cf   :  { %2800 = vadd.xlane.f32.xlu0 %v2799_v29  ;;  %v3010_v29 = vld [vmem:[#allocation2 + $0xd60] sm:$0xff] }
 0x85c   :  { %v2801_v55 = vpop.xlane.xlu0 %2800 }
 0x85d   :  { %v2802_v33 = vmul.f32 0.015625, %v2801_v55  ;;  %v3099_v55 = vld [vmem:[#allocation2 + $0xd98] sm:$0xff] }
 0x85f   :  { %v2803_v63 = vsub.f32 %v2797_v28, %v2802_v33  ;;  %v3009_v28 = vld [vmem:[#allocation2 + $0xd58] sm:$0xff]  ;;  %v3100_v33 = vld [vmem:[#allocation2 + $0xda0] sm:$0xff] }
 0x861   :  { %v2804_v36 = vmul.f32 %v2803_v63, %v2803_v63 }
 0x863   :  { %v2805_v38 = vsel %vm2798_vm9, %v2804_v36, 0.0  ;;  %v5223_v36 = vpack.c.bf16 %v3100_v33, %v3099_v55  ;;  %v3432_v55 = vld [vmem:[#allocation2 + $0xeb0] sm:$0xff]  ;;  %v3433_v33 = vld [vmem:[#allocation2 + $0xeb8] sm:$0xff] }
 0x864   :  { %2806 = vadd.xlane.f32.xlu1 %v2805_v38  ;;  %v3011_v38 = vld [vmem:[#allocation2 + $0xd68] sm:$0xff] }
 0x865   :  { %v5214_v4 = vpack.c.bf16 %v3012_v49, %v3011_v38 }
 0x8f1   :  { %v2807_v3 = vpop.xlane.xlu1 %2806 }
 0x8f2   :  { %v2808_v35 = vmul.f32 0.015625, %v2807_v3  ;;  %v3203_v3 = vld [vmem:[#allocation2 + $0xe20] sm:$0xff] }
 0x8f4   :  { %v2809_v6 = vadd.f32 1e-05, %v2808_v35  ;;  %v3204_v35 = vld [vmem:[#allocation2 + $0xe28] sm:$0xff] }
 0x8f6   :  { %5342 = vrsqrt.f32 %v2809_v6  ;;  %v3195_v6 = vld [vmem:[#allocation2 + $0xde0] sm:$0xff] }
 0x900   :  { %v5343_v11 = vpop.eup %5342 }
 0x901   :  { %v2811_v12 = vmul.f32 %v5343_v11, %v2803_v63  ;;  %v5211_v63 = vpack.c.bf16 %v3010_v29, %v3009_v28  ;;  %v3196_v11 = vld [vmem:[#allocation2 + $0xde8] sm:$0xff]  ;;  %v3353_v28 = vld [vmem:[#allocation2 + $0xe70] sm:$0xff]  ;;  %v3354_v29 = vld [vmem:[#allocation2 + $0xe78] sm:$0xff] }
 0x903   :  { %v2817_v31 = vmul.f32 %v3787_v7, %v2811_v12  ;;  %v5235_v7 = vpack.c.bf16 %v3204_v35, %v3203_v3  ;;  %v5247_v12 = vpack.c.bf16 %v3196_v11, %v3195_v6  ;;  %v3793_v3 = vld [vmem:[#allocation2 + $0xdb8] ss:$0 sm:$0xff] }
 0x905   :  { %v2823_v50 = vadd.f32 %v3788_v30, %v2817_v31  ;;  %v3205_v30 = vld [vmem:[#allocation2 + $0xe30] sm:$0xff]  ;;  %v3206_v31 = vld [vmem:[#allocation2 + $0xe38] sm:$0xff] }
 0x907   :  { %v2825_v13 = vcombine.high %v2823_v50, %v2823_v50  ;;  %v2845_v57 = vrot.slane %v2823_v50, %v2844_v56  ;;  %v2927_v18 = vrot.slane %v2823_v50, %v2926_v25  ;;  %v3016_v9 = vrot.slane %v2823_v50, %v3015_v20 }
 0x908   :  { %v3106_v46 = vrot.slane %v2823_v50, %v3105_v16  ;;  %v3198_v50 = vld [vmem:[#allocation2 + $0xdf8] sm:$0xff] }
 0x909   :  { %v2849_v61 = vrot.slane %v2825_v13, %v2844_v56  ;;  %v2931_v19 = vrot.slane %v2825_v13, %v2926_v25  ;;  %v3020_v34 = vrot.slane %v2825_v13, %v3015_v20  ;;  %v3110_v45 = vrot.slane %v2825_v13, %v3105_v16  ;;  %v3427_v13 = vld [vmem:[#allocation2 + $0xe88] sm:$0xff] }
 0x90a   :  { %v5238_v56 = vpack.c.bf16 %v3206_v31, %v3205_v30  ;;  %v5250_v25 = vpack.c.bf16 %v3198_v50, %v3197_v44 }
 0x90b   :  { %v5978_v27 = vsel %vm2850_vm10, %v2849_v61, %v2845_v57  ;;  %v5981_v26 = vsel %vm2850_vm10, %v2931_v19, %v2927_v18  ;;  %v6002_v60 = vsel %vm2850_vm10, %v3020_v34, %v3016_v9  ;;  %v6005_v21 = vsel %vm2850_vm10, %v3110_v45, %v3106_v46  ;;  %v3349_v57 = vld [vmem:[#allocation2 + $0xe50] sm:$0xff]  ;;  %v3350_v61 = vld [vmem:[#allocation2 + $0xe58] sm:$0xff] }
 0x90c   :  { %4555 = vmatmul.mubr.msk.f32.vlgmr.msra.gmra.mrb[44].mxu0 %vm2798_vm9, %v5978_v27  ;;  %4574 = vmatmul.mubr.msk.f32.vlgmr.msra.gmra.mrb[34].mxu1 %vm2798_vm9, %v5981_v26  ;;  %v3428_v18 = vld [vmem:[#allocation2 + $0xe90] sm:$0xff]  ;;  %v3429_v19 = vld [vmem:[#allocation2 + $0xe98] sm:$0xff]  ;;  %v5256_v47 = vpack.c.bf16 %v3350_v61, %v3349_v57  ;;  %v3550_v61 = vld [vmem:[#allocation2 + $0xf08] sm:$0xff] }
 0x90d   :  { %5206 = vmatpush3.bf16.msra.mxu0 %v5205_v14  ;;  %5218 = vmatpush3.bf16.msra.mxu1 %v5217_v40  ;;  %v5253_v14 = vpack.c.bf16 %v3348_v8, %v3347_v17  ;;  %v5265_v40 = vpack.c.bf16 %v3427_v13, %v3426_v10  ;;  %v5268_v22 = vpack.c.bf16 %v3429_v19, %v3428_v18  ;;  %v3546_v8 = vld [vmem:[#allocation2 + $0xee8] sm:$0xff]  ;;  %v3547_v10 = vld [vmem:[#allocation2 + $0xef0] sm:$0xff] }
 0x90e   :  { %5207 = vmatprep.subr.bf16.mxu0 %v5405_v1  ;;  %5219 = vmatprep.subr.bf16.mxu1 %v5405_v1  ;;  %v5280_v13 = vpack.c.bf16 %v3547_v10, %v3546_v8  ;;  %v3551_v18 = vld [vmem:[#allocation2 + $0xf10] sm:$0xff] }
 0x90f   :  { %4592 = vmatprep.mubr.msk.f32.mxu0 %vm5406_vm0, %v5407_v2  ;;  %4611 = vmatprep.mubr.msk.f32.mxu1 %vm5406_vm0, %v5407_v2  ;;  %v5286_v19 = vpack.c.bf16 %v3551_v18, %v3550_v61 }
 0x911   :  { %5209 = vmatpush3.bf16.msra.mxu0 %v5208_v42  ;;  %5221 = vmatpush3.bf16.msra.mxu1 %v5220_v48  ;;  %v3430_v42 = vld [vmem:[#allocation2 + $0xea0] sm:$0xff]  ;;  %v3431_v48 = vld [vmem:[#allocation2 + $0xea8] sm:$0xff] }
 0x912   :  { %5210 = vmatprep.subr.bf16.mxu0 %v5405_v1  ;;  %5222 = vmatprep.subr.bf16.mxu1 %v5405_v1 }
 0x915   :  { %5212 = vmatpush3.bf16.msra.mxu0 %v5211_v63  ;;  %5224 = vmatpush3.bf16.msra.mxu1 %v5223_v36  ;;  %v5262_v63 = vpack.c.bf16 %v3354_v29, %v3353_v28  ;;  %v5274_v36 = vpack.c.bf16 %v3433_v33, %v3432_v55  ;;  %v3636_v29 = vld [vmem:[#allocation2 + $0xf20] sm:$0xff]  ;;  %v3637_v55 = vld [vmem:[#allocation2 + $0xf28] sm:$0xff] }
 0x916   :  { %5213 = vmatprep.subr.bf16.mxu0 %v5405_v1  ;;  %5225 = vmatprep.subr.bf16.mxu1 %v5405_v1  ;;  %v5289_v33 = vpack.c.bf16 %v3637_v55, %v3636_v29 }
 0x919   :  { %5215 = vmatpush3.bf16.msra.mxu0 %v5214_v4  ;;  %5227 = vmatpush3.bf16.msra.mxu1 %v5226_v39 }
 0x91a   :  { %5228 = vmatprep.subr.bf16.mxu0 %v5405_v1  ;;  %5240 = vmatprep.subr.bf16.mxu1 %v5405_v1 }
 0x91c   :  { %4593 = vmatmul.mubr.msk.f32.vlgmr.msra.gmra.mrb[46].mxu0 %vm2798_vm9, %v6002_v60  ;;  %4612 = vmatmul.mubr.msk.f32.vlgmr.msra.gmra.mrb[36].mxu1 %vm2798_vm9, %v6005_v21 }
 0x91d   :  { %5230 = vmatpush3.bf16.msra.mxu0 %v5229_v0  ;;  %5242 = vmatpush3.bf16.msra.mxu1 %v5241_v51 }
 0x91e   :  { %5231 = vmatprep.subr.bf16.mxu0 %v5405_v1  ;;  %5243 = vmatprep.subr.bf16.mxu1 %v5405_v1 }
 0x91f   :  { %4630 = vmatprep.mubr.msk.f32.mxu0 %vm5406_vm0, %v5407_v2  ;;  %4649 = vmatprep.mubr.msk.f32.mxu1 %vm5406_vm0, %v5407_v2 }
 0x921   :  { %5233 = vmatpush3.bf16.msra.mxu0 %v5232_v54  ;;  %5245 = vmatpush3.bf16.msra.mxu1 %v5244_v62 }
 0x922   :  { %5234 = vmatprep.subr.bf16.mxu0 %v5405_v1  ;;  %5246 = vmatprep.subr.bf16.mxu1 %v5405_v1 }
 0x925   :  { %5236 = vmatpush3.bf16.msra.mxu0 %v5235_v7  ;;  %5248 = vmatpush3.bf16.msra.mxu1 %v5247_v12 }
 0x926   :  { %5237 = vmatprep.subr.bf16.mxu0 %v5405_v1  ;;  %5249 = vmatprep.subr.bf16.mxu1 %v5405_v1 }
 0x929   :  { %5239 = vmatpush3.bf16.msra.mxu0 %v5238_v56  ;;  %5251 = vmatpush3.bf16.msra.mxu1 %v5250_v25  ;;  %v3544_v56 = vld [vmem:[#allocation2 + $0xed8] sm:$0xff]  ;;  %v3545_v25 = vld [vmem:[#allocation2 + $0xee0] sm:$0xff] }
 0x92a   :  { %5252 = vmatprep.subr.bf16.mxu0 %v5405_v1  ;;  %5264 = vmatprep.subr.bf16.mxu1 %v5405_v1  ;;  %v5277_v17 = vpack.c.bf16 %v3545_v25, %v3544_v56 }
 0x92c   :  { %4631 = vmatmul.mubr.msk.f32.vlgmr.msra.gmra.mrb[48].mxu0 %vm2798_vm9, %v5978_v27  ;;  %4650 = vmatmul.mubr.msk.f32.vlgmr.msra.gmra.mrb[38].mxu1 %vm2798_vm9, %v5981_v26  ;;  %v5259_v27 = vpack.c.bf16 %v3352_v24, %v3351_v23  ;;  %v5271_v26 = vpack.c.bf16 %v3431_v48, %v3430_v42  ;;  %v3800_v42 = vld [vmem:[#allocation2 + $0xec8] ss:$0 sm:$0xff] }
 0x92d   :  { %5254 = vmatpush3.bf16.msra.mxu0 %v5253_v14  ;;  %5266 = vmatpush3.bf16.msra.mxu1 %v5265_v40  ;;  %v3548_v14 = vld [vmem:[#allocation2 + $0xef8] sm:$0xff]  ;;  %v3549_v40 = vld [vmem:[#allocation2 + $0xf00] sm:$0xff] }
 0x92e   :  { %5255 = vmatprep.subr.bf16.mxu0 %v5405_v1  ;;  %5267 = vmatprep.subr.bf16.mxu1 %v5405_v1  ;;  %v5283_v57 = vpack.c.bf16 %v3549_v40, %v3548_v14 }
 0x92f   :  { %4668 = vmatprep.mubr.msk.f32.mxu0 %vm5406_vm0, %v5407_v2  ;;  %4687 = vmatprep.mubr.msk.f32.mxu1 %vm5406_vm0, %v5407_v2 }
 0x931   :  { %5257 = vmatpush3.bf16.msra.mxu0 %v5256_v47  ;;  %5269 = vmatpush3.bf16.msra.mxu1 %v5268_v22 }
 0x932   :  { %5258 = vmatprep.subr.bf16.mxu0 %v5405_v1  ;;  %5270 = vmatprep.subr.bf16.mxu1 %v5405_v1 }
 0x935   :  { %5260 = vmatpush3.bf16.msra.mxu0 %v5259_v27  ;;  %5272 = vmatpush3.bf16.msra.mxu1 %v5271_v26  ;;  %v3801_v27 = vld [vmem:[#allocation2 + $0xed0] ss:$0 sm:$0xff] }
 0x936   :  { %5261 = vmatprep.subr.bf16.mxu0 %v5405_v1  ;;  %5273 = vmatprep.subr.bf16.mxu1 %v5405_v1 }
 0x939   :  { %5263 = vmatpush3.bf16.msra.mxu0 %v5262_v63  ;;  %5275 = vmatpush3.bf16.msra.mxu1 %v5274_v36  ;;  %v3638_v63 = vld [vmem:[#allocation2 + $0xf30] sm:$0xff]  ;;  %v3639_v36 = vld [vmem:[#allocation2 + $0xf38] sm:$0xff] }
 0x93a   :  { %5276 = vmatprep.subr.bf16.mxu0 %v5405_v1  ;;  %5288 = vmatprep.subr.bf16.mxu1 %v5405_v1 }
 0x93c   :  { %4669 = vmatmul.mubr.msk.f32.vlgmr.msra.gmra.mrb[50].mxu0 %vm2798_vm9, %v6002_v60  ;;  %4688 = vmatmul.mubr.msk.f32.vlgmr.msra.gmra.mrb[40].mxu1 %vm2798_vm9, %v6005_v21 }
 0x93d   :  { %4706 = vmatprep.mubr.msk.f32.mxu0 %vm5406_vm0, %v5407_v2  ;;  %4725 = vmatprep.mubr.msk.f32.mxu1 %vm5406_vm0, %v5407_v2 }
 0x93e   :  { %5278 = vmatpush3.bf16.msra.mxu0 %v5277_v17  ;;  %5290 = vmatpush3.bf16.msra.mxu1 %v5289_v33 }
 0x93f   :  { %5279 = vmatprep.subr.bf16.mxu0 %v5405_v1  ;;  %5291 = vmatprep.subr.bf16.mxu1 %v5405_v1 }
 0x942   :  { %5281 = vmatpush3.bf16.msra.mxu0 %v5280_v13 }
 0x943   :  { %5282 = vmatprep.subr.bf16.mxu0 %v5405_v1 }
 0x946   :  { %5284 = vmatpush3.bf16.msra.mxu0 %v5283_v57 }
 0x947   :  { %5285 = vmatprep.subr.bf16.mxu0 %v5405_v1 }
 0x94a   :  { %5287 = vmatpush3.bf16.msra.mxu0 %v5286_v19 }
 0x9df   :  { %v2920_v38 = vpop.f32.mrb[44].mxu0  ;;  %v3001_v49 = vpop.f32.mrb[34].mxu1 }
 0x9e0   :  { %v3002_v52 = vadd.f32 %v3001_v49, %v2920_v38  ;;  %v4556_v58 = vpop.f32.mrb[45].mxu0  ;;  %v4575_v4 = vpop.f32.mrb[35].mxu1  ;;  %v3640_v38 = vld [vmem:[#allocation2 + $0xf40] sm:$0xff]  ;;  %v5292_v49 = vpack.c.bf16 %v3639_v36, %v3638_v63 }
 0x9e1   :  { %v3642_v4 = vld [vmem:[#allocation2 + $0xf50] sm:$0xff] }
 0x9e2   :  { %5293 = vmatpush3.bf16.msra.mxu1 %v5292_v49 }
 0x9e3   :  { %5294 = vmatprep.subr.bf16.mxu1 %v5405_v1 }
 0x9ef   :  { %v3090_v39 = vpop.f32.mrb[46].mxu0  ;;  %v3180_v20 = vpop.f32.mrb[36].mxu1 }
 0x9f0   :  { %v3094_v16 = vadd.f32 %v3090_v39, %v3002_v52  ;;  %v4594_v37 = vpop.f32.mrb[47].mxu0  ;;  %v4613_v43 = vpop.f32.mrb[37].mxu1  ;;  %v3641_v52 = vld [vmem:[#allocation2 + $0xf48] sm:$0xff]  ;;  %v3643_v39 = vld [vmem:[#allocation2 + $0xf58] sm:$0xff] }
 0x9f1   :  { %v5295_v58 = vpack.c.bf16 %v3641_v52, %v3640_v38 }
 0x9f2   :  { %v3184_v15 = vadd.f32 %v3180_v20, %v3094_v16  ;;  %v5298_v20 = vpack.c.bf16 %v3643_v39, %v3642_v4  ;;  %v3802_v16 = vld [vmem:[#allocation2 + $0xf18] ss:$0 sm:$0xff] }
 0x9f3   :  { %5296 = vmatpush3.bf16.msra.mxu1 %v5295_v58 }
 0x9f4   :  { %v3190_v35 = vadd.f32 %v3793_v3, %v3184_v15  ;;  %5297 = vmatprep.subr.bf16.mxu1 %v5405_v1 }
 0x9f7   :  { %5299 = vmatpush3.bf16.msra.mxu1 %v5298_v20 }
 0x9ff   :  { %v3273_v41 = vpop.f32.mrb[48].mxu0  ;;  %v3343_v34 = vpop.f32.mrb[38].mxu1 }
 0xa00   :  { %v3344_v45 = vadd.f32 %v3343_v34, %v3273_v41  ;;  %v4632_v0 = vpop.f32.mrb[49].mxu0  ;;  %v4651_v9 = vpop.f32.mrb[39].mxu1 }
 0xa01   :  { %v3805_v9 = vld [vmem:[#allocation2 + $0xf60] ss:$0 sm:$0xff] }
 0xa0f   :  { %v3421_v46 = vpop.f32.mrb[50].mxu0  ;;  %v3500_v51 = vpop.f32.mrb[40].mxu1 }
 0xa10   :  { %v3425_v32 = vadd.f32 %v3421_v46, %v3344_v45  ;;  %v4670_v2 = vpop.f32.mrb[51].mxu0  ;;  %v4689_v5 = vpop.f32.mrb[41].mxu1 }
 0xa12   :  { %v3504_v59 = vadd.f32 %v3500_v51, %v3425_v32 }
 0xa14   :  { %v3510_v60 = vadd.f32 %v3798_v53, %v3504_v59 }
 0xa16   :  { %v3799_v21 = vmul.f32 -1.442695, %v3510_v60 }
 0xa18   :  { %5344 = vpow2.f32 %v3799_v21 }
 0xa22   :  { %v5345_v54 = vpop.eup %5344 }
 0xa23   :  { %v3514_v62 = vadd.f32 1.0, %v5345_v54 }
 0xa25   :  { %5346 = vrcp.f32 %v3514_v62 }
 0xa2f   :  { %v5347_v6 = vpop.eup %5346 }
 0xa30   :  { %v3517_v11 = vmul.f32 %v5347_v6, %v3190_v35 }
 0xa32   :  { %v3519_v7 = vsel %vm3518_vm11, %v3517_v11, 0.0 }
 0xa33   :  { %3520 = vadd.xlane.f32.xlu0 %v3519_v7 }
 0xac0   :  { %v3521_v12 = vpop.xlane.xlu0 %3520 }
 0xac1   :  { %v3522_v30 = vmul.f32 0.015625, %v3521_v12 }
 0xac3   :  { %v3523_v31 = vsub.f32 %v3517_v11, %v3522_v30 }
 0xac5   :  { %v3524_v44 = vmul.f32 %v3523_v31, %v3523_v31 }
 0xac7   :  { %v3525_v50 = vsel %vm3518_vm11, %v3524_v44, 0.0 }
 0xac8   :  { %3526 = vadd.xlane.f32.xlu1 %v3525_v50 }
 0xb55   :  { %v3527_v47 = vpop.xlane.xlu1 %3526 }
 0xb56   :  { %v3528_v22 = vmul.f32 0.015625, %v3527_v47 }
 0xb58   :  { %v3529_v23 = vadd.f32 1e-05, %v3528_v22 }
 0xb5a   :  { %5348 = vrsqrt.f32 %v3529_v23 }
 0xb64   :  { %v5349_v24 = vpop.eup %5348 }
 0xb65   :  { %v3531_v48 = vmul.f32 %v5349_v24, %v3523_v31 }
 0xb67   :  { %v3537_v26 = vmul.f32 %v3800_v42, %v3531_v48 }
 0xb69   :  { %v3543_v28 = vadd.f32 %v3801_v27, %v3537_v26 }
 0xb6b   :  { %4707 = vmatmul.mubr.msk.f32.vlgmr.msra.gmra.mrb[52].mxu0 %vm2798_vm9, %v3543_v28 }
 0xc3e   :  { %v3626_v37 = vpop.f32.mrb[52].mxu0 }
 0xc3f   :  { %v3627_v43 = vadd.f32 %v3802_v16, %v3626_v37  ;;  %v4708_v15 = vpop.f32.mrb[53].mxu0 }
 0xc41   :  { %v3804_v41 = vmul.f32 -1.442695, %v3627_v43 }
 0xc43   :  { %5350 = vpow2.f32 %v3804_v41 }
 0xc4d   :  { %v5351_v34 = vpop.eup %5350 }
 0xc4e   :  { %v3633_v45 = vadd.f32 1.0, %v5351_v34 }
 0xc50   :  { %5352 = vrcp.f32 %v3633_v45 }
 0xc5a   :  { %v5353_v0 = vpop.eup %5352 }
 0xc5b   :  { %4726 = vmatmul.mubr.msk.f32.vlgmr.msra.gmra.mrb[42].mxu1 %vm2798_vm9, %v5353_v0 }
 0xd2e   :  { %v3718_v46 = vpop.f32.mrb[42].mxu1 }
 0xd2f   :  { %v3719_v51 = vadd.f32 %v3805_v9, %v3718_v46  ;;  %v4727_v1 = vpop.f32.mrb[43].mxu1 }
 0xd31   :  { %3723 = vst.msk [vmem:[#allocation5] sm:$0x3] %vm3722_vm12, %v3719_v51 }
 0xd32   :  { %5387 = shalt.err (!%p5384_p12)
}
 0xd33   :  { %s5388_s6 = scalar_lea.hbm %s6069_s2, 32 }
 0xd34   :  { %p5389_p13 = scmp.ne.s32.totalorder %s6069_s2, %s5388_s6  ;;  %p5392_p0 = scmp.lt.u32.totalorder %s5388_s6, %s6069_s2 }
 0xd36   :  { %p5394_p1 = pnand %p5392_p0, %p5389_p13 }
 0xd38   :  { %5397 = shalt.err (!%p5394_p1)
}
 0xd39   :  { %3733 = dma.vmem_to_hbm [thread:$0]  %s3731_s30, 32, %s6069_s2, [#allocation4]  }
 0xd3a   :  { %5400 = dma.done.wait [#allocation4], 32  }
 0xd3b   :  { %5401 = vsyncadd [#allocation4], 4294967264 }
 0xd3c   :  { %3737 = vsyncpa [#allocation3], 1 }
 0xd3d   :  { %3738 = vsyncpa [#allocation4], 1 }

</bundles_post_ra>
